<compile_context>
chip_gen: v7x
topology: tpu7x:2x2x1
jax: 0.10.0
libtpu: 0.0.40
codegen_flags: <defaults>
</compile_context>

<pallas_src>
import math

import jax
import jax.numpy as jnp
from jax.experimental import pallas as pl
from jax.experimental.pallas import tpu as pltpu

# ----------------------------- configuration --------------------------------
H = 128                                 # hidden size (stand-in for BERT's 768)
S = 8                                   # sequence length
B = 2                                   # batch size
NH = 4                                  # attention heads
DH = H // NH                            # head dim
FF = 4 * H                              # FFN intermediate size
NLAYERS = 2                             # encoder layers (stand-in for 12)
NUM_TOPICS = (4, 8, 16, 8, 4, 8, 4)     # num_topics_each_level (7 levels)
TOTAL_TOPICS = sum(NUM_TOPICS)          # 52
HEAD_N = 128                            # lane-dense head width (>= TOTAL_TOPICS + 1)
LN_EPS = 1e-12                          # BERT layernorm eps
TB = 2 * B                              # stacked sequences (both towers)
M = TB * S                              # stacked matmul rows (32)
QKV_N = 2 * H + NH * H                  # fused [Q | K | Vo_h0..h3] width = 768
OUT_ROWS = 8                            # padded output rows -> one (8,128) tile
LOG2_S = S.bit_length() - 1
assert S == 1 << LOG2_S

_NT = (((1,), (1,)), ((), ()))          # dot_general dims for x @ y.T


# ------------------------------ kernel helpers -------------------------------
def _layernorm(x, g, b):
    mu = jnp.mean(x, axis=-1, keepdims=True)
    var = jnp.mean((x - mu) ** 2, axis=-1, keepdims=True)
    return (x - mu) * jax.lax.rsqrt(var + LN_EPS) * g + b


def _erf(x):
    # Abramowitz & Stegun 7.1.26 (|err| < 1.5e-7): erf-accurate GELU without
    # relying on an in-kernel lax.erf lowering.
    a1, a2, a3 = 0.254829592, -0.284496736, 1.421413741
    a4, a5, p = -1.453152027, 1.061405429, 0.3275911
    sgn = jnp.where(x >= 0.0, 1.0, -1.0)
    z = jnp.abs(x)
    t = 1.0 / (1.0 + p * z)
    poly = ((((a5 * t + a4) * t + a3) * t + a2) * t + a1) * t
    return sgn * (1.0 - poly * jnp.exp(-z * z))


def _gelu_exact(x):
    # torch.nn.GELU / HF BERT use exact (erf) GELU, not the tanh approximation.
    return 0.5 * x * (1.0 + _erf(x * 0.7071067811865476))


# ------------------------------ fused kernel ---------------------------------
def fused_forward_kernel(x_ref, wqkv_ref, bqkv_ref, vec_ref,
                         wf1_ref, bf1_ref, wf2_ref,
                         wh_ref, bh_ref, out_ref):
    f32 = jnp.float32
    bf16 = jnp.bfloat16

    xf = x_ref[...]                     # (M, H) f32: [tower1 ; tower2] x S rows

    # Block-diagonal additive bias (stacked sequences must not attend across),
    # generated in-kernel (cheap VPU/iota work, no extra input DMA).
    row_seq = jax.lax.shift_right_logical(
        jax.lax.broadcasted_iota(jnp.int32, (M, M), 0), LOG2_S)
    col_seq = jax.lax.shift_right_logical(
        jax.lax.broadcasted_iota(jnp.int32, (M, M), 1), LOG2_S)
    attn_bias = jnp.where(row_seq == col_seq, 0.0, -1e30).astype(f32)

    for l in range(NLAYERS):            # static unroll; all weights VMEM-resident
        vecs = vec_ref[l]               # (6, H) f32
        b_o, g1, be1, g2, be2, b_f2 = (vecs[i:i + 1] for i in range(6))

        # ---- fused projection: one (M,H)@(H,768) bf16 push group -----------
        # cols [0,H): Q (scale folded), [H,2H): K, [2H+h*H, 2H+(h+1)*H): Wv_h@Wo_h
        xb = xf.astype(bf16)
        qkv = jnp.dot(xb, wqkv_ref[l], preferred_element_type=f32) + bqkv_ref[l]

        attn = jnp.zeros((M, H), f32)
        for h in range(NH):
            qh = qkv[:, h * DH:(h + 1) * DH].astype(bf16)          # (M, DH)
            kh = qkv[:, H + h * DH:H + (h + 1) * DH].astype(bf16)  # (M, DH)
            voh = qkv[:, 2 * H + h * H:2 * H + (h + 1) * H].astype(bf16)  # (M, H)

            s = jax.lax.dot_general(qh, kh, _NT, preferred_element_type=f32)
            s = s + attn_bias
            s = s - jnp.max(s, axis=-1, keepdims=True)
            e = jnp.exp(s)
            probs = e * pl.reciprocal(jnp.sum(e, axis=-1, keepdims=True),
                                      approx=True)
            # out-proj already folded into voh; bv @ Wo folded into b_o.
            attn = attn + jnp.dot(probs.astype(bf16), voh,
                                  preferred_element_type=f32)      # (M, H)

        x1 = _layernorm(xf + attn + b_o, g1, be1)

        # ----------------------------------- FFN ----------------------------
        hid = _gelu_exact(jnp.dot(x1.astype(bf16), wf1_ref[l],
                                  preferred_element_type=f32) + bf1_ref[l])
        ffn = jnp.dot(hid.astype(bf16), wf2_ref[l],
                      preferred_element_type=f32) + b_f2
        xf = _layernorm(x1 + ffn, g2, be2)

    # ----- heads: (8, M) selection matrix (means + signed diffs), one full-tile store
    r = jax.lax.broadcasted_iota(jnp.int32, (OUT_ROWS, M), 0)
    c = jax.lax.broadcasted_iota(jnp.int32, (OUT_ROWS, M), 1)
    seq = jax.lax.shift_right_logical(c, LOG2_S)
    inv_s = 1.0 / S
    is_diff = jnp.logical_and(r >= TB, r < TB + B)
    avg8 = jnp.where(jnp.logical_and(r < TB, seq == r), inv_s, 0.0)
    avg8 = avg8 + jnp.where(jnp.logical_and(is_diff, seq == r - TB), inv_s, 0.0)
    avg8 = avg8 + jnp.where(jnp.logical_and(is_diff, seq == r - TB + B), -inv_s, 0.0)

    avg = jnp.dot(avg8.astype(jnp.bfloat16), xf.astype(jnp.bfloat16),
                  preferred_element_type=f32)                       # (8, H)
    # rows 0..TB-1: avg_seq @ W_head + b ; rows TB..TB+B-1: (avg1-avg2) @ W_head + b
    out_ref[...] = jnp.dot(avg.astype(jnp.bfloat16), wh_ref[...],
                           preferred_element_type=f32) + bh_ref[...]


def _fused_call(x_flat, packed):
    vmem = pl.BlockSpec(memory_space=pltpu.MemorySpace.VMEM)
    args = (x_flat, packed["wqkv"], packed["bqkv"], packed["vecs"],
            packed["wf1"], packed["bf1"], packed["wf2"],
            packed["w_head"], packed["b_head"])
    return pl.pallas_call(
        fused_forward_kernel,
        out_shape=jax.ShapeDtypeStruct((OUT_ROWS, HEAD_N), jnp.float32),
        in_specs=[vmem] * len(args),
        out_specs=vmem,
    )(*args)


# ------------------------------ parameter init -------------------------------
def init_params(key):
    std = 0.02

    def dense(k, fan_in, fan_out):
        kw, kb = jax.random.split(k)
        return (jax.random.normal(kw, (fan_in, fan_out), jnp.float32) * std,
                jax.random.normal(kb, (1, fan_out), jnp.float32) * std)

    layers = []
    for _ in range(NLAYERS):
        key, *ks = jax.random.split(key, 7)
        wq, bq = dense(ks[0], H, H)
        wk, bk = dense(ks[1], H, H)
        wv, bv = dense(ks[2], H, H)
        wo, bo = dense(ks[3], H, H)
        wf1, bf1 = dense(ks[4], H, FF)
        wf2, bf2 = dense(ks[5], FF, H)
        layers.append(dict(
            wq=wq, bq=bq, wk=wk, bk=bk, wv=wv, bv=bv, wo=wo, bo=bo,
            wf1=wf1, bf1=bf1, wf2=wf2, bf2=bf2,
            g1=jnp.ones((1, H), jnp.float32), be1=jnp.zeros((1, H), jnp.float32),
            g2=jnp.ones((1, H), jnp.float32), be2=jnp.zeros((1, H), jnp.float32)))

    key, k_sim = jax.random.split(key)
    w_sim, b_sim = dense(k_sim, H, 1)                       # dense_layer: H -> 1

    hw, hb = [], []
    for n in NUM_TOPICS:                                    # dense_layer1..7
        key, kh = jax.random.split(key)
        w, bvec = dense(kh, H, n)
        hw.append(w)
        hb.append(bvec)

    return dict(layers=layers, w_sim=w_sim, b_sim=b_sim,
                w_hier=jnp.concatenate(hw, axis=1),         # (H, TOTAL_TOPICS)
                b_hier=jnp.concatenate(hb, axis=1))         # (1, TOTAL_TOPICS)


def pack_params(params):
    """Re-layout params for the fused kernel (QKV fused, Wo folded, bf16)."""
    scale = 1.0 / math.sqrt(DH)
    wqkv, bqkv, vecs, wf1, bf1, wf2 = [], [], [], [], [], []
    for lp in params["layers"]:
        # Fold the out-projection into V per head: Wvo_h = Wv_h @ Wo_h  (H, H).
        wvo = jnp.concatenate(
            [lp["wv"][:, h * DH:(h + 1) * DH] @ lp["wo"][h * DH:(h + 1) * DH, :]
             for h in range(NH)], axis=1)                       # (H, NH*H)
        # Fused projection weight: [Q*scale | K | Vo_h0..Vo_h3]  -> (H, 768).
        w_fused = jnp.concatenate([lp["wq"] * scale, lp["wk"], wvo], axis=1)
        b_fused = jnp.concatenate([lp["bq"] * scale, lp["bk"],
                                   jnp.zeros((1, NH * H), jnp.float32)], axis=1)
        b_o_folded = lp["bo"] + lp["bv"] @ lp["wo"]             # bv @ Wo folded
        wqkv.append(w_fused)
        bqkv.append(b_fused)
        vecs.append(jnp.concatenate(
            [b_o_folded, lp["g1"], lp["be1"], lp["g2"], lp["be2"], lp["bf2"]],
            axis=0))                                            # (6, H)
        wf1.append(lp["wf1"])
        bf1.append(lp["bf1"])
        wf2.append(lp["wf2"])

    # Fused lane-dense head weight: cols [0, 52) = hierarchy heads, col 52 = sim head.
    w_head = jnp.zeros((H, HEAD_N), jnp.float32)
    w_head = w_head.at[:, :TOTAL_TOPICS].set(params["w_hier"])
    w_head = w_head.at[:, TOTAL_TOPICS].set(params["w_sim"][:, 0])
    b_head = jnp.zeros((1, HEAD_N), jnp.float32)
    b_head = b_head.at[:, :TOTAL_TOPICS].set(params["b_hier"])
    b_head = b_head.at[0, TOTAL_TOPICS].set(params["b_sim"][0, 0])

    bf16 = jnp.bfloat16
    return dict(
        wqkv=jnp.stack(wqkv).astype(bf16),     # (NLAYERS, H, QKV_N) bf16
        bqkv=jnp.stack(bqkv),                  # (NLAYERS, 1, QKV_N) f32
        vecs=jnp.stack(vecs),                  # (NLAYERS, 6, H)     f32
        wf1=jnp.stack(wf1).astype(bf16),       # (NLAYERS, H, FF)    bf16
        bf1=jnp.stack(bf1),                    # (NLAYERS, 1, FF)    f32
        wf2=jnp.stack(wf2).astype(bf16),       # (NLAYERS, FF, H)    bf16
        w_head=w_head.astype(bf16),            # (H, HEAD_N)         bf16
        b_head=b_head)                         # (1, HEAD_N)         f32


# ------------------------------- full forward --------------------------------
@jax.jit
def hier_siamese_forward(embedding1, embedding2, packed):
    # Stack both towers + batch into one 32-row activation slab.
    x = jnp.concatenate([embedding1, embedding2], axis=0).astype(jnp.float32)
    x = x.reshape(M, H)

    head = _fused_call(x, packed)                                     # (8, 128)

    hier1 = head[0:B, :TOTAL_TOPICS]                                  # avg1 @ W_hier + b
    hier2 = head[B:TB, :TOTAL_TOPICS]                                 # avg2 @ W_hier + b
    # torch.sub(avg1, avg2) is a signed difference -> linear head distributes.
    sim_logit = head[TB:TB + B, TOTAL_TOPICS:TOTAL_TOPICS + 1]        # (B, 1)
    similarity = jax.nn.sigmoid(sim_logit).reshape(B, 1, 1)           # matches torch (B,1,1)

    def split_levels(hm):
        outs, off = [], 0
        for n in NUM_TOPICS:
            outs.append(hm[:, off:off + n])   # torch: Linear(...).squeeze() -> (B, n)
            off += n
        return outs

    return tuple([similarity] + split_levels(hier1) + split_levels(hier2))


# ---------------------------------- main --------------------------------------
if __name__ == "__main__":
    key = jax.random.PRNGKey(0)
    k_params, k_e1, k_e2 = jax.random.split(key, 3)

    params = init_params(k_params)
    packed = pack_params(params)

    embedding1 = jax.random.normal(k_e1, (B, S, H), jnp.float32)
    embedding2 = jax.random.normal(k_e2, (B, S, H), jnp.float32)

    outputs = hier_siamese_forward(embedding1, embedding2, packed)
    outputs = jax.block_until_ready(outputs)

    assert len(outputs) == 15
    assert outputs[0].shape == (B, 1, 1)
    for i, n in enumerate(NUM_TOPICS):
        assert outputs[1 + i].shape == (B, n)
        assert outputs[8 + i].shape == (B, n)
    for o in outputs:
        assert bool(jnp.all(jnp.isfinite(o)))

    print("KERNEL_OK")
</pallas_src>

<mosaic_0001>
module attributes {stable_mosaic.version = 11 : i64} {
  func.func @fused_forward_kernel(%arg0: memref<32x128xf32, #tpu.memory_space<vmem>>, %arg1: memref<2x128x768xbf16, #tpu.memory_space<vmem>>, %arg2: memref<2x1x768xf32, #tpu.memory_space<vmem>>, %arg3: memref<2x6x128xf32, #tpu.memory_space<vmem>>, %arg4: memref<2x128x512xbf16, #tpu.memory_space<vmem>>, %arg5: memref<2x1x512xf32, #tpu.memory_space<vmem>>, %arg6: memref<2x512x128xbf16, #tpu.memory_space<vmem>>, %arg7: memref<128x128xbf16, #tpu.memory_space<vmem>>, %arg8: memref<1x128xf32, #tpu.memory_space<vmem>>, %arg9: memref<8x128xf32, #tpu.memory_space<vmem>>) attributes {dimension_semantics = [], scalar_prefetch = 0 : i64, scratch_operands = 0 : i64, tpu.core_type = #tpu.core_type<tc>} {
    %c0 = arith.constant 0 : index
    %c0_0 = arith.constant 0 : index
    %0 = vector.load %arg0[%c0, %c0_0] : memref<32x128xf32, #tpu.memory_space<vmem>>, vector<32x128xf32>
    %1 = tpu.iota {dimensions = array<i32: 0>} : vector<32x32xi32>
    %c3_i32 = arith.constant 3 : i32
    %2 = vector.broadcast %c3_i32 : i32 to vector<32x32xi32>
    %3 = arith.shrui %1, %2 : vector<32x32xi32>
    %4 = tpu.iota {dimensions = array<i32: 1>} : vector<32x32xi32>
    %c3_i32_1 = arith.constant 3 : i32
    %5 = vector.broadcast %c3_i32_1 : i32 to vector<32x32xi32>
    %6 = arith.shrui %4, %5 : vector<32x32xi32>
    %7 = arith.cmpi eq, %3, %6 : vector<32x32xi32>
    %cst = arith.constant 0.000000e+00 : f32
    %cst_2 = arith.constant -1.000000e+30 : f32
    %8 = vector.broadcast %cst : f32 to vector<32x32xf32>
    %9 = vector.broadcast %cst_2 : f32 to vector<32x32xf32>
    %10 = arith.select %7, %8, %9 : vector<32x32xi1>, vector<32x32xf32>
    %c0_3 = arith.constant 0 : index
    %c0_4 = arith.constant 0 : index
    %c0_5 = arith.constant 0 : index
    %11 = vector.load %arg3[%c0_3, %c0_4, %c0_5] : memref<2x6x128xf32, #tpu.memory_space<vmem>>, vector<1x6x128xf32>
    %12 = vector.shape_cast %11 : vector<1x6x128xf32> to vector<6x128xf32>
    %13 = vector.extract_strided_slice %12 {offsets = [0, 0], sizes = [1, 128], strides = [1, 1]} : vector<6x128xf32> to vector<1x128xf32>
    %14 = vector.extract_strided_slice %12 {offsets = [1, 0], sizes = [1, 128], strides = [1, 1]} : vector<6x128xf32> to vector<1x128xf32>
    %15 = vector.extract_strided_slice %12 {offsets = [2, 0], sizes = [1, 128], strides = [1, 1]} : vector<6x128xf32> to vector<1x128xf32>
    %16 = vector.extract_strided_slice %12 {offsets = [3, 0], sizes = [1, 128], strides = [1, 1]} : vector<6x128xf32> to vector<1x128xf32>
    %17 = vector.extract_strided_slice %12 {offsets = [4, 0], sizes = [1, 128], strides = [1, 1]} : vector<6x128xf32> to vector<1x128xf32>
    %18 = vector.extract_strided_slice %12 {offsets = [5, 0], sizes = [1, 128], strides = [1, 1]} : vector<6x128xf32> to vector<1x128xf32>
    %19 = arith.truncf %0 : vector<32x128xf32> to vector<32x128xbf16>
    %c0_6 = arith.constant 0 : index
    %c0_7 = arith.constant 0 : index
    %c0_8 = arith.constant 0 : index
    %20 = vector.load %arg1[%c0_6, %c0_7, %c0_8] : memref<2x128x768xbf16, #tpu.memory_space<vmem>>, vector<1x128x768xbf16>
    %21 = vector.shape_cast %20 : vector<1x128x768xbf16> to vector<128x768xbf16>
    %cst_9 = arith.constant dense<0.000000e+00> : vector<32x768xf32>
    %22 = tpu.matmul %19, %21, %cst_9 {dimension_numbers = #tpu.dot_dimension_numbers<[1], [0], [0], [1], [0, 0, 1, 1], [], []>} : vector<32x128xbf16>, vector<128x768xbf16>, vector<32x768xf32> -> vector<32x768xf32>
    %c0_10 = arith.constant 0 : index
    %c0_11 = arith.constant 0 : index
    %c0_12 = arith.constant 0 : index
    %23 = vector.load %arg2[%c0_10, %c0_11, %c0_12] : memref<2x1x768xf32, #tpu.memory_space<vmem>>, vector<1x1x768xf32>
    %24 = vector.shape_cast %23 : vector<1x1x768xf32> to vector<1x768xf32>
    %25 = vector.broadcast %24 : vector<1x768xf32> to vector<32x768xf32>
    %26 = arith.addf %22, %25 : vector<32x768xf32>
    %cst_13 = arith.constant 0.000000e+00 : f32
    %27 = vector.broadcast %cst_13 : f32 to vector<32x128xf32>
    %28 = vector.extract_strided_slice %26 {offsets = [0, 0], sizes = [32, 32], strides = [1, 1]} : vector<32x768xf32> to vector<32x32xf32>
    %29 = arith.truncf %28 : vector<32x32xf32> to vector<32x32xbf16>
    %30 = vector.extract_strided_slice %26 {offsets = [0, 128], sizes = [32, 32], strides = [1, 1]} : vector<32x768xf32> to vector<32x32xf32>
    %31 = arith.truncf %30 : vector<32x32xf32> to vector<32x32xbf16>
    %32 = vector.extract_strided_slice %26 {offsets = [0, 256], sizes = [32, 128], strides = [1, 1]} : vector<32x768xf32> to vector<32x128xf32>
    %33 = arith.truncf %32 : vector<32x128xf32> to vector<32x128xbf16>
    %cst_14 = arith.constant dense<0.000000e+00> : vector<32x32xf32>
    %34 = tpu.matmul %29, %31, %cst_14 {dimension_numbers = #tpu.dot_dimension_numbers<[1], [1], [0], [0], [0, 0, 1, 0], [], []>} : vector<32x32xbf16>, vector<32x32xbf16>, vector<32x32xf32> -> vector<32x32xf32>
    %35 = arith.addf %34, %10 : vector<32x32xf32>
    %cst_15 = arith.constant dense<0xFF800000> : vector<32xf32>
    %36 = vector.multi_reduction <maximumf>, %35, %cst_15 [1] : vector<32x32xf32> to vector<32xf32>
    %37 = vector.shape_cast %36 : vector<32xf32> to vector<32x1xf32>
    %38 = vector.broadcast %37 : vector<32x1xf32> to vector<32x32xf32>
    %39 = arith.subf %35, %38 : vector<32x32xf32>
    %40 = math.exp %39 : vector<32x32xf32>
    %cst_16 = arith.constant dense<0.000000e+00> : vector<32xf32>
    %41 = vector.multi_reduction <add>, %40, %cst_16 [1] : vector<32x32xf32> to vector<32xf32>
    %42 = vector.shape_cast %41 : vector<32xf32> to vector<32x1xf32>
    %43 = tpu.reciprocal %42 {approx = true} : vector<32x1xf32> -> vector<32x1xf32>
    %44 = vector.broadcast %43 : vector<32x1xf32> to vector<32x32xf32>
    %45 = arith.mulf %40, %44 : vector<32x32xf32>
    %46 = arith.truncf %45 : vector<32x32xf32> to vector<32x32xbf16>
    %cst_17 = arith.constant dense<0.000000e+00> : vector<32x128xf32>
    %47 = tpu.matmul %46, %33, %cst_17 {dimension_numbers = #tpu.dot_dimension_numbers<[1], [0], [0], [1], [0, 0, 1, 1], [], []>} : vector<32x32xbf16>, vector<32x128xbf16>, vector<32x128xf32> -> vector<32x128xf32>
    %48 = arith.addf %27, %47 : vector<32x128xf32>
    %49 = vector.extract_strided_slice %26 {offsets = [0, 32], sizes = [32, 32], strides = [1, 1]} : vector<32x768xf32> to vector<32x32xf32>
    %50 = arith.truncf %49 : vector<32x32xf32> to vector<32x32xbf16>
    %51 = vector.extract_strided_slice %26 {offsets = [0, 160], sizes = [32, 32], strides = [1, 1]} : vector<32x768xf32> to vector<32x32xf32>
    %52 = arith.truncf %51 : vector<32x32xf32> to vector<32x32xbf16>
    %53 = vector.extract_strided_slice %26 {offsets = [0, 384], sizes = [32, 128], strides = [1, 1]} : vector<32x768xf32> to vector<32x128xf32>
    %54 = arith.truncf %53 : vector<32x128xf32> to vector<32x128xbf16>
    %cst_18 = arith.constant dense<0.000000e+00> : vector<32x32xf32>
    %55 = tpu.matmul %50, %52, %cst_18 {dimension_numbers = #tpu.dot_dimension_numbers<[1], [1], [0], [0], [0, 0, 1, 0], [], []>} : vector<32x32xbf16>, vector<32x32xbf16>, vector<32x32xf32> -> vector<32x32xf32>
    %56 = arith.addf %55, %10 : vector<32x32xf32>
    %cst_19 = arith.constant dense<0xFF800000> : vector<32xf32>
    %57 = vector.multi_reduction <maximumf>, %56, %cst_19 [1] : vector<32x32xf32> to vector<32xf32>
    %58 = vector.shape_cast %57 : vector<32xf32> to vector<32x1xf32>
    %59 = vector.broadcast %58 : vector<32x1xf32> to vector<32x32xf32>
    %60 = arith.subf %56, %59 : vector<32x32xf32>
    %61 = math.exp %60 : vector<32x32xf32>
    %cst_20 = arith.constant dense<0.000000e+00> : vector<32xf32>
    %62 = vector.multi_reduction <add>, %61, %cst_20 [1] : vector<32x32xf32> to vector<32xf32>
    %63 = vector.shape_cast %62 : vector<32xf32> to vector<32x1xf32>
    %64 = tpu.reciprocal %63 {approx = true} : vector<32x1xf32> -> vector<32x1xf32>
    %65 = vector.broadcast %64 : vector<32x1xf32> to vector<32x32xf32>
    %66 = arith.mulf %61, %65 : vector<32x32xf32>
    %67 = arith.truncf %66 : vector<32x32xf32> to vector<32x32xbf16>
    %cst_21 = arith.constant dense<0.000000e+00> : vector<32x128xf32>
    %68 = tpu.matmul %67, %54, %cst_21 {dimension_numbers = #tpu.dot_dimension_numbers<[1], [0], [0], [1], [0, 0, 1, 1], [], []>} : vector<32x32xbf16>, vector<32x128xbf16>, vector<32x128xf32> -> vector<32x128xf32>
    %69 = arith.addf %48, %68 : vector<32x128xf32>
    %70 = vector.extract_strided_slice %26 {offsets = [0, 64], sizes = [32, 32], strides = [1, 1]} : vector<32x768xf32> to vector<32x32xf32>
    %71 = arith.truncf %70 : vector<32x32xf32> to vector<32x32xbf16>
    %72 = vector.extract_strided_slice %26 {offsets = [0, 192], sizes = [32, 32], strides = [1, 1]} : vector<32x768xf32> to vector<32x32xf32>
    %73 = arith.truncf %72 : vector<32x32xf32> to vector<32x32xbf16>
    %74 = vector.extract_strided_slice %26 {offsets = [0, 512], sizes = [32, 128], strides = [1, 1]} : vector<32x768xf32> to vector<32x128xf32>
    %75 = arith.truncf %74 : vector<32x128xf32> to vector<32x128xbf16>
    %cst_22 = arith.constant dense<0.000000e+00> : vector<32x32xf32>
    %76 = tpu.matmul %71, %73, %cst_22 {dimension_numbers = #tpu.dot_dimension_numbers<[1], [1], [0], [0], [0, 0, 1, 0], [], []>} : vector<32x32xbf16>, vector<32x32xbf16>, vector<32x32xf32> -> vector<32x32xf32>
    %77 = arith.addf %76, %10 : vector<32x32xf32>
    %cst_23 = arith.constant dense<0xFF800000> : vector<32xf32>
    %78 = vector.multi_reduction <maximumf>, %77, %cst_23 [1] : vector<32x32xf32> to vector<32xf32>
    %79 = vector.shape_cast %78 : vector<32xf32> to vector<32x1xf32>
    %80 = vector.broadcast %79 : vector<32x1xf32> to vector<32x32xf32>
    %81 = arith.subf %77, %80 : vector<32x32xf32>
    %82 = math.exp %81 : vector<32x32xf32>
    %cst_24 = arith.constant dense<0.000000e+00> : vector<32xf32>
    %83 = vector.multi_reduction <add>, %82, %cst_24 [1] : vector<32x32xf32> to vector<32xf32>
    %84 = vector.shape_cast %83 : vector<32xf32> to vector<32x1xf32>
    %85 = tpu.reciprocal %84 {approx = true} : vector<32x1xf32> -> vector<32x1xf32>
    %86 = vector.broadcast %85 : vector<32x1xf32> to vector<32x32xf32>
    %87 = arith.mulf %82, %86 : vector<32x32xf32>
    %88 = arith.truncf %87 : vector<32x32xf32> to vector<32x32xbf16>
    %cst_25 = arith.constant dense<0.000000e+00> : vector<32x128xf32>
    %89 = tpu.matmul %88, %75, %cst_25 {dimension_numbers = #tpu.dot_dimension_numbers<[1], [0], [0], [1], [0, 0, 1, 1], [], []>} : vector<32x32xbf16>, vector<32x128xbf16>, vector<32x128xf32> -> vector<32x128xf32>
    %90 = arith.addf %69, %89 : vector<32x128xf32>
    %91 = vector.extract_strided_slice %26 {offsets = [0, 96], sizes = [32, 32], strides = [1, 1]} : vector<32x768xf32> to vector<32x32xf32>
    %92 = arith.truncf %91 : vector<32x32xf32> to vector<32x32xbf16>
    %93 = vector.extract_strided_slice %26 {offsets = [0, 224], sizes = [32, 32], strides = [1, 1]} : vector<32x768xf32> to vector<32x32xf32>
    %94 = arith.truncf %93 : vector<32x32xf32> to vector<32x32xbf16>
    %95 = vector.extract_strided_slice %26 {offsets = [0, 640], sizes = [32, 128], strides = [1, 1]} : vector<32x768xf32> to vector<32x128xf32>
    %96 = arith.truncf %95 : vector<32x128xf32> to vector<32x128xbf16>
    %cst_26 = arith.constant dense<0.000000e+00> : vector<32x32xf32>
    %97 = tpu.matmul %92, %94, %cst_26 {dimension_numbers = #tpu.dot_dimension_numbers<[1], [1], [0], [0], [0, 0, 1, 0], [], []>} : vector<32x32xbf16>, vector<32x32xbf16>, vector<32x32xf32> -> vector<32x32xf32>
    %98 = arith.addf %97, %10 : vector<32x32xf32>
    %cst_27 = arith.constant dense<0xFF800000> : vector<32xf32>
    %99 = vector.multi_reduction <maximumf>, %98, %cst_27 [1] : vector<32x32xf32> to vector<32xf32>
    %100 = vector.shape_cast %99 : vector<32xf32> to vector<32x1xf32>
    %101 = vector.broadcast %100 : vector<32x1xf32> to vector<32x32xf32>
    %102 = arith.subf %98, %101 : vector<32x32xf32>
    %103 = math.exp %102 : vector<32x32xf32>
    %cst_28 = arith.constant dense<0.000000e+00> : vector<32xf32>
    %104 = vector.multi_reduction <add>, %103, %cst_28 [1] : vector<32x32xf32> to vector<32xf32>
    %105 = vector.shape_cast %104 : vector<32xf32> to vector<32x1xf32>
    %106 = tpu.reciprocal %105 {approx = true} : vector<32x1xf32> -> vector<32x1xf32>
    %107 = vector.broadcast %106 : vector<32x1xf32> to vector<32x32xf32>
    %108 = arith.mulf %103, %107 : vector<32x32xf32>
    %109 = arith.truncf %108 : vector<32x32xf32> to vector<32x32xbf16>
    %cst_29 = arith.constant dense<0.000000e+00> : vector<32x128xf32>
    %110 = tpu.matmul %109, %96, %cst_29 {dimension_numbers = #tpu.dot_dimension_numbers<[1], [0], [0], [1], [0, 0, 1, 1], [], []>} : vector<32x32xbf16>, vector<32x128xbf16>, vector<32x128xf32> -> vector<32x128xf32>
    %111 = arith.addf %90, %110 : vector<32x128xf32>
    %112 = arith.addf %0, %111 : vector<32x128xf32>
    %113 = vector.broadcast %13 : vector<1x128xf32> to vector<32x128xf32>
    %114 = arith.addf %112, %113 : vector<32x128xf32>
    %cst_30 = arith.constant dense<0.000000e+00> : vector<32xf32>
    %115 = vector.multi_reduction <add>, %114, %cst_30 [1] : vector<32x128xf32> to vector<32xf32>
    %116 = vector.shape_cast %115 : vector<32xf32> to vector<32x1xf32>
    %cst_31 = arith.constant 1.280000e+02 : f32
    %117 = vector.broadcast %cst_31 : f32 to vector<32x1xf32>
    %118 = arith.divf %116, %117 : vector<32x1xf32>
    %119 = vector.broadcast %118 : vector<32x1xf32> to vector<32x128xf32>
    %120 = arith.subf %114, %119 : vector<32x128xf32>
    %121 = arith.mulf %120, %120 : vector<32x128xf32>
    %cst_32 = arith.constant dense<0.000000e+00> : vector<32xf32>
    %122 = vector.multi_reduction <add>, %121, %cst_32 [1] : vector<32x128xf32> to vector<32xf32>
    %123 = vector.shape_cast %122 : vector<32xf32> to vector<32x1xf32>
    %cst_33 = arith.constant 1.280000e+02 : f32
    %124 = vector.broadcast %cst_33 : f32 to vector<32x1xf32>
    %125 = arith.divf %123, %124 : vector<32x1xf32>
    %126 = vector.broadcast %118 : vector<32x1xf32> to vector<32x128xf32>
    %127 = arith.subf %114, %126 : vector<32x128xf32>
    %cst_34 = arith.constant 9.99999996E-13 : f32
    %128 = vector.broadcast %cst_34 : f32 to vector<32x1xf32>
    %129 = arith.addf %125, %128 : vector<32x1xf32>
    %130 = math.rsqrt %129 : vector<32x1xf32>
    %131 = vector.broadcast %130 : vector<32x1xf32> to vector<32x128xf32>
    %132 = arith.mulf %127, %131 : vector<32x128xf32>
    %133 = vector.broadcast %14 : vector<1x128xf32> to vector<32x128xf32>
    %134 = arith.mulf %132, %133 : vector<32x128xf32>
    %135 = vector.broadcast %15 : vector<1x128xf32> to vector<32x128xf32>
    %136 = arith.addf %134, %135 : vector<32x128xf32>
    %137 = arith.truncf %136 : vector<32x128xf32> to vector<32x128xbf16>
    %c0_35 = arith.constant 0 : index
    %c0_36 = arith.constant 0 : index
    %c0_37 = arith.constant 0 : index
    %138 = vector.load %arg4[%c0_35, %c0_36, %c0_37] : memref<2x128x512xbf16, #tpu.memory_space<vmem>>, vector<1x128x512xbf16>
    %139 = vector.shape_cast %138 : vector<1x128x512xbf16> to vector<128x512xbf16>
    %cst_38 = arith.constant dense<0.000000e+00> : vector<32x512xf32>
    %140 = tpu.matmul %137, %139, %cst_38 {dimension_numbers = #tpu.dot_dimension_numbers<[1], [0], [0], [1], [0, 0, 1, 1], [], []>} : vector<32x128xbf16>, vector<128x512xbf16>, vector<32x512xf32> -> vector<32x512xf32>
    %c0_39 = arith.constant 0 : index
    %c0_40 = arith.constant 0 : index
    %c0_41 = arith.constant 0 : index
    %141 = vector.load %arg5[%c0_39, %c0_40, %c0_41] : memref<2x1x512xf32, #tpu.memory_space<vmem>>, vector<1x1x512xf32>
    %142 = vector.shape_cast %141 : vector<1x1x512xf32> to vector<1x512xf32>
    %143 = vector.broadcast %142 : vector<1x512xf32> to vector<32x512xf32>
    %144 = arith.addf %140, %143 : vector<32x512xf32>
    %cst_42 = arith.constant 5.000000e-01 : f32
    %145 = vector.broadcast %cst_42 : f32 to vector<32x512xf32>
    %146 = arith.mulf %145, %144 : vector<32x512xf32>
    %cst_43 = arith.constant 0.707106769 : f32
    %147 = vector.broadcast %cst_43 : f32 to vector<32x512xf32>
    %148 = arith.mulf %144, %147 : vector<32x512xf32>
    %cst_44 = arith.constant 0.000000e+00 : f32
    %149 = vector.broadcast %cst_44 : f32 to vector<32x512xf32>
    %150 = arith.cmpf oge, %148, %149 : vector<32x512xf32>
    %cst_45 = arith.constant 1.000000e+00 : f32
    %cst_46 = arith.constant -1.000000e+00 : f32
    %151 = vector.broadcast %cst_45 : f32 to vector<32x512xf32>
    %152 = vector.broadcast %cst_46 : f32 to vector<32x512xf32>
    %153 = arith.select %150, %151, %152 : vector<32x512xi1>, vector<32x512xf32>
    %154 = math.absf %148 : vector<32x512xf32>
    %cst_47 = arith.constant 0.327591091 : f32
    %155 = vector.broadcast %cst_47 : f32 to vector<32x512xf32>
    %156 = arith.mulf %155, %154 : vector<32x512xf32>
    %cst_48 = arith.constant 1.000000e+00 : f32
    %157 = vector.broadcast %cst_48 : f32 to vector<32x512xf32>
    %158 = arith.addf %157, %156 : vector<32x512xf32>
    %cst_49 = arith.constant 1.000000e+00 : f32
    %159 = vector.broadcast %cst_49 : f32 to vector<32x512xf32>
    %160 = arith.divf %159, %158 : vector<32x512xf32>
    %cst_50 = arith.constant 1.06140542 : f32
    %161 = vector.broadcast %cst_50 : f32 to vector<32x512xf32>
    %162 = arith.mulf %161, %160 : vector<32x512xf32>
    %cst_51 = arith.constant -1.45315206 : f32
    %163 = vector.broadcast %cst_51 : f32 to vector<32x512xf32>
    %164 = arith.addf %162, %163 : vector<32x512xf32>
    %165 = arith.mulf %164, %160 : vector<32x512xf32>
    %cst_52 = arith.constant 1.42141378 : f32
    %166 = vector.broadcast %cst_52 : f32 to vector<32x512xf32>
    %167 = arith.addf %165, %166 : vector<32x512xf32>
    %168 = arith.mulf %167, %160 : vector<32x512xf32>
    %cst_53 = arith.constant -0.284496725 : f32
    %169 = vector.broadcast %cst_53 : f32 to vector<32x512xf32>
    %170 = arith.addf %168, %169 : vector<32x512xf32>
    %171 = arith.mulf %170, %160 : vector<32x512xf32>
    %cst_54 = arith.constant 0.254829586 : f32
    %172 = vector.broadcast %cst_54 : f32 to vector<32x512xf32>
    %173 = arith.addf %171, %172 : vector<32x512xf32>
    %174 = arith.mulf %173, %160 : vector<32x512xf32>
    %cst_55 = arith.constant 0.000000e+00 : f32
    %175 = vector.broadcast %cst_55 : f32 to vector<32x512xf32>
    %176 = arith.subf %175, %154 : vector<32x512xf32>
    %177 = arith.mulf %176, %154 : vector<32x512xf32>
    %178 = math.exp %177 : vector<32x512xf32>
    %179 = arith.mulf %174, %178 : vector<32x512xf32>
    %cst_56 = arith.constant 1.000000e+00 : f32
    %180 = vector.broadcast %cst_56 : f32 to vector<32x512xf32>
    %181 = arith.subf %180, %179 : vector<32x512xf32>
    %182 = arith.mulf %153, %181 : vector<32x512xf32>
    %cst_57 = arith.constant 1.000000e+00 : f32
    %183 = vector.broadcast %cst_57 : f32 to vector<32x512xf32>
    %184 = arith.addf %183, %182 : vector<32x512xf32>
    %185 = arith.mulf %146, %184 : vector<32x512xf32>
    %186 = arith.truncf %185 : vector<32x512xf32> to vector<32x512xbf16>
    %c0_58 = arith.constant 0 : index
    %c0_59 = arith.constant 0 : index
    %c0_60 = arith.constant 0 : index
    %187 = vector.load %arg6[%c0_58, %c0_59, %c0_60] : memref<2x512x128xbf16, #tpu.memory_space<vmem>>, vector<1x512x128xbf16>
    %188 = vector.shape_cast %187 : vector<1x512x128xbf16> to vector<512x128xbf16>
    %cst_61 = arith.constant dense<0.000000e+00> : vector<32x128xf32>
    %189 = tpu.matmul %186, %188, %cst_61 {dimension_numbers = #tpu.dot_dimension_numbers<[1], [0], [0], [1], [0, 0, 1, 1], [], []>} : vector<32x512xbf16>, vector<512x128xbf16>, vector<32x128xf32> -> vector<32x128xf32>
    %190 = vector.broadcast %18 : vector<1x128xf32> to vector<32x128xf32>
    %191 = arith.addf %189, %190 : vector<32x128xf32>
    %192 = arith.addf %136, %191 : vector<32x128xf32>
    %cst_62 = arith.constant dense<0.000000e+00> : vector<32xf32>
    %193 = vector.multi_reduction <add>, %192, %cst_62 [1] : vector<32x128xf32> to vector<32xf32>
    %194 = vector.shape_cast %193 : vector<32xf32> to vector<32x1xf32>
    %cst_63 = arith.constant 1.280000e+02 : f32
    %195 = vector.broadcast %cst_63 : f32 to vector<32x1xf32>
    %196 = arith.divf %194, %195 : vector<32x1xf32>
    %197 = vector.broadcast %196 : vector<32x1xf32> to vector<32x128xf32>
    %198 = arith.subf %192, %197 : vector<32x128xf32>
    %199 = arith.mulf %198, %198 : vector<32x128xf32>
    %cst_64 = arith.constant dense<0.000000e+00> : vector<32xf32>
    %200 = vector.multi_reduction <add>, %199, %cst_64 [1] : vector<32x128xf32> to vector<32xf32>
    %201 = vector.shape_cast %200 : vector<32xf32> to vector<32x1xf32>
    %cst_65 = arith.constant 1.280000e+02 : f32
    %202 = vector.broadcast %cst_65 : f32 to vector<32x1xf32>
    %203 = arith.divf %201, %202 : vector<32x1xf32>
    %204 = vector.broadcast %196 : vector<32x1xf32> to vector<32x128xf32>
    %205 = arith.subf %192, %204 : vector<32x128xf32>
    %cst_66 = arith.constant 9.99999996E-13 : f32
    %206 = vector.broadcast %cst_66 : f32 to vector<32x1xf32>
    %207 = arith.addf %203, %206 : vector<32x1xf32>
    %208 = math.rsqrt %207 : vector<32x1xf32>
    %209 = vector.broadcast %208 : vector<32x1xf32> to vector<32x128xf32>
    %210 = arith.mulf %205, %209 : vector<32x128xf32>
    %211 = vector.broadcast %16 : vector<1x128xf32> to vector<32x128xf32>
    %212 = arith.mulf %210, %211 : vector<32x128xf32>
    %213 = vector.broadcast %17 : vector<1x128xf32> to vector<32x128xf32>
    %214 = arith.addf %212, %213 : vector<32x128xf32>
    %c1 = arith.constant 1 : index
    %c0_67 = arith.constant 0 : index
    %c0_68 = arith.constant 0 : index
    %215 = vector.load %arg3[%c1, %c0_67, %c0_68] : memref<2x6x128xf32, #tpu.memory_space<vmem>>, vector<1x6x128xf32>
    %216 = vector.shape_cast %215 : vector<1x6x128xf32> to vector<6x128xf32>
    %217 = vector.extract_strided_slice %216 {offsets = [0, 0], sizes = [1, 128], strides = [1, 1]} : vector<6x128xf32> to vector<1x128xf32>
    %218 = vector.extract_strided_slice %216 {offsets = [1, 0], sizes = [1, 128], strides = [1, 1]} : vector<6x128xf32> to vector<1x128xf32>
    %219 = vector.extract_strided_slice %216 {offsets = [2, 0], sizes = [1, 128], strides = [1, 1]} : vector<6x128xf32> to vector<1x128xf32>
    %220 = vector.extract_strided_slice %216 {offsets = [3, 0], sizes = [1, 128], strides = [1, 1]} : vector<6x128xf32> to vector<1x128xf32>
    %221 = vector.extract_strided_slice %216 {offsets = [4, 0], sizes = [1, 128], strides = [1, 1]} : vector<6x128xf32> to vector<1x128xf32>
    %222 = vector.extract_strided_slice %216 {offsets = [5, 0], sizes = [1, 128], strides = [1, 1]} : vector<6x128xf32> to vector<1x128xf32>
    %223 = arith.truncf %214 : vector<32x128xf32> to vector<32x128xbf16>
    %c1_69 = arith.constant 1 : index
    %c0_70 = arith.constant 0 : index
    %c0_71 = arith.constant 0 : index
    %224 = vector.load %arg1[%c1_69, %c0_70, %c0_71] : memref<2x128x768xbf16, #tpu.memory_space<vmem>>, vector<1x128x768xbf16>
    %225 = vector.shape_cast %224 : vector<1x128x768xbf16> to vector<128x768xbf16>
    %cst_72 = arith.constant dense<0.000000e+00> : vector<32x768xf32>
    %226 = tpu.matmul %223, %225, %cst_72 {dimension_numbers = #tpu.dot_dimension_numbers<[1], [0], [0], [1], [0, 0, 1, 1], [], []>} : vector<32x128xbf16>, vector<128x768xbf16>, vector<32x768xf32> -> vector<32x768xf32>
    %c1_73 = arith.constant 1 : index
    %c0_74 = arith.constant 0 : index
    %c0_75 = arith.constant 0 : index
    %227 = vector.load %arg2[%c1_73, %c0_74, %c0_75] : memref<2x1x768xf32, #tpu.memory_space<vmem>>, vector<1x1x768xf32>
    %228 = vector.shape_cast %227 : vector<1x1x768xf32> to vector<1x768xf32>
    %229 = vector.broadcast %228 : vector<1x768xf32> to vector<32x768xf32>
    %230 = arith.addf %226, %229 : vector<32x768xf32>
    %cst_76 = arith.constant 0.000000e+00 : f32
    %231 = vector.broadcast %cst_76 : f32 to vector<32x128xf32>
    %232 = vector.extract_strided_slice %230 {offsets = [0, 0], sizes = [32, 32], strides = [1, 1]} : vector<32x768xf32> to vector<32x32xf32>
    %233 = arith.truncf %232 : vector<32x32xf32> to vector<32x32xbf16>
    %234 = vector.extract_strided_slice %230 {offsets = [0, 128], sizes = [32, 32], strides = [1, 1]} : vector<32x768xf32> to vector<32x32xf32>
    %235 = arith.truncf %234 : vector<32x32xf32> to vector<32x32xbf16>
    %236 = vector.extract_strided_slice %230 {offsets = [0, 256], sizes = [32, 128], strides = [1, 1]} : vector<32x768xf32> to vector<32x128xf32>
    %237 = arith.truncf %236 : vector<32x128xf32> to vector<32x128xbf16>
    %cst_77 = arith.constant dense<0.000000e+00> : vector<32x32xf32>
    %238 = tpu.matmul %233, %235, %cst_77 {dimension_numbers = #tpu.dot_dimension_numbers<[1], [1], [0], [0], [0, 0, 1, 0], [], []>} : vector<32x32xbf16>, vector<32x32xbf16>, vector<32x32xf32> -> vector<32x32xf32>
    %239 = arith.addf %238, %10 : vector<32x32xf32>
    %cst_78 = arith.constant dense<0xFF800000> : vector<32xf32>
    %240 = vector.multi_reduction <maximumf>, %239, %cst_78 [1] : vector<32x32xf32> to vector<32xf32>
    %241 = vector.shape_cast %240 : vector<32xf32> to vector<32x1xf32>
    %242 = vector.broadcast %241 : vector<32x1xf32> to vector<32x32xf32>
    %243 = arith.subf %239, %242 : vector<32x32xf32>
    %244 = math.exp %243 : vector<32x32xf32>
    %cst_79 = arith.constant dense<0.000000e+00> : vector<32xf32>
    %245 = vector.multi_reduction <add>, %244, %cst_79 [1] : vector<32x32xf32> to vector<32xf32>
    %246 = vector.shape_cast %245 : vector<32xf32> to vector<32x1xf32>
    %247 = tpu.reciprocal %246 {approx = true} : vector<32x1xf32> -> vector<32x1xf32>
    %248 = vector.broadcast %247 : vector<32x1xf32> to vector<32x32xf32>
    %249 = arith.mulf %244, %248 : vector<32x32xf32>
    %250 = arith.truncf %249 : vector<32x32xf32> to vector<32x32xbf16>
    %cst_80 = arith.constant dense<0.000000e+00> : vector<32x128xf32>
    %251 = tpu.matmul %250, %237, %cst_80 {dimension_numbers = #tpu.dot_dimension_numbers<[1], [0], [0], [1], [0, 0, 1, 1], [], []>} : vector<32x32xbf16>, vector<32x128xbf16>, vector<32x128xf32> -> vector<32x128xf32>
    %252 = arith.addf %231, %251 : vector<32x128xf32>
    %253 = vector.extract_strided_slice %230 {offsets = [0, 32], sizes = [32, 32], strides = [1, 1]} : vector<32x768xf32> to vector<32x32xf32>
    %254 = arith.truncf %253 : vector<32x32xf32> to vector<32x32xbf16>
    %255 = vector.extract_strided_slice %230 {offsets = [0, 160], sizes = [32, 32], strides = [1, 1]} : vector<32x768xf32> to vector<32x32xf32>
    %256 = arith.truncf %255 : vector<32x32xf32> to vector<32x32xbf16>
    %257 = vector.extract_strided_slice %230 {offsets = [0, 384], sizes = [32, 128], strides = [1, 1]} : vector<32x768xf32> to vector<32x128xf32>
    %258 = arith.truncf %257 : vector<32x128xf32> to vector<32x128xbf16>
    %cst_81 = arith.constant dense<0.000000e+00> : vector<32x32xf32>
    %259 = tpu.matmul %254, %256, %cst_81 {dimension_numbers = #tpu.dot_dimension_numbers<[1], [1], [0], [0], [0, 0, 1, 0], [], []>} : vector<32x32xbf16>, vector<32x32xbf16>, vector<32x32xf32> -> vector<32x32xf32>
    %260 = arith.addf %259, %10 : vector<32x32xf32>
    %cst_82 = arith.constant dense<0xFF800000> : vector<32xf32>
    %261 = vector.multi_reduction <maximumf>, %260, %cst_82 [1] : vector<32x32xf32> to vector<32xf32>
    %262 = vector.shape_cast %261 : vector<32xf32> to vector<32x1xf32>
    %263 = vector.broadcast %262 : vector<32x1xf32> to vector<32x32xf32>
    %264 = arith.subf %260, %263 : vector<32x32xf32>
    %265 = math.exp %264 : vector<32x32xf32>
    %cst_83 = arith.constant dense<0.000000e+00> : vector<32xf32>
    %266 = vector.multi_reduction <add>, %265, %cst_83 [1] : vector<32x32xf32> to vector<32xf32>
    %267 = vector.shape_cast %266 : vector<32xf32> to vector<32x1xf32>
    %268 = tpu.reciprocal %267 {approx = true} : vector<32x1xf32> -> vector<32x1xf32>
    %269 = vector.broadcast %268 : vector<32x1xf32> to vector<32x32xf32>
    %270 = arith.mulf %265, %269 : vector<32x32xf32>
    %271 = arith.truncf %270 : vector<32x32xf32> to vector<32x32xbf16>
    %cst_84 = arith.constant dense<0.000000e+00> : vector<32x128xf32>
    %272 = tpu.matmul %271, %258, %cst_84 {dimension_numbers = #tpu.dot_dimension_numbers<[1], [0], [0], [1], [0, 0, 1, 1], [], []>} : vector<32x32xbf16>, vector<32x128xbf16>, vector<32x128xf32> -> vector<32x128xf32>
    %273 = arith.addf %252, %272 : vector<32x128xf32>
    %274 = vector.extract_strided_slice %230 {offsets = [0, 64], sizes = [32, 32], strides = [1, 1]} : vector<32x768xf32> to vector<32x32xf32>
    %275 = arith.truncf %274 : vector<32x32xf32> to vector<32x32xbf16>
    %276 = vector.extract_strided_slice %230 {offsets = [0, 192], sizes = [32, 32], strides = [1, 1]} : vector<32x768xf32> to vector<32x32xf32>
    %277 = arith.truncf %276 : vector<32x32xf32> to vector<32x32xbf16>
    %278 = vector.extract_strided_slice %230 {offsets = [0, 512], sizes = [32, 128], strides = [1, 1]} : vector<32x768xf32> to vector<32x128xf32>
    %279 = arith.truncf %278 : vector<32x128xf32> to vector<32x128xbf16>
    %cst_85 = arith.constant dense<0.000000e+00> : vector<32x32xf32>
    %280 = tpu.matmul %275, %277, %cst_85 {dimension_numbers = #tpu.dot_dimension_numbers<[1], [1], [0], [0], [0, 0, 1, 0], [], []>} : vector<32x32xbf16>, vector<32x32xbf16>, vector<32x32xf32> -> vector<32x32xf32>
    %281 = arith.addf %280, %10 : vector<32x32xf32>
    %cst_86 = arith.constant dense<0xFF800000> : vector<32xf32>
    %282 = vector.multi_reduction <maximumf>, %281, %cst_86 [1] : vector<32x32xf32> to vector<32xf32>
    %283 = vector.shape_cast %282 : vector<32xf32> to vector<32x1xf32>
    %284 = vector.broadcast %283 : vector<32x1xf32> to vector<32x32xf32>
    %285 = arith.subf %281, %284 : vector<32x32xf32>
    %286 = math.exp %285 : vector<32x32xf32>
    %cst_87 = arith.constant dense<0.000000e+00> : vector<32xf32>
    %287 = vector.multi_reduction <add>, %286, %cst_87 [1] : vector<32x32xf32> to vector<32xf32>
    %288 = vector.shape_cast %287 : vector<32xf32> to vector<32x1xf32>
    %289 = tpu.reciprocal %288 {approx = true} : vector<32x1xf32> -> vector<32x1xf32>
    %290 = vector.broadcast %289 : vector<32x1xf32> to vector<32x32xf32>
    %291 = arith.mulf %286, %290 : vector<32x32xf32>
    %292 = arith.truncf %291 : vector<32x32xf32> to vector<32x32xbf16>
    %cst_88 = arith.constant dense<0.000000e+00> : vector<32x128xf32>
    %293 = tpu.matmul %292, %279, %cst_88 {dimension_numbers = #tpu.dot_dimension_numbers<[1], [0], [0], [1], [0, 0, 1, 1], [], []>} : vector<32x32xbf16>, vector<32x128xbf16>, vector<32x128xf32> -> vector<32x128xf32>
    %294 = arith.addf %273, %293 : vector<32x128xf32>
    %295 = vector.extract_strided_slice %230 {offsets = [0, 96], sizes = [32, 32], strides = [1, 1]} : vector<32x768xf32> to vector<32x32xf32>
    %296 = arith.truncf %295 : vector<32x32xf32> to vector<32x32xbf16>
    %297 = vector.extract_strided_slice %230 {offsets = [0, 224], sizes = [32, 32], strides = [1, 1]} : vector<32x768xf32> to vector<32x32xf32>
    %298 = arith.truncf %297 : vector<32x32xf32> to vector<32x32xbf16>
    %299 = vector.extract_strided_slice %230 {offsets = [0, 640], sizes = [32, 128], strides = [1, 1]} : vector<32x768xf32> to vector<32x128xf32>
    %300 = arith.truncf %299 : vector<32x128xf32> to vector<32x128xbf16>
    %cst_89 = arith.constant dense<0.000000e+00> : vector<32x32xf32>
    %301 = tpu.matmul %296, %298, %cst_89 {dimension_numbers = #tpu.dot_dimension_numbers<[1], [1], [0], [0], [0, 0, 1, 0], [], []>} : vector<32x32xbf16>, vector<32x32xbf16>, vector<32x32xf32> -> vector<32x32xf32>
    %302 = arith.addf %301, %10 : vector<32x32xf32>
    %cst_90 = arith.constant dense<0xFF800000> : vector<32xf32>
    %303 = vector.multi_reduction <maximumf>, %302, %cst_90 [1] : vector<32x32xf32> to vector<32xf32>
    %304 = vector.shape_cast %303 : vector<32xf32> to vector<32x1xf32>
    %305 = vector.broadcast %304 : vector<32x1xf32> to vector<32x32xf32>
    %306 = arith.subf %302, %305 : vector<32x32xf32>
    %307 = math.exp %306 : vector<32x32xf32>
    %cst_91 = arith.constant dense<0.000000e+00> : vector<32xf32>
    %308 = vector.multi_reduction <add>, %307, %cst_91 [1] : vector<32x32xf32> to vector<32xf32>
    %309 = vector.shape_cast %308 : vector<32xf32> to vector<32x1xf32>
    %310 = tpu.reciprocal %309 {approx = true} : vector<32x1xf32> -> vector<32x1xf32>
    %311 = vector.broadcast %310 : vector<32x1xf32> to vector<32x32xf32>
    %312 = arith.mulf %307, %311 : vector<32x32xf32>
    %313 = arith.truncf %312 : vector<32x32xf32> to vector<32x32xbf16>
    %cst_92 = arith.constant dense<0.000000e+00> : vector<32x128xf32>
    %314 = tpu.matmul %313, %300, %cst_92 {dimension_numbers = #tpu.dot_dimension_numbers<[1], [0], [0], [1], [0, 0, 1, 1], [], []>} : vector<32x32xbf16>, vector<32x128xbf16>, vector<32x128xf32> -> vector<32x128xf32>
    %315 = arith.addf %294, %314 : vector<32x128xf32>
    %316 = arith.addf %214, %315 : vector<32x128xf32>
    %317 = vector.broadcast %217 : vector<1x128xf32> to vector<32x128xf32>
    %318 = arith.addf %316, %317 : vector<32x128xf32>
    %cst_93 = arith.constant dense<0.000000e+00> : vector<32xf32>
    %319 = vector.multi_reduction <add>, %318, %cst_93 [1] : vector<32x128xf32> to vector<32xf32>
    %320 = vector.shape_cast %319 : vector<32xf32> to vector<32x1xf32>
    %cst_94 = arith.constant 1.280000e+02 : f32
    %321 = vector.broadcast %cst_94 : f32 to vector<32x1xf32>
    %322 = arith.divf %320, %321 : vector<32x1xf32>
    %323 = vector.broadcast %322 : vector<32x1xf32> to vector<32x128xf32>
    %324 = arith.subf %318, %323 : vector<32x128xf32>
    %325 = arith.mulf %324, %324 : vector<32x128xf32>
    %cst_95 = arith.constant dense<0.000000e+00> : vector<32xf32>
    %326 = vector.multi_reduction <add>, %325, %cst_95 [1] : vector<32x128xf32> to vector<32xf32>
    %327 = vector.shape_cast %326 : vector<32xf32> to vector<32x1xf32>
    %cst_96 = arith.constant 1.280000e+02 : f32
    %328 = vector.broadcast %cst_96 : f32 to vector<32x1xf32>
    %329 = arith.divf %327, %328 : vector<32x1xf32>
    %330 = vector.broadcast %322 : vector<32x1xf32> to vector<32x128xf32>
    %331 = arith.subf %318, %330 : vector<32x128xf32>
    %cst_97 = arith.constant 9.99999996E-13 : f32
    %332 = vector.broadcast %cst_97 : f32 to vector<32x1xf32>
    %333 = arith.addf %329, %332 : vector<32x1xf32>
    %334 = math.rsqrt %333 : vector<32x1xf32>
    %335 = vector.broadcast %334 : vector<32x1xf32> to vector<32x128xf32>
    %336 = arith.mulf %331, %335 : vector<32x128xf32>
    %337 = vector.broadcast %218 : vector<1x128xf32> to vector<32x128xf32>
    %338 = arith.mulf %336, %337 : vector<32x128xf32>
    %339 = vector.broadcast %219 : vector<1x128xf32> to vector<32x128xf32>
    %340 = arith.addf %338, %339 : vector<32x128xf32>
    %341 = arith.truncf %340 : vector<32x128xf32> to vector<32x128xbf16>
    %c1_98 = arith.constant 1 : index
    %c0_99 = arith.constant 0 : index
    %c0_100 = arith.constant 0 : index
    %342 = vector.load %arg4[%c1_98, %c0_99, %c0_100] : memref<2x128x512xbf16, #tpu.memory_space<vmem>>, vector<1x128x512xbf16>
    %343 = vector.shape_cast %342 : vector<1x128x512xbf16> to vector<128x512xbf16>
    %cst_101 = arith.constant dense<0.000000e+00> : vector<32x512xf32>
    %344 = tpu.matmul %341, %343, %cst_101 {dimension_numbers = #tpu.dot_dimension_numbers<[1], [0], [0], [1], [0, 0, 1, 1], [], []>} : vector<32x128xbf16>, vector<128x512xbf16>, vector<32x512xf32> -> vector<32x512xf32>
    %c1_102 = arith.constant 1 : index
    %c0_103 = arith.constant 0 : index
    %c0_104 = arith.constant 0 : index
    %345 = vector.load %arg5[%c1_102, %c0_103, %c0_104] : memref<2x1x512xf32, #tpu.memory_space<vmem>>, vector<1x1x512xf32>
    %346 = vector.shape_cast %345 : vector<1x1x512xf32> to vector<1x512xf32>
    %347 = vector.broadcast %346 : vector<1x512xf32> to vector<32x512xf32>
    %348 = arith.addf %344, %347 : vector<32x512xf32>
    %cst_105 = arith.constant 5.000000e-01 : f32
    %349 = vector.broadcast %cst_105 : f32 to vector<32x512xf32>
    %350 = arith.mulf %349, %348 : vector<32x512xf32>
    %cst_106 = arith.constant 0.707106769 : f32
    %351 = vector.broadcast %cst_106 : f32 to vector<32x512xf32>
    %352 = arith.mulf %348, %351 : vector<32x512xf32>
    %cst_107 = arith.constant 0.000000e+00 : f32
    %353 = vector.broadcast %cst_107 : f32 to vector<32x512xf32>
    %354 = arith.cmpf oge, %352, %353 : vector<32x512xf32>
    %cst_108 = arith.constant 1.000000e+00 : f32
    %cst_109 = arith.constant -1.000000e+00 : f32
    %355 = vector.broadcast %cst_108 : f32 to vector<32x512xf32>
    %356 = vector.broadcast %cst_109 : f32 to vector<32x512xf32>
    %357 = arith.select %354, %355, %356 : vector<32x512xi1>, vector<32x512xf32>
    %358 = math.absf %352 : vector<32x512xf32>
    %cst_110 = arith.constant 0.327591091 : f32
    %359 = vector.broadcast %cst_110 : f32 to vector<32x512xf32>
    %360 = arith.mulf %359, %358 : vector<32x512xf32>
    %cst_111 = arith.constant 1.000000e+00 : f32
    %361 = vector.broadcast %cst_111 : f32 to vector<32x512xf32>
    %362 = arith.addf %361, %360 : vector<32x512xf32>
    %cst_112 = arith.constant 1.000000e+00 : f32
    %363 = vector.broadcast %cst_112 : f32 to vector<32x512xf32>
    %364 = arith.divf %363, %362 : vector<32x512xf32>
    %cst_113 = arith.constant 1.06140542 : f32
    %365 = vector.broadcast %cst_113 : f32 to vector<32x512xf32>
    %366 = arith.mulf %365, %364 : vector<32x512xf32>
    %cst_114 = arith.constant -1.45315206 : f32
    %367 = vector.broadcast %cst_114 : f32 to vector<32x512xf32>
    %368 = arith.addf %366, %367 : vector<32x512xf32>
    %369 = arith.mulf %368, %364 : vector<32x512xf32>
    %cst_115 = arith.constant 1.42141378 : f32
    %370 = vector.broadcast %cst_115 : f32 to vector<32x512xf32>
    %371 = arith.addf %369, %370 : vector<32x512xf32>
    %372 = arith.mulf %371, %364 : vector<32x512xf32>
    %cst_116 = arith.constant -0.284496725 : f32
    %373 = vector.broadcast %cst_116 : f32 to vector<32x512xf32>
    %374 = arith.addf %372, %373 : vector<32x512xf32>
    %375 = arith.mulf %374, %364 : vector<32x512xf32>
    %cst_117 = arith.constant 0.254829586 : f32
    %376 = vector.broadcast %cst_117 : f32 to vector<32x512xf32>
    %377 = arith.addf %375, %376 : vector<32x512xf32>
    %378 = arith.mulf %377, %364 : vector<32x512xf32>
    %cst_118 = arith.constant 0.000000e+00 : f32
    %379 = vector.broadcast %cst_118 : f32 to vector<32x512xf32>
    %380 = arith.subf %379, %358 : vector<32x512xf32>
    %381 = arith.mulf %380, %358 : vector<32x512xf32>
    %382 = math.exp %381 : vector<32x512xf32>
    %383 = arith.mulf %378, %382 : vector<32x512xf32>
    %cst_119 = arith.constant 1.000000e+00 : f32
    %384 = vector.broadcast %cst_119 : f32 to vector<32x512xf32>
    %385 = arith.subf %384, %383 : vector<32x512xf32>
    %386 = arith.mulf %357, %385 : vector<32x512xf32>
    %cst_120 = arith.constant 1.000000e+00 : f32
    %387 = vector.broadcast %cst_120 : f32 to vector<32x512xf32>
    %388 = arith.addf %387, %386 : vector<32x512xf32>
    %389 = arith.mulf %350, %388 : vector<32x512xf32>
    %390 = arith.truncf %389 : vector<32x512xf32> to vector<32x512xbf16>
    %c1_121 = arith.constant 1 : index
    %c0_122 = arith.constant 0 : index
    %c0_123 = arith.constant 0 : index
    %391 = vector.load %arg6[%c1_121, %c0_122, %c0_123] : memref<2x512x128xbf16, #tpu.memory_space<vmem>>, vector<1x512x128xbf16>
    %392 = vector.shape_cast %391 : vector<1x512x128xbf16> to vector<512x128xbf16>
    %cst_124 = arith.constant dense<0.000000e+00> : vector<32x128xf32>
    %393 = tpu.matmul %390, %392, %cst_124 {dimension_numbers = #tpu.dot_dimension_numbers<[1], [0], [0], [1], [0, 0, 1, 1], [], []>} : vector<32x512xbf16>, vector<512x128xbf16>, vector<32x128xf32> -> vector<32x128xf32>
    %394 = vector.broadcast %222 : vector<1x128xf32> to vector<32x128xf32>
    %395 = arith.addf %393, %394 : vector<32x128xf32>
    %396 = arith.addf %340, %395 : vector<32x128xf32>
    %cst_125 = arith.constant dense<0.000000e+00> : vector<32xf32>
    %397 = vector.multi_reduction <add>, %396, %cst_125 [1] : vector<32x128xf32> to vector<32xf32>
    %398 = vector.shape_cast %397 : vector<32xf32> to vector<32x1xf32>
    %cst_126 = arith.constant 1.280000e+02 : f32
    %399 = vector.broadcast %cst_126 : f32 to vector<32x1xf32>
    %400 = arith.divf %398, %399 : vector<32x1xf32>
    %401 = vector.broadcast %400 : vector<32x1xf32> to vector<32x128xf32>
    %402 = arith.subf %396, %401 : vector<32x128xf32>
    %403 = arith.mulf %402, %402 : vector<32x128xf32>
    %cst_127 = arith.constant dense<0.000000e+00> : vector<32xf32>
    %404 = vector.multi_reduction <add>, %403, %cst_127 [1] : vector<32x128xf32> to vector<32xf32>
    %405 = vector.shape_cast %404 : vector<32xf32> to vector<32x1xf32>
    %cst_128 = arith.constant 1.280000e+02 : f32
    %406 = vector.broadcast %cst_128 : f32 to vector<32x1xf32>
    %407 = arith.divf %405, %406 : vector<32x1xf32>
    %408 = vector.broadcast %400 : vector<32x1xf32> to vector<32x128xf32>
    %409 = arith.subf %396, %408 : vector<32x128xf32>
    %cst_129 = arith.constant 9.99999996E-13 : f32
    %410 = vector.broadcast %cst_129 : f32 to vector<32x1xf32>
    %411 = arith.addf %407, %410 : vector<32x1xf32>
    %412 = math.rsqrt %411 : vector<32x1xf32>
    %413 = vector.broadcast %412 : vector<32x1xf32> to vector<32x128xf32>
    %414 = arith.mulf %409, %413 : vector<32x128xf32>
    %415 = vector.broadcast %220 : vector<1x128xf32> to vector<32x128xf32>
    %416 = arith.mulf %414, %415 : vector<32x128xf32>
    %417 = vector.broadcast %221 : vector<1x128xf32> to vector<32x128xf32>
    %418 = arith.addf %416, %417 : vector<32x128xf32>
    %419 = tpu.iota {dimensions = array<i32: 0>} : vector<8x32xi32>
    %420 = tpu.iota {dimensions = array<i32: 1>} : vector<8x32xi32>
    %c3_i32_130 = arith.constant 3 : i32
    %421 = vector.broadcast %c3_i32_130 : i32 to vector<8x32xi32>
    %422 = arith.shrui %420, %421 : vector<8x32xi32>
    %c4_i32 = arith.constant 4 : i32
    %423 = vector.broadcast %c4_i32 : i32 to vector<8x32xi32>
    %424 = arith.cmpi sge, %419, %423 : vector<8x32xi32>
    %c6_i32 = arith.constant 6 : i32
    %425 = vector.broadcast %c6_i32 : i32 to vector<8x32xi32>
    %426 = arith.cmpi slt, %419, %425 : vector<8x32xi32>
    %427 = arith.andi %424, %426 : vector<8x32xi1>
    %c4_i32_131 = arith.constant 4 : i32
    %428 = vector.broadcast %c4_i32_131 : i32 to vector<8x32xi32>
    %429 = arith.cmpi slt, %419, %428 : vector<8x32xi32>
    %430 = arith.cmpi eq, %422, %419 : vector<8x32xi32>
    %431 = arith.andi %429, %430 : vector<8x32xi1>
    %cst_132 = arith.constant 1.250000e-01 : f32
    %cst_133 = arith.constant 0.000000e+00 : f32
    %432 = vector.broadcast %cst_132 : f32 to vector<8x32xf32>
    %433 = vector.broadcast %cst_133 : f32 to vector<8x32xf32>
    %434 = arith.select %431, %432, %433 : vector<8x32xi1>, vector<8x32xf32>
    %c4_i32_134 = arith.constant 4 : i32
    %435 = vector.broadcast %c4_i32_134 : i32 to vector<8x32xi32>
    %436 = arith.subi %419, %435 : vector<8x32xi32>
    %437 = arith.cmpi eq, %422, %436 : vector<8x32xi32>
    %438 = arith.andi %427, %437 : vector<8x32xi1>
    %cst_135 = arith.constant 1.250000e-01 : f32
    %cst_136 = arith.constant 0.000000e+00 : f32
    %439 = vector.broadcast %cst_135 : f32 to vector<8x32xf32>
    %440 = vector.broadcast %cst_136 : f32 to vector<8x32xf32>
    %441 = arith.select %438, %439, %440 : vector<8x32xi1>, vector<8x32xf32>
    %442 = arith.addf %434, %441 : vector<8x32xf32>
    %c4_i32_137 = arith.constant 4 : i32
    %443 = vector.broadcast %c4_i32_137 : i32 to vector<8x32xi32>
    %444 = arith.subi %419, %443 : vector<8x32xi32>
    %c2_i32 = arith.constant 2 : i32
    %445 = vector.broadcast %c2_i32 : i32 to vector<8x32xi32>
    %446 = arith.addi %444, %445 : vector<8x32xi32>
    %447 = arith.cmpi eq, %422, %446 : vector<8x32xi32>
    %448 = arith.andi %427, %447 : vector<8x32xi1>
    %cst_138 = arith.constant -1.250000e-01 : f32
    %cst_139 = arith.constant 0.000000e+00 : f32
    %449 = vector.broadcast %cst_138 : f32 to vector<8x32xf32>
    %450 = vector.broadcast %cst_139 : f32 to vector<8x32xf32>
    %451 = arith.select %448, %449, %450 : vector<8x32xi1>, vector<8x32xf32>
    %452 = arith.addf %442, %451 : vector<8x32xf32>
    %453 = arith.truncf %452 : vector<8x32xf32> to vector<8x32xbf16>
    %454 = arith.truncf %418 : vector<32x128xf32> to vector<32x128xbf16>
    %cst_140 = arith.constant dense<0.000000e+00> : vector<8x128xf32>
    %455 = tpu.matmul %453, %454, %cst_140 {dimension_numbers = #tpu.dot_dimension_numbers<[1], [0], [0], [1], [0, 0, 1, 1], [], []>} : vector<8x32xbf16>, vector<32x128xbf16>, vector<8x128xf32> -> vector<8x128xf32>
    %456 = arith.truncf %455 : vector<8x128xf32> to vector<8x128xbf16>
    %c0_141 = arith.constant 0 : index
    %c0_142 = arith.constant 0 : index
    %457 = vector.load %arg7[%c0_141, %c0_142] : memref<128x128xbf16, #tpu.memory_space<vmem>>, vector<128x128xbf16>
    %cst_143 = arith.constant dense<0.000000e+00> : vector<8x128xf32>
    %458 = tpu.matmul %456, %457, %cst_143 {dimension_numbers = #tpu.dot_dimension_numbers<[1], [0], [0], [1], [0, 0, 1, 1], [], []>} : vector<8x128xbf16>, vector<128x128xbf16>, vector<8x128xf32> -> vector<8x128xf32>
    %c0_144 = arith.constant 0 : index
    %c0_145 = arith.constant 0 : index
    %459 = vector.load %arg8[%c0_144, %c0_145] : memref<1x128xf32, #tpu.memory_space<vmem>>, vector<1x128xf32>
    %460 = vector.broadcast %459 : vector<1x128xf32> to vector<8x128xf32>
    %461 = arith.addf %458, %460 : vector<8x128xf32>
    %c0_146 = arith.constant 0 : index
    %c0_147 = arith.constant 0 : index
    %462 = vector.load %arg9[%c0_146, %c0_147] : memref<8x128xf32, #tpu.memory_space<vmem>>, vector<8x128xf32>
    tpu.vector_store %arg9[%c0_146, %c0_147], %461 {strides = array<i32>} : memref<8x128xf32, #tpu.memory_space<vmem>>, vector<8x128xf32>,
    return
  }
}

</mosaic_0001>

<bundles_post_ra>
// kernel: hier_siamese_forward.1
= control target key start
LH: loop header
LB: loop body
LE: loop exit
PB: predicated region body
PF: predicated region fallthrough
CT: control target
= control target key end

     0   :  { %14 = vsyncpa [#allocation3], 0  ;;  %s8246_s0 = inlined_call_operand.vmem [shape: f32[32,128], index: 0, kind: input, shape index: {}]   ;;  %s8247_s1 = inlined_call_operand.hbm [shape: bf16[2,128,768], index: 1, kind: input, shape index: {}]   ;;  %s8248_s2 = inlined_call_operand.vmem [shape: f32[2,1,768], index: 2, kind: input, shape index: {}]   ;;  %s8249_s3 = inlined_call_operand.vmem [shape: f32[2,6,128], index: 3, kind: input, shape index: {}]   ;;  %s8250_s4 = inlined_call_operand.hbm [shape: bf16[2,128,512], index: 4, kind: input, shape index: {}]   ;;  %s8251_s5 = inlined_call_operand.vmem [shape: f32[2,1,512], index: 5, kind: input, shape index: {}]   ;;  %s8252_s6 = inlined_call_operand.hbm [shape: bf16[2,512,128], index: 6, kind: input, shape index: {}]   ;;  %s8253_s7 = inlined_call_operand.vmem [shape: bf16[128,128], index: 7, kind: input, shape index: {}]   ;;  %s8254_s8 = inlined_call_operand.vmem [shape: f32[1,128], index: 8, kind: input, shape index: {}]   ;;  %s8255_s9 = inlined_call_operand.vmem [shape: f32[8,128], index: 9, kind: output, shape index: {}]  }
   0x1   :  { %15 = vsyncpa [#allocation5], 0  ;;  %s6502_s30 = smov [#allocation4]   ;;  %s6432_s13 = scalar_lea.hbm %s8250_s4, 8192 }
   0x2   :  { %s39_s10 = sshll.u32 %s6502_s30, 4  ;;  %p6433_p0 = scmp.ne.s32.totalorder %s8250_s4, %s6432_s13  ;;  %s40_s10 = int_to_ptr.vmem [resolvable:$true] %s39_s10 }
   0x3   :  { %p6436_p1 = scmp.lt.u32.totalorder %s6432_s13, %s8250_s4 }
   0x5   :  { %p6438_p2 = pnand %p6436_p1, %p6433_p0 }
   0x7   :  { %6441 = shalt.err (!%p6438_p2)
}
   0x8   :  { %s6442_s18 = scalar_lea.vmem %s40_s10, 8192  ;;  %p6447_p4 = scmp.lt.s32.totalorder %s40_s10, %s40_s10 }
   0x9   :  { %p6443_p3 = scmp.ne.s32.totalorder %s40_s10, %s6442_s18  ;;  %p6448_p5 = scmp.lt.s32.totalorder %s6442_s18, %s6442_s18 }
   0xb   :  { %p6449_p6 = por %p6448_p5, %p6447_p4 }
   0xd   :  { %p6450_p7 = pnand %p6449_p6, %p6443_p3 }
   0xf   :  { %6453 = shalt.err (!%p6450_p7)
}
  0x10   :  { %s6503_s19 = smov 256   ;;  %s6504_s20 = smov 16  }
  0x11   :  { %45 = dma.hbm_to_vmem [thread:$0]  %s8250_s4, 8192, %s40_s10, [#allocation5], %s6503_s19, %s6503_s19, %s6504_s20  }
  0x12   :  { %s6505_s23 = smov [#allocation2]   ;;  %s6454_s27 = scalar_lea.hbm %s8247_s1, 12288 }
  0x13   :  { %s23_s24 = sshll.u32 %s6505_s23, 4  ;;  %p6455_p8 = scmp.ne.s32.totalorder %s8247_s1, %s6454_s27  ;;  %s24_s24 = int_to_ptr.vmem [resolvable:$true] %s23_s24 }
  0x14   :  { %p6458_p9 = scmp.lt.u32.totalorder %s6454_s27, %s8247_s1 }
  0x16   :  { %p6460_p10 = pnand %p6458_p9, %p6455_p8 }
  0x18   :  { %6463 = shalt.err (!%p6460_p10)
}
  0x19   :  { %s6464_s12 = scalar_lea.vmem %s24_s24, 12288  ;;  %p6469_p12 = scmp.lt.s32.totalorder %s24_s24, %s24_s24 }
  0x1a   :  { %p6465_p11 = scmp.ne.s32.totalorder %s24_s24, %s6464_s12  ;;  %p6470_p13 = scmp.lt.s32.totalorder %s6464_s12, %s6464_s12 }
  0x1c   :  { %p6471_p0 = por %p6470_p13, %p6469_p12 }
  0x1e   :  { %p6472_p1 = pnand %p6471_p0, %p6465_p11 }
  0x20   :  { %6475 = shalt.err (!%p6472_p1)
}
  0x21   :  { %s6506_s4 = smov 384   ;;  %s6507_s10 = smov 24  }
  0x22   :  { %29 = dma.hbm_to_vmem [thread:$0]  %s8247_s1, 12288, %s24_s24, [#allocation3], %s6506_s4, %s6506_s4, %s6507_s10  }
  0x23   :  { %s6508_s15 = smov [#allocation6]   ;;  %s6476_s19 = scalar_lea.hbm %s8252_s6, 8192 }
  0x24   :  { %s53_s16 = sshll.u32 %s6508_s15, 4  ;;  %p6477_p2 = scmp.ne.s32.totalorder %s8252_s6, %s6476_s19  ;;  %s54_s16 = int_to_ptr.vmem [resolvable:$true] %s53_s16 }
  0x25   :  { %p6480_p3 = scmp.lt.u32.totalorder %s6476_s19, %s8252_s6 }
  0x27   :  { %p6482_p4 = pnand %p6480_p3, %p6477_p2 }
  0x29   :  { %6485 = shalt.err (!%p6482_p4)
}
  0x2a   :  { %s6486_s25 = scalar_lea.vmem %s54_s16, 8192  ;;  %p6491_p6 = scmp.lt.s32.totalorder %s54_s16, %s54_s16 }
  0x2b   :  { %p6487_p5 = scmp.ne.s32.totalorder %s54_s16, %s6486_s25  ;;  %p6492_p7 = scmp.lt.s32.totalorder %s6486_s25, %s6486_s25 }
  0x2d   :  { %p6493_p8 = por %p6492_p7, %p6491_p6 }
  0x2f   :  { %p6494_p9 = pnand %p6493_p8, %p6487_p5 }
  0x31   :  { %6497 = shalt.err (!%p6494_p9)
}
  0x32   :  { %s6509_s1 = smov 64   ;;  %s6510_s24 = smov 4  }
  0x33   :  { %59 = dma.hbm_to_vmem [thread:$0]  %s8252_s6, 8192, %s54_s16, [#allocation5], %s6509_s1, %s6509_s1, %s6510_s24  }
  0x34   :  { %6498 = dma.done.wait [#allocation3], 12288  }
  0x35   :  { %6499 = vsyncadd [#allocation3], 4294955008 }
  0x36   :  { %6500 = dma.done.wait [#allocation5], 16384  }
  0x37   :  { %6501 = vsyncadd [#allocation5], 4294950912  ;;  %v8256_v0 = vmov 0   ;;  %v5826_v1 = vld [vmem:[#allocation2 + $0x4] ss:$24 sps:$4 sm:$0xff]   ;;  %v75_v27 = vld [vmem:[%s8246_s0 + $0x8] sm:$0xff]  ;;  %v78_v55 = vlaneseq }
  0x38   :  { %453 = vmatprep.mubr.bf16.mxu0 %v8256_v0  ;;  %506 = vmatprep.mubr.bf16.mxu1 %v8256_v0  ;;  %v5828_v2 = vld [vmem:[#allocation2] ss:$24 sps:$4 sm:$0xff]   ;;  %v5829_v3 = vld [vmem:[#allocation2 + $0x34] ss:$24 sps:$4 sm:$0xff]   ;;  %v5831_v4 = vld [vmem:[#allocation2 + $0x30] ss:$24 sps:$4 sm:$0xff]  }
  0x39   :  { %421 = vmatprep.subr.bf16.mxu0 %v5826_v1  ;;  %v5832_v5 = vld [vmem:[#allocation2 + $0x64] ss:$24 sps:$4 sm:$0xff]   ;;  %v5834_v6 = vld [vmem:[#allocation2 + $0x60] ss:$24 sps:$4 sm:$0xff]   ;;  %v5835_v7 = vld [vmem:[#allocation2 + $0x94] ss:$24 sps:$4 sm:$0xff]  }
  0x3a   :  { %422 = vmatpush1.bf16.msra.mxu0 %v5828_v2  ;;  %v5837_v8 = vld [vmem:[#allocation2 + $0x90] ss:$24 sps:$4 sm:$0xff]   ;;  %v5838_v9 = vld [vmem:[#allocation2 + $0xc4] ss:$24 sps:$4 sm:$0xff]   ;;  %v5840_v12 = vld [vmem:[#allocation2 + $0xc0] ss:$24 sps:$4 sm:$0xff]  }
  0x3b   :  { %423 = vmatprep.subr.bf16.mxu0 %v5829_v3  ;;  %v5850_v10 = vld [vmem:[#allocation2 + $0xc] ss:$24 sps:$4 sm:$0xff]   ;;  %v5852_v11 = vld [vmem:[#allocation2 + $0x8] ss:$24 sps:$4 sm:$0xff]   ;;  %v5853_v13 = vld [vmem:[#allocation2 + $0x3c] ss:$24 sps:$4 sm:$0xff]  }
  0x3c   :  { %474 = vmatprep.subr.bf16.mxu1 %v5850_v10  ;;  %v5841_v14 = vld [vmem:[#allocation2 + $0xf4] ss:$24 sps:$4 sm:$0xff]   ;;  %v5855_v15 = vld [vmem:[#allocation2 + $0x38] ss:$24 sps:$4 sm:$0xff]   ;;  %v5844_v18 = vld [vmem:[#allocation2 + $0x124] ss:$24 sps:$4 sm:$0xff]  }
  0x3d   :  { %475 = vmatpush1.bf16.msra.mxu1 %v5852_v11  ;;  %v5856_v16 = vld [vmem:[#allocation2 + $0x6c] ss:$24 sps:$4 sm:$0xff]   ;;  %v5843_v17 = vld [vmem:[#allocation2 + $0xf0] ss:$24 sps:$4 sm:$0xff]   ;;  %v5859_v20 = vld [vmem:[#allocation2 + $0x9c] ss:$24 sps:$4 sm:$0xff]  }
  0x3e   :  { %424 = vmatpush1.bf16.msra.mxu0 %v5831_v4  ;;  %476 = vmatprep.subr.bf16.mxu1 %v5853_v13  ;;  %v5858_v19 = vld [vmem:[#allocation2 + $0x68] ss:$24 sps:$4 sm:$0xff]   ;;  %v5847_v22 = vld [vmem:[#allocation2 + $0x154] ss:$24 sps:$4 sm:$0xff]   ;;  %v5861_v23 = vld [vmem:[#allocation2 + $0x98] ss:$24 sps:$4 sm:$0xff]  }
  0x3f   :  { %425 = vmatprep.subr.bf16.mxu0 %v5832_v5  ;;  %v5846_v21 = vld [vmem:[#allocation2 + $0x120] ss:$24 sps:$4 sm:$0xff]   ;;  %v5862_v24 = vld [vmem:[#allocation2 + $0xcc] ss:$24 sps:$4 sm:$0xff]   ;;  %v5849_v25 = vld [vmem:[#allocation2 + $0x150] ss:$24 sps:$4 sm:$0xff]  }
  0x40   :  { %v74_v26 = vld [vmem:[%s8246_s0] sm:$0xff]  ;;  %v5865_v29 = vld [vmem:[#allocation2 + $0xfc] ss:$24 sps:$4 sm:$0xff]   ;;  %v5867_v30 = vld [vmem:[#allocation2 + $0xf8] ss:$24 sps:$4 sm:$0xff]   ;;  %v6625_v56 = vshrl.u32 %v78_v55, 7 }
  0x41   :  { %477 = vmatpush1.bf16.msra.mxu1 %v5855_v15  ;;  %v5864_v28 = vld [vmem:[#allocation2 + $0xc8] ss:$24 sps:$4 sm:$0xff]   ;;  %v99_v31 = vpack.c.bf16 %v75_v27, %v74_v26  ;;  %v5868_v32 = vld [vmem:[#allocation2 + $0x12c] ss:$24 sps:$4 sm:$0xff]   ;;  %v76_v33 = vld [vmem:[%s8246_s0 + $0x10] sm:$0xff]  ;;  %vm586_vm0 = vcmask 261120  }
  0x42   :  { %426 = vmatpush1.bf16.msra.mxu0 %v5834_v6  ;;  %478 = vmatprep.subr.bf16.mxu1 %v5856_v16  ;;  %v77_v34 = vld [vmem:[%s8246_s0 + $0x18] sm:$0xff]  ;;  %v5870_v35 = vld [vmem:[#allocation2 + $0x128] ss:$24 sps:$4 sm:$0xff]   ;;  %v5876_v40 = vld [vmem:[#allocation2 + $0x14] ss:$24 sps:$4 sm:$0xff]   ;;  %8301 = vst [vmem:[#allocation9_spill] sm:$0xff] %v6625_v56 }
  0x43   :  { %427 = vmatprep.subr.bf16.mxu0 %v5835_v7  ;;  %v5871_v36 = vld [vmem:[#allocation2 + $0x15c] ss:$24 sps:$4 sm:$0xff]   ;;  %v5873_v37 = vld [vmem:[#allocation2 + $0x158] ss:$24 sps:$4 sm:$0xff]   ;;  %v100_v38 = vpack.c.bf16 %v77_v34, %v76_v33  ;;  %v6628_v57 = vsub.s32 0, %v6625_v56  ;;  %v6636_v59 = vsub.s32 1, %v6625_v56 }
  0x44   :  { %v5874_v39 = vld [vmem:[#allocation2 + $0x10] ss:$24 sps:$4 sm:$0xff]   ;;  %v5879_v41 = vld [vmem:[#allocation2 + $0x44] ss:$24 sps:$4 sm:$0xff]   ;;  %v5877_v42 = vld [vmem:[#allocation2 + $0x40] ss:$24 sps:$4 sm:$0xff]  }
  0x45   :  { %479 = vmatpush1.bf16.msra.mxu1 %v5858_v19  ;;  %v5882_v43 = vld [vmem:[#allocation2 + $0x74] ss:$24 sps:$4 sm:$0xff]   ;;  %v5880_v44 = vld [vmem:[#allocation2 + $0x70] ss:$24 sps:$4 sm:$0xff]   ;;  %v5885_v45 = vld [vmem:[#allocation2 + $0xa4] ss:$24 sps:$4 sm:$0xff]  }
  0x46   :  { %428 = vmatpush1.bf16.msra.mxu0 %v5837_v8  ;;  %480 = vmatprep.subr.bf16.mxu1 %v5859_v20  ;;  %v5883_v46 = vld [vmem:[#allocation2 + $0xa0] ss:$24 sps:$4 sm:$0xff]   ;;  %v5888_v47 = vld [vmem:[#allocation2 + $0xd4] ss:$24 sps:$4 sm:$0xff]   ;;  %v5886_v48 = vld [vmem:[#allocation2 + $0xd0] ss:$24 sps:$4 sm:$0xff]  }
  0x47   :  { %429 = vmatprep.subr.bf16.mxu0 %v5838_v9  ;;  %v5891_v49 = vld [vmem:[#allocation2 + $0x104] ss:$24 sps:$4 sm:$0xff]   ;;  %v5889_v50 = vld [vmem:[#allocation2 + $0x100] ss:$24 sps:$4 sm:$0xff]   ;;  %v5894_v51 = vld [vmem:[#allocation2 + $0x134] ss:$24 sps:$4 sm:$0xff]  }
  0x48   :  { %v5892_v52 = vld [vmem:[#allocation2 + $0x130] ss:$24 sps:$4 sm:$0xff]   ;;  %v5897_v53 = vld [vmem:[#allocation2 + $0x164] ss:$24 sps:$4 sm:$0xff]   ;;  %v5895_v54 = vld [vmem:[#allocation2 + $0x160] ss:$24 sps:$4 sm:$0xff]  }
  0x49   :  { %481 = vmatpush1.bf16.msra.mxu1 %v5861_v23  ;;  %8302 = vst [vmem:[#allocation10_spill] sm:$0xff] %v6628_v57  ;;  %v6633_v58 = vld [vmem:[%s8248_s2] sm:$0x3f]  ;;  %8303 = vst [vmem:[#allocation11_spill] sm:$0xff] %v6636_v59  ;;  %v6657_v16 = vsub.s32 2, %v6625_v56  ;;  %s6513_s15 = smov 96  }
  0x4a   :  { %430 = vmatpush1.bf16.msra.mxu0 %v5840_v12  ;;  %482 = vmatprep.subr.bf16.mxu1 %v5862_v24  ;;  %v154_v60 = vrot.slane %v6633_v58, %v6628_v57  ;;  %v158_v62 = vrot.slane %v6633_v58, %v6636_v59  ;;  %s6514_s16 = smov 32  }
  0x4b   :  { %431 = vmatprep.subr.bf16.mxu0 %v5841_v14  ;;  %8304 = vst [vmem:[#allocation12_spill] sm:$0xff] %v6657_v16 }
  0x4d   :  { %483 = vmatpush1.bf16.msra.mxu1 %v5864_v28 }
  0x4e   :  { %432 = vmatpush1.bf16.msra.mxu0 %v5843_v17  ;;  %484 = vmatprep.subr.bf16.mxu1 %v5865_v29  ;;  %v6660_v17 = vsub.s32 3, %v6625_v56 }
  0x4f   :  { %433 = vmatprep.subr.bf16.mxu0 %v5844_v18 }
  0x50   :  { %8305 = vst [vmem:[#allocation13_spill] sm:$0xff] %v6660_v17  ;;  %v166_v23 = vrot.slane %v6633_v58, %v6660_v17 }
  0x51   :  { %485 = vmatpush1.bf16.msra.mxu1 %v5867_v30 }
  0x52   :  { %434 = vmatpush1.bf16.msra.mxu0 %v5846_v21  ;;  %486 = vmatprep.subr.bf16.mxu1 %v5868_v32 }
  0x53   :  { %435 = vmatprep.subr.bf16.mxu0 %v5847_v22  ;;  %v162_v22 = vrot.slane %v6633_v58, %v6657_v16 }
  0x55   :  { %487 = vmatpush1.bf16.msra.mxu1 %v5870_v35 }
  0x56   :  { %436 = vmatpush1.bf16.msra.mxu0 %v5849_v25  ;;  %488 = vmatprep.subr.bf16.mxu1 %v5871_v36 }
  0x57   :  { %527 = vmatprep.subr.bf16.mxu0 %v5876_v40 }
  0x59   :  { %454 = vmatmul.mubr.bf16.vlgmr.msra.gmra.mrb[0].mxu0 %v99_v31  ;;  %489 = vmatpush1.bf16.msra.mxu1 %v5873_v37 }
  0x5a   :  { %463 = vmatprep.mubr.bf16.mxu0 %v8256_v0  ;;  %528 = vmatpush1.bf16.msra.mxu0 %v5874_v39 }
  0x5b   :  { %529 = vmatprep.subr.bf16.mxu0 %v5879_v41 }
  0x5c   :  { %507 = vmatmul.mubr.bf16.vlgmr.msra.gmra.mrb[0].mxu1 %v99_v31 }
  0x5d   :  { %516 = vmatprep.mubr.bf16.mxu1 %v8256_v0 }
  0x5e   :  { %530 = vmatpush1.bf16.msra.mxu0 %v5877_v42 }
  0x5f   :  { %531 = vmatprep.subr.bf16.mxu0 %v5882_v43 }
  0x61   :  { %464 = vmatmul.mubr.bf16.gmra.mrb[4].mxu0 %v100_v38 }
  0x62   :  { %559 = vmatprep.mubr.bf16.mxu0 %v8256_v0  ;;  %532 = vmatpush1.bf16.msra.mxu0 %v5880_v44 }
  0x63   :  { %533 = vmatprep.subr.bf16.mxu0 %v5885_v45 }
  0x64   :  { %517 = vmatmul.mubr.bf16.gmra.mrb[4].mxu1 %v100_v38 }
  0x66   :  { %534 = vmatpush1.bf16.msra.mxu0 %v5883_v46 }
  0x67   :  { %535 = vmatprep.subr.bf16.mxu0 %v5888_v47 }
  0x6a   :  { %536 = vmatpush1.bf16.msra.mxu0 %v5886_v48 }
  0x6b   :  { %537 = vmatprep.subr.bf16.mxu0 %v5891_v49 }
  0x6e   :  { %538 = vmatpush1.bf16.msra.mxu0 %v5889_v50  ;;  %v6694_v50 = vsub.s32 4, %v6625_v56 }
  0x6f   :  { %539 = vmatprep.subr.bf16.mxu0 %v5894_v51  ;;  %v6697_v51 = vsub.s32 5, %v6625_v56 }
  0x70   :  { %8306 = vst [vmem:[#allocation14_spill] sm:$0xff] %v6694_v50 }
  0x71   :  { %8307 = vst [vmem:[#allocation15_spill] sm:$0xff] %v6697_v51 }
  0x72   :  { %540 = vmatpush1.bf16.msra.mxu0 %v5892_v52 }
  0x73   :  { %541 = vmatprep.subr.bf16.mxu0 %v5897_v53  ;;  %v170_v53 = vrot.slane %v6633_v58, %v6694_v50 }
  0x76   :  { %542 = vmatpush1.bf16.msra.mxu0 %v5895_v54  ;;  %v174_v54 = vrot.slane %v6633_v58, %v6697_v51 }
  0x79   :  { %560 = vmatmul.mubr.bf16.vlgmr.msra.gmra.mrb[8].mxu0 %v99_v31 }
  0x7a   :  { %569 = vmatprep.mubr.bf16.mxu0 %v8256_v0 }
  0x81   :  { %570 = vmatmul.mubr.bf16.gmra.mrb[12].mxu0 %v100_v38 }
 0x12c   :  { %v455_v61 = vpop.f32.mrb[0].mxu0 }
 0x12d   :  { %v457_v63 = vpop.f32.mrb[1].mxu0  ;;  %v456_v2 = vadd.f32 %v455_v61, %v154_v60 }
 0x12e   :  { %v459_v1 = vpop.f32.mrb[2].mxu0  ;;  %v458_v5 = vadd.f32 %v457_v63, %v158_v62 }
 0x12f   :  { %v460_v3 = vadd.f32 %v459_v1, %v154_v60  ;;  %v461_v4 = vpop.f32.mrb[3].mxu0  ;;  %v508_v20 = vpop.f32.mrb[0].mxu1 }
 0x130   :  { %v462_v6 = vadd.f32 %v461_v4, %v158_v62  ;;  %v510_v24 = vpop.f32.mrb[1].mxu1  ;;  %v509_v27 = vadd.f32 %v508_v20, %v162_v22 }
 0x131   :  { %v6642_v7 = vpack.c.bf16 %v460_v3, %v456_v2  ;;  %v512_v26 = vpop.f32.mrb[2].mxu1  ;;  %v511_v28 = vadd.f32 %v510_v24, %v166_v23 }
 0x132   :  { %v6644_v8 = vpack.c.bf16 %v462_v6, %v458_v5  ;;  %v513_v29 = vadd.f32 %v512_v26, %v162_v22  ;;  %v514_v30 = vpop.f32.mrb[3].mxu1  ;;  %v88_v26 = vand.u32 127, %v78_v55 }
 0x133   :  { %927 = vrot.lane.b32.xlu1 %v6642_v7, %s6509_s1  ;;  %5618 = vmatprep.mubr.msk.bf16.mxu1 %vm586_vm0, %v6642_v7  ;;  %v515_v32 = vadd.f32 %v514_v30, %v166_v23  ;;  %v83_v30 = vshrl.u32 %v6625_v56, 3 }
 0x134   :  { %v465_v9 = vpop.f32.mrb[4].mxu0  ;;  %931 = vrot.lane.b32.xlu0 %v6644_v8, %s6509_s1  ;;  %5794 = vmatprep.subr.msk.bf16.mxu1 %vm586_vm0, %v6644_v8  ;;  %v594_v10 = vsel %vm586_vm0, %v6644_v8, 0  ;;  %v6678_v33 = vpack.c.bf16 %v513_v29, %v509_v27  ;;  %v81_v27 = vadd.s32 16, %v6625_v56  ;;  %v6719_v29 = vshrl.u32 %v88_v26, 3 }
 0x135   :  { %v467_v11 = vpop.f32.mrb[5].mxu0  ;;  %5615 = vmatpush3.bf16.xpose.msra.mxu1 %v594_v10  ;;  %v466_v13 = vadd.f32 %v465_v9, %v154_v60  ;;  %v6680_v34 = vpack.c.bf16 %v515_v32, %v511_v28  ;;  %v80_v28 = vadd.s32 8, %v6625_v56  ;;  %v82_v32 = vadd.s32 24, %v6625_v56 }
 0x136   :  { %v469_v12 = vpop.f32.mrb[6].mxu0  ;;  %v468_v18 = vadd.f32 %v467_v11, %v158_v62  ;;  %8308 = vst [vmem:[#allocation16_spill] sm:$0xff] %v6719_v29  ;;  %vm90_vm1 = vcmp.eq.s32.totalorder %v83_v30, %v6719_v29 }
 0x137   :  { %v470_v14 = vadd.f32 %v469_v12, %v154_v60  ;;  %v471_v15 = vpop.f32.mrb[7].mxu0  ;;  %v518_v35 = vpop.f32.mrb[4].mxu1 }
 0x138   :  { %v472_v19 = vadd.f32 %v471_v15, %v158_v62  ;;  %v519_v36 = vadd.f32 %v518_v35, %v162_v22  ;;  %v520_v37 = vpop.f32.mrb[5].mxu1  ;;  %v84_v35 = vshrl.u32 %v80_v28, 3 }
 0x139   :  { %v6662_v21 = vpack.c.bf16 %v470_v14, %v466_v13  ;;  %v521_v38 = vadd.f32 %v520_v37, %v166_v23  ;;  %v522_v39 = vpop.f32.mrb[6].mxu1  ;;  %v6512_v37 = vmov -1e+30  }
 0x13a   :  { %v6668_v25 = vpack.c.bf16 %v472_v19, %v468_v18  ;;  %v523_v40 = vadd.f32 %v522_v39, %v162_v22  ;;  %v524_v41 = vpop.f32.mrb[7].mxu1  ;;  %vm91_vm3 = vcmp.eq.s32.totalorder %v84_v35, %v6719_v29 }
 0x13b   :  { %929 = vrot.lane.b32.xlu1 %v6662_v21, %s6509_s1  ;;  %v525_v42 = vadd.f32 %v524_v41, %v166_v23 }
 0x13c   :  { %933 = vrot.lane.b32.xlu0 %v6668_v25, %s6509_s1  ;;  %5795 = vmatprep.subr.msk.bf16.mxu1 %vm586_vm0, %v6668_v25  ;;  %v597_v31 = vsel %vm586_vm0, %v6668_v25, 0  ;;  %v6684_v43 = vpack.c.bf16 %v523_v40, %v519_v36  ;;  %v86_v36 = vshrl.u32 %v82_v32, 3 }
 0x13d   :  { %5617 = vmatpush3.bf16.xpose.msra.mxu1 %v597_v31  ;;  %v6686_v44 = vpack.c.bf16 %v525_v42, %v521_v38  ;;  %v85_v31 = vshrl.u32 %v81_v27, 3  ;;  %v6726_v38 = vsel %vm90_vm1, 0.0, %v6512_v37 }
 0x13e   :  { %8309 = vst [vmem:[#allocation17_spill] sm:$0xff] %v6726_v38  ;;  %vm93_vm4 = vcmp.eq.s32.totalorder %v86_v36, %v6719_v29 }
 0x13f   :  { %vm92_vm2 = vcmp.eq.s32.totalorder %v85_v31, %v6719_v29 }
 0x140   :  { %v6729_v42 = vsel %vm92_vm2, 0.0, %v6512_v37 }
 0x141   :  { %8310 = vst [vmem:[#allocation18_spill] sm:$0xff] %v6729_v42 }
 0x144   :  { %5619 = vmatmul.mubr.msk.bf16.vlgmr.msra.gmra.mrb[8].mxu1 %vm586_vm0, %v6662_v21 }
 0x14c   :  { %v561_v60 = vpop.f32.mrb[8].mxu0 }
 0x14d   :  { %v562_v61 = vadd.f32 %v561_v60, %v170_v53  ;;  %v563_v62 = vpop.f32.mrb[9].mxu0 }
 0x14e   :  { %v564_v63 = vadd.f32 %v563_v62, %v174_v54  ;;  %v565_v1 = vpop.f32.mrb[10].mxu0 }
 0x14f   :  { %v566_v2 = vadd.f32 %v565_v1, %v170_v53  ;;  %v567_v3 = vpop.f32.mrb[11].mxu0 }
 0x150   :  { %v568_v4 = vadd.f32 %v567_v3, %v174_v54 }
 0x151   :  { %v925_v5 = vpack.c.bf16 %v566_v2, %v562_v61 }
 0x152   :  { %v6704_v6 = vpack.c.bf16 %v568_v4, %v564_v63 }
 0x154   :  { %v571_v9 = vpop.f32.mrb[12].mxu0 }
 0x155   :  { %v572_v10 = vadd.f32 %v571_v9, %v170_v53  ;;  %v573_v11 = vpop.f32.mrb[13].mxu0 }
 0x156   :  { %v574_v12 = vadd.f32 %v573_v11, %v174_v54  ;;  %v575_v13 = vpop.f32.mrb[14].mxu0 }
 0x157   :  { %v576_v14 = vadd.f32 %v575_v13, %v170_v53  ;;  %v577_v58 = vpop.f32.mrb[15].mxu0  ;;  %v6738_v53 = vsel %vm93_vm4, 0.0, %v6512_v37 }
 0x158   :  { %v578_v15 = vadd.f32 %v577_v58, %v174_v54  ;;  %8312 = vst [vmem:[#allocation20_spill] sm:$0xff] %v6738_v53 }
 0x159   :  { %v926_v18 = vpack.c.bf16 %v576_v14, %v572_v10 }
 0x15a   :  { %v6706_v19 = vpack.c.bf16 %v578_v15, %v574_v12 }
 0x1a5   :  { %v928_v45 = vpop.permute.xlu1 %927 }
 0x1a6   :  { %v932_v46 = vpop.permute.xlu0 %931  ;;  %5650 = vmatprep.mubr.msk.bf16.mxu0 %vm586_vm0, %v928_v45  ;;  %v6731_v45 = vsel %vm91_vm3, 0.0, %v6512_v37 }
 0x1a7   :  { %5798 = vmatprep.subr.msk.bf16.mxu0 %vm586_vm0, %v932_v46  ;;  %v942_v47 = vsel %vm586_vm0, %v932_v46, 0  ;;  %8311 = vst [vmem:[#allocation19_spill] sm:$0xff] %v6731_v45 }
 0x1a8   :  { %5647 = vmatpush3.bf16.xpose.msra.mxu0 %v942_v47 }
 0x1ad   :  { %v930_v52 = vpop.permute.xlu1 %929 }
 0x1ae   :  { %v934_v48 = vpop.permute.xlu0 %933 }
 0x1af   :  { %5799 = vmatprep.subr.msk.bf16.mxu0 %vm586_vm0, %v934_v48  ;;  %v945_v49 = vsel %vm586_vm0, %v934_v48, 0 }
 0x1b0   :  { %5649 = vmatpush3.bf16.xpose.msra.mxu0 %v945_v49 }
 0x1b1   :  { %5654 = vmatprep.subr.bf16.mxu0 %v925_v5 }
 0x1b7   :  { %5651 = vmatmul.mubr.msk.bf16.vlgmr.msra.gmra.mrb[16].mxu0 %vm586_vm0, %v930_v52 }
 0x1b8   :  { %5655 = vmatpush3.bf16.msra.mxu0 %v925_v5 }
 0x1b9   :  { %5656 = vmatprep.subr.bf16.mxu0 %v926_v18 }
 0x1bc   :  { %5657 = vmatpush3.bf16.msra.mxu0 %v926_v18 }
 0x217   :  { %v6708_v20 = vpop.f32.mrb[8].mxu1 }
 0x218   :  { %v6710_v22 = vpop.f32.mrb[9].mxu1 }
 0x219   :  { %v6712_v23 = vpop.f32.mrb[10].mxu1 }
 0x21a   :  { %v6714_v24 = vpop.f32.mrb[11].mxu1 }
 0x28a   :  { %v5652_v55 = vpop.f32.mrb[16].mxu0 }
 0x28b   :  { %v981_v39 = vpop.f32.mrb[17].mxu0  ;;  %v990_v47 = vadd.f32 %v5652_v55, %v6729_v42 }
 0x28c   :  { %v982_v40 = vadd.f32 %v981_v39, %v6726_v38  ;;  %v5653_v41 = vpop.f32.mrb[18].mxu0 }
 0x28d   :  { %v984_v46 = vpop.f32.mrb[19].mxu0  ;;  %v993_v54 = vadd.f32 %v5653_v41, %v6738_v53  ;;  %v1002_v60 = vsel %vm586_vm0, %v990_v47, -inf }
 0x28e   :  { %v985_v48 = vadd.f32 %v984_v46, %v6731_v45  ;;  %v996_v49 = vsel %vm586_vm0, %v982_v40, -inf }
 0x28f   :  { %997 = vmax.xlane.f32.xlu0 %v996_v49  ;;  %v1005_v61 = vsel %vm586_vm0, %v993_v54, -inf }
 0x290   :  { %v999_v52 = vsel %vm586_vm0, %v985_v48, -inf }
 0x291   :  { %1000 = vmax.xlane.f32.xlu1 %v999_v52 }
 0x293   :  { %1003 = vmax.xlane.f32.xlu0 %v1002_v60 }
 0x297   :  { %1006 = vmax.xlane.f32.xlu0 %v1005_v61 }
 0x2a2   :  { %704 = vrot.lane.b32.xlu1 %v6644_v8, %s6513_s15 }
 0x2a6   :  { %698 = vrot.lane.b32.xlu1 %v6642_v7, %s6513_s15 }
 0x2ad   :  { %706 = vrot.lane.b32.xlu0 %v6668_v25, %s6513_s15 }
 0x31c   :  { %v998_v62 = vpop.xlane.xlu0 %997 }
 0x31d   :  { %v1008_v1 = vsub.f32 %v982_v40, %v998_v62 }
 0x31e   :  { %v1001_v63 = vpop.xlane.xlu1 %1000 }
 0x31f   :  { %v1012_v5 = vmul.f32 1.442695, %v1008_v1  ;;  %v1009_v9 = vsub.f32 %v985_v48, %v1001_v63 }
 0x320   :  { %v1004_v2 = vpop.xlane.xlu0 %1003 }
 0x321   :  { %v1010_v3 = vsub.f32 %v990_v47, %v1004_v2  ;;  %v1014_v58 = vmul.f32 1.442695, %v1009_v9 }
 0x322   :  { %v705_v4 = vpop.permute.xlu1 %704 }
 0x323   :  { %v1016_v10 = vmul.f32 1.442695, %v1010_v3  ;;  %5796 = vmatprep.subr.msk.bf16.mxu1 %vm586_vm0, %v705_v4  ;;  %v715_v11 = vsel %vm586_vm0, %v705_v4, 0 }
 0x324   :  { %v1007_v12 = vpop.xlane.xlu0 %1006  ;;  %5623 = vmatpush3.bf16.xpose.msra.mxu1 %v715_v11 }
 0x325   :  { %6138 = vpow2.f32 %v1016_v10  ;;  %v1011_v13 = vsub.f32 %v993_v54, %v1007_v12 }
 0x326   :  { %v699_v14 = vpop.permute.xlu1 %698  ;;  %6140 = vpow2.f32 %v1012_v5 }
 0x327   :  { %v1018_v15 = vmul.f32 1.442695, %v1011_v13  ;;  %5626 = vmatprep.mubr.msk.bf16.mxu1 %vm586_vm0, %v699_v14  ;;  %v634_v13 = vadd.f32 %v6710_v22, %v6726_v38 }
 0x328   :  { %v707_v18 = vpop.permute.xlu0 %706 }
 0x329   :  { %6142 = vpow2.f32 %v1018_v15  ;;  %5797 = vmatprep.subr.msk.bf16.mxu1 %vm586_vm0, %v707_v18  ;;  %v718_v26 = vsel %vm586_vm0, %v707_v18, 0  ;;  %v642_v18 = vadd.f32 %v6708_v20, %v6729_v42 }
 0x32a   :  { %6144 = vpow2.f32 %v1014_v58 }
 0x32b   :  { %v654_v22 = vsel %vm586_vm0, %v642_v18, -inf }
 0x32c   :  { %5625 = vmatpush3.bf16.xpose.msra.mxu1 %v718_v26  ;;  %v648_v26 = vsel %vm586_vm0, %v634_v13, -inf }
 0x32d   :  { %5630 = vmatprep.subr.bf16.mxu1 %v6680_v34 }
 0x32f   :  { %v6139_v27 = vpop.eup %6138 }
 0x330   :  { %v1026_v28 = vsel %vm586_vm0, %v6139_v27, 0.0  ;;  %v6141_v30 = vpop.eup %6140 }
 0x331   :  { %1027 = vadd.xlane.f32.xlu1 %v1026_v28  ;;  %v1020_v32 = vsel %vm586_vm0, %v6141_v30, 0.0 }
 0x333   :  { %v6143_v31 = vpop.eup %6142 }
 0x334   :  { %v1029_v35 = vsel %vm586_vm0, %v6143_v31, 0.0  ;;  %v6145_v36 = vpop.eup %6144 }
 0x335   :  { %1021 = vadd.xlane.f32.xlu1 %v1020_v32  ;;  %1030 = vadd.xlane.f32.xlu0 %v1029_v35  ;;  %v1023_v55 = vsel %vm586_vm0, %v6145_v36, 0.0 }
 0x339   :  { %1024 = vadd.xlane.f32.xlu0 %v1023_v55 }
 0x346   :  { %700 = vrot.lane.b32.xlu1 %v6662_v21, %s6513_s15 }
 0x34a   :  { %1109 = vrot.lane.b32.xlu1 %v6668_v25, %s6514_s16 }
 0x34e   :  { %1105 = vrot.lane.b32.xlu1 %v6662_v21, %s6514_s16 }
 0x34f   :  { %1107 = vrot.lane.b32.xlu0 %v6644_v8, %s6514_s16 }
 0x353   :  { %1103 = vrot.lane.b32.xlu0 %v6642_v7, %s6514_s16 }
 0x3be   :  { %v1028_v37 = vpop.xlane.xlu1 %1027 }
 0x3c2   :  { %v1022_v39 = vpop.xlane.xlu1 %1021  ;;  %v1031_v40 = vpop.xlane.xlu0 %1030 }
 0x3c3   :  { %6146 = vrcp.f32 %v1031_v40 }
 0x3c4   :  { %6148 = vrcp.f32 %v1022_v39 }
 0x3c5   :  { %6150 = vrcp.f32 %v1028_v37 }
 0x3c6   :  { %v701_v41 = vpop.permute.xlu1 %700  ;;  %v1025_v46 = vpop.xlane.xlu0 %1024 }
 0x3c7   :  { %6152 = vrcp.f32 %v1025_v46  ;;  %5627 = vmatmul.mubr.msk.bf16.vlgmr.msra.gmra.mrb[12].mxu1 %vm586_vm0, %v701_v41 }
 0x3c8   :  { %5631 = vmatpush3.bf16.msra.mxu1 %v6680_v34 }
 0x3c9   :  { %5632 = vmatprep.subr.bf16.mxu1 %v6686_v44 }
 0x3ca   :  { %v1108_v21 = vpop.permute.xlu0 %1107 }
 0x3cb   :  { %5800 = vmatprep.subr.msk.bf16.mxu0 %vm586_vm0, %v1108_v21  ;;  %v1118_v62 = vsel %vm586_vm0, %v1108_v21, 0 }
 0x3cc   :  { %5633 = vmatpush3.bf16.msra.mxu1 %v6686_v44  ;;  %v1110_v44 = vpop.permute.xlu1 %1109 }
 0x3cd   :  { %5638 = vmatprep.subr.bf16.mxu1 %v6678_v33  ;;  %v6147_v7 = vpop.eup %6146  ;;  %v1121_v63 = vsel %vm586_vm0, %v1110_v44, 0 }
 0x3ce   :  { %v6149_v8 = vpop.eup %6148  ;;  %v1039_v48 = vmul.f32 %v6147_v7, %v6143_v31  ;;  %v1104_v34 = vpop.permute.xlu0 %1103 }
 0x3cf   :  { %v6151_v25 = vpop.eup %6150  ;;  %v1036_v49 = vmul.f32 %v6149_v8, %v6141_v30  ;;  %v645_v30 = vadd.f32 %v6712_v23, %v6738_v53 }
 0x3d0   :  { %v1038_v54 = vmul.f32 %v6151_v25, %v6139_v27  ;;  %v1106_v1 = vpop.permute.xlu1 %1105  ;;  %v637_v27 = vadd.f32 %v6714_v24, %v6731_v45 }
 0x3d1   :  { %v6153_v47 = vpop.eup %6152  ;;  %v657_v24 = vsel %vm586_vm0, %v645_v30, -inf }
 0x3d2   :  { %v1037_v52 = vmul.f32 %v6153_v47, %v6145_v36  ;;  %v1041_v61 = vpack.c.bf16 %v1039_v48, %v1038_v54  ;;  %v651_v32 = vsel %vm586_vm0, %v637_v27, -inf }
 0x3d4   :  { %v1040_v60 = vpack.c.bf16 %v1037_v52, %v1036_v49 }
 0x3d6   :  { %5658 = vmatprep.mubr.msk.bf16.mxu0 %vm586_vm0, %v1040_v60 }
 0x3d7   :  { %5659 = vmatmul.mubr.msk.bf16.vlgmr.msra.gmra.mrb[20].mxu0 %vm586_vm0, %v1041_v61 }
 0x3d8   :  { %5663 = vmatpush3.bf16.xpose.msra.mxu0 %v1118_v62  ;;  %5666 = vmatprep.mubr.msk.bf16.mxu0 %vm586_vm0, %v1104_v34 }
 0x3d9   :  { %5801 = vmatprep.subr.msk.bf16.mxu0 %vm586_vm0, %v1110_v44 }
 0x3e0   :  { %5665 = vmatpush3.bf16.xpose.msra.mxu0 %v1121_v63 }
 0x3e7   :  { %5667 = vmatmul.mubr.msk.bf16.vlgmr.msra.gmra.mrb[24].mxu0 %vm586_vm0, %v1106_v1 }
 0x3e8   :  { %1598 = vmatprep.mubr.bf16.mxu0 %v8256_v0 }
 0x49a   :  { %v5628_v2 = vpop.f32.mrb[12].mxu1 }
 0x49b   :  { %v754_v3 = vpop.f32.mrb[13].mxu1  ;;  %v763_v10 = vadd.f32 %v5628_v2, %v6729_v42 }
 0x49c   :  { %v755_v4 = vadd.f32 %v754_v3, %v6726_v38  ;;  %v5629_v5 = vpop.f32.mrb[14].mxu1 }
 0x49d   :  { %v757_v9 = vpop.f32.mrb[15].mxu1  ;;  %v766_v58 = vadd.f32 %v5629_v5, %v6738_v53  ;;  %v775_v15 = vsel %vm586_vm0, %v763_v10, -inf }
 0x49e   :  { %v758_v11 = vadd.f32 %v757_v9, %v6731_v45  ;;  %v769_v12 = vsel %vm586_vm0, %v755_v4, -inf }
 0x49f   :  { %770 = vmax.xlane.f32.xlu0 %v769_v12  ;;  %v778_v28 = vsel %vm586_vm0, %v766_v58, -inf }
 0x4a0   :  { %v772_v14 = vsel %vm586_vm0, %v758_v11, -inf }
 0x4a1   :  { %773 = vmax.xlane.f32.xlu1 %v772_v14 }
 0x4a3   :  { %776 = vmax.xlane.f32.xlu0 %v775_v15 }
 0x4a5   :  { %649 = vmax.xlane.f32.xlu1 %v648_v26 }
 0x4a7   :  { %779 = vmax.xlane.f32.xlu0 %v778_v28 }
 0x4a9   :  { %655 = vmax.xlane.f32.xlu1 %v654_v22 }
 0x4aa   :  { %v6801_v31 = vpop.f32.mrb[20].mxu0 }
 0x4ab   :  { %v6804_v20 = vpop.f32.mrb[21].mxu0  ;;  %652 = vmax.xlane.f32.xlu0 %v651_v32 }
 0x4ac   :  { %v6806_v35 = vpop.f32.mrb[22].mxu0 }
 0x4ad   :  { %v6808_v36 = vpop.f32.mrb[23].mxu0 }
 0x4af   :  { %658 = vmax.xlane.f32.xlu0 %v657_v24 }
 0x4ba   :  { %v5668_v55 = vpop.f32.mrb[24].mxu0 }
 0x4bb   :  { %v1157_v37 = vpop.f32.mrb[25].mxu0  ;;  %v6815_v41 = vadd.f32 %v5668_v55, %v6729_v42 }
 0x4bc   :  { %v6812_v39 = vadd.f32 %v1157_v37, %v6726_v38  ;;  %v5669_v23 = vpop.f32.mrb[26].mxu0 }
 0x4bd   :  { %v1160_v40 = vpop.f32.mrb[27].mxu0  ;;  %v6823_v7 = vadd.f32 %v5669_v23, %v6738_v53  ;;  %v1178_v25 = vsel %vm586_vm0, %v6815_v41, -inf  ;;  %v8268_v53 = vmov -1.0  }
 0x4be   :  { %v6818_v46 = vadd.f32 %v1160_v40, %v6731_v45  ;;  %v1172_v21 = vsel %vm586_vm0, %v6812_v39, -inf }
 0x4bf   :  { %1173 = vmax.xlane.f32.xlu1 %v1172_v21  ;;  %v1181_v47 = vsel %vm586_vm0, %v6823_v7, -inf }
 0x4c0   :  { %v1175_v8 = vsel %vm586_vm0, %v6818_v46, -inf }
 0x4c1   :  { %1176 = vmax.xlane.f32.xlu0 %v1175_v8 }
 0x4c3   :  { %1179 = vmax.xlane.f32.xlu1 %v1178_v25 }
 0x4c5   :  { %1182 = vmax.xlane.f32.xlu0 %v1181_v47 }
 0x52c   :  { %v771_v48 = vpop.xlane.xlu0 %770 }
 0x52d   :  { %v781_v49 = vsub.f32 %v755_v4, %v771_v48 }
 0x52e   :  { %v774_v52 = vpop.xlane.xlu1 %773 }
 0x52f   :  { %v785_v54 = vmul.f32 1.442695, %v781_v49  ;;  %v782_v60 = vsub.f32 %v758_v11, %v774_v52 }
 0x530   :  { %v777_v61 = vpop.xlane.xlu0 %776 }
 0x531   :  { %6154 = vpow2.f32 %v785_v54  ;;  %v787_v34 = vmul.f32 1.442695, %v782_v60  ;;  %v783_v62 = vsub.f32 %v763_v10, %v777_v61 }
 0x532   :  { %v650_v44 = vpop.xlane.xlu1 %649 }
 0x533   :  { %6156 = vpow2.f32 %v787_v34  ;;  %v789_v63 = vmul.f32 1.442695, %v783_v62  ;;  %v660_v1 = vsub.f32 %v634_v13, %v650_v44 }
 0x534   :  { %v780_v2 = vpop.xlane.xlu0 %779 }
 0x535   :  { %6158 = vpow2.f32 %v789_v63  ;;  %v664_v3 = vmul.f32 1.442695, %v660_v1  ;;  %v784_v5 = vsub.f32 %v766_v58, %v780_v2 }
 0x536   :  { %v656_v9 = vpop.xlane.xlu1 %655 }
 0x537   :  { %6160 = vpow2.f32 %v664_v3  ;;  %v791_v12 = vmul.f32 1.442695, %v784_v5  ;;  %v662_v14 = vsub.f32 %v642_v18, %v656_v9 }
 0x538   :  { %v653_v4 = vpop.xlane.xlu0 %652 }
 0x539   :  { %6162 = vpow2.f32 %v791_v12  ;;  %v668_v15 = vmul.f32 1.442695, %v662_v14  ;;  %v661_v11 = vsub.f32 %v637_v27, %v653_v4 }
 0x53b   :  { %v6831_v26 = vpop.eup %6154  ;;  %6164 = vpow2.f32 %v668_v15  ;;  %v666_v10 = vmul.f32 1.442695, %v661_v11 }
 0x53c   :  { %v659_v28 = vpop.xlane.xlu0 %658  ;;  %v793_v13 = vsel %vm586_vm0, %v6831_v26, 0.0 }
 0x53d   :  { %v6835_v22 = vpop.eup %6156  ;;  %6166 = vpow2.f32 %v666_v10  ;;  %v663_v58 = vsub.f32 %v645_v30, %v659_v28  ;;  %794 = vadd.xlane.f32.xlu1 %v793_v13 }
 0x53e   :  { %v796_v18 = vsel %vm586_vm0, %v6835_v22, 0.0 }
 0x53f   :  { %v6839_v32 = vpop.eup %6158  ;;  %v670_v24 = vmul.f32 1.442695, %v663_v58  ;;  %797 = vadd.xlane.f32.xlu0 %v796_v18 }
 0x540   :  { %v799_v27 = vsel %vm586_vm0, %v6839_v32, 0.0 }
 0x541   :  { %v6843_v55 = vpop.eup %6160  ;;  %6168 = vpow2.f32 %v670_v24  ;;  %800 = vadd.xlane.f32.xlu1 %v799_v27 }
 0x542   :  { %v672_v23 = vsel %vm586_vm0, %v6843_v55, 0.0 }
 0x543   :  { %v6845_v37 = vpop.eup %6162 }
 0x544   :  { %v802_v30 = vsel %vm586_vm0, %v6845_v37, 0.0 }
 0x545   :  { %v6851_v40 = vpop.eup %6164  ;;  %803 = vadd.xlane.f32.xlu0 %v802_v30  ;;  %673 = vadd.xlane.f32.xlu1 %v672_v23 }
 0x546   :  { %v678_v25 = vsel %vm586_vm0, %v6851_v40, 0.0 }
 0x547   :  { %v6853_v21 = vpop.eup %6166 }
 0x548   :  { %v675_v8 = vsel %vm586_vm0, %v6853_v21, 0.0 }
 0x549   :  { %676 = vadd.xlane.f32.xlu0 %v675_v8  ;;  %679 = vadd.xlane.f32.xlu1 %v678_v25 }
 0x54b   :  { %v6859_v47 = vpop.eup %6168 }
 0x54c   :  { %v1174_v48 = vpop.xlane.xlu1 %1173  ;;  %v681_v49 = vsel %vm586_vm0, %v6859_v47, 0.0 }
 0x54d   :  { %v1184_v52 = vsub.f32 %v6812_v39, %v1174_v48  ;;  %682 = vadd.xlane.f32.xlu0 %v681_v49 }
 0x54e   :  { %v1177_v54 = vpop.xlane.xlu0 %1176 }
 0x54f   :  { %v1188_v60 = vmul.f32 1.442695, %v1184_v52  ;;  %v1185_v61 = vsub.f32 %v6818_v46, %v1177_v54 }
 0x550   :  { %v1180_v34 = vpop.xlane.xlu1 %1179 }
 0x551   :  { %6170 = vpow2.f32 %v1188_v60  ;;  %v1190_v62 = vmul.f32 1.442695, %v1185_v61  ;;  %v1186_v44 = vsub.f32 %v6815_v41, %v1180_v34 }
 0x552   :  { %v1183_v63 = vpop.xlane.xlu0 %1182 }
 0x553   :  { %6172 = vpow2.f32 %v1190_v62  ;;  %v1192_v1 = vmul.f32 1.442695, %v1186_v44  ;;  %v1187_v2 = vsub.f32 %v6823_v7, %v1183_v63 }
 0x555   :  { %6174 = vpow2.f32 %v1192_v1  ;;  %v1194_v3 = vmul.f32 1.442695, %v1187_v2 }
 0x557   :  { %6176 = vpow2.f32 %v1194_v3 }
 0x55b   :  { %v6867_v5 = vpop.eup %6170 }
 0x55c   :  { %v1196_v39 = vsel %vm586_vm0, %v6867_v5, 0.0 }
 0x55d   :  { %v6871_v9 = vpop.eup %6172  ;;  %1197 = vadd.xlane.f32.xlu1 %v1196_v39 }
 0x55e   :  { %v1199_v46 = vsel %vm586_vm0, %v6871_v9, 0.0 }
 0x55f   :  { %v6875_v41 = vpop.eup %6174  ;;  %1200 = vadd.xlane.f32.xlu0 %v1199_v46 }
 0x560   :  { %v1202_v7 = vsel %vm586_vm0, %v6875_v41, 0.0 }
 0x561   :  { %v6879_v12 = vpop.eup %6176  ;;  %1203 = vadd.xlane.f32.xlu1 %v1202_v7 }
 0x562   :  { %v1205_v14 = vsel %vm586_vm0, %v6879_v12, 0.0 }
 0x563   :  { %1206 = vadd.xlane.f32.xlu0 %v1205_v14 }
 0x5ca   :  { %v795_v4 = vpop.xlane.xlu1 %794 }
 0x5cb   :  { %6178 = vrcp.f32 %v795_v4 }
 0x5cc   :  { %v798_v15 = vpop.xlane.xlu0 %797 }
 0x5cd   :  { %6180 = vrcp.f32 %v798_v15 }
 0x5ce   :  { %v801_v11 = vpop.xlane.xlu1 %800 }
 0x5cf   :  { %6182 = vrcp.f32 %v801_v11 }
 0x5d2   :  { %v804_v10 = vpop.xlane.xlu0 %803  ;;  %v674_v28 = vpop.xlane.xlu1 %673 }
 0x5d3   :  { %6184 = vrcp.f32 %v804_v10 }
 0x5d4   :  { %6186 = vrcp.f32 %v674_v28 }
 0x5d5   :  { %v6179_v13 = vpop.eup %6178 }
 0x5d6   :  { %v677_v58 = vpop.xlane.xlu0 %676  ;;  %v809_v24 = vmul.f32 %v6179_v13, %v6831_v26  ;;  %v680_v30 = vpop.xlane.xlu1 %679 }
 0x5d7   :  { %v6181_v18 = vpop.eup %6180  ;;  %6188 = vrcp.f32 %v677_v58 }
 0x5d8   :  { %v810_v27 = vmul.f32 %v6181_v18, %v6835_v22 }
 0x5d9   :  { %v6183_v25 = vpop.eup %6182 }
 0x5da   :  { %v683_v23 = vpop.xlane.xlu0 %682  ;;  %v813_v8 = vpack.c.bf16 %v810_v27, %v809_v24  ;;  %v811_v49 = vmul.f32 %v6183_v25, %v6839_v32  ;;  %v6428_v25 = vld [vmem:[%s8246_s0 + $0x8] sm:$0xff] }
 0x5db   :  { %6190 = vrcp.f32 %v683_v23  ;;  %v6427_v23 = vld [vmem:[%s8246_s0 + $0x10] sm:$0xff] }
 0x5dc   :  { %5634 = vmatprep.mubr.msk.bf16.mxu1 %vm586_vm0, %v813_v8  ;;  %6192 = vrcp.f32 %v680_v30 }
 0x5dd   :  { %v6185_v48 = vpop.eup %6184 }
 0x5de   :  { %v812_v52 = vmul.f32 %v6185_v48, %v6845_v37  ;;  %v6187_v54 = vpop.eup %6186 }
 0x5df   :  { %v688_v26 = vmul.f32 %v6187_v54, %v6843_v55 }
 0x5e0   :  { %v814_v60 = vpack.c.bf16 %v812_v52, %v811_v49  ;;  %v6429_v52 = vld [vmem:[%s8246_s0 + $0x18] sm:$0xff] }
 0x5e1   :  { %v6189_v61 = vpop.eup %6188 }
 0x5e2   :  { %5635 = vmatmul.mubr.msk.bf16.vlgmr.msra.gmra.mrb[16].mxu1 %vm586_vm0, %v814_v60  ;;  %v689_v22 = vmul.f32 %v6189_v61, %v6853_v21 }
 0x5e3   :  { %5639 = vmatpush3.bf16.msra.mxu1 %v6678_v33 }
 0x5e4   :  { %5640 = vmatprep.subr.bf16.mxu1 %v6684_v43  ;;  %v692_v34 = vpack.c.bf16 %v689_v22, %v688_v26  ;;  %v5898_v22 = vld [vmem:[#allocation4] ss:$16 sps:$4 sm:$0xff]  }
 0x5e5   :  { %v6191_v62 = vpop.eup %6190 }
 0x5e6   :  { %5642 = vmatprep.mubr.msk.bf16.mxu1 %vm586_vm0, %v692_v34  ;;  %v6193_v32 = vpop.eup %6192  ;;  %v691_v37 = vmul.f32 %v6191_v62, %v6859_v47  ;;  %v5900_v34 = vld [vmem:[#allocation4 + $0x4] ss:$16 sps:$4 sm:$0xff]   ;;  %v5901_v62 = vld [vmem:[#allocation4 + $0x8] ss:$16 sps:$4 sm:$0xff]  }
 0x5e7   :  { %5641 = vmatpush3.bf16.msra.mxu1 %v6684_v43  ;;  %v690_v44 = vmul.f32 %v6193_v32, %v6851_v40  ;;  %v5903_v32 = vld [vmem:[#allocation4 + $0xc] ss:$16 sps:$4 sm:$0xff]   ;;  %1566 = vmatprep.subr.bf16.mxu0 %v5900_v34 }
 0x5e8   :  { %5670 = vmatprep.subr.bf16.mxu1 %v6704_v6  ;;  %1567 = vmatpush1.bf16.msra.mxu0 %v5898_v22 }
 0x5e9   :  { %v693_v63 = vpack.c.bf16 %v691_v37, %v690_v44  ;;  %v5906_v37 = vld [vmem:[#allocation4 + $0x24] ss:$16 sps:$4 sm:$0xff]   ;;  %v5909_v44 = vld [vmem:[#allocation4 + $0x2c] ss:$16 sps:$4 sm:$0xff]  }
 0x5ea   :  { %v1198_v55 = vpop.xlane.xlu1 %1197  ;;  %1568 = vmatprep.subr.bf16.mxu0 %v5906_v37 }
 0x5eb   :  { %6194 = vrcp.f32 %v1198_v55  ;;  %v5904_v55 = vld [vmem:[#allocation4 + $0x20] ss:$16 sps:$4 sm:$0xff]  }
 0x5ec   :  { %v1201_v21 = vpop.xlane.xlu0 %1200  ;;  %1569 = vmatpush1.bf16.msra.mxu0 %v5904_v55 }
 0x5ed   :  { %6196 = vrcp.f32 %v1201_v21  ;;  %v5907_v21 = vld [vmem:[#allocation4 + $0x28] ss:$16 sps:$4 sm:$0xff]  }
 0x5ee   :  { %v1204_v33 = vpop.xlane.xlu1 %1203  ;;  %5643 = vmatmul.mubr.msk.bf16.vlgmr.msra.gmra.mrb[16].mxu1 %vm586_vm0, %v693_v63 }
 0x5ef   :  { %6198 = vrcp.f32 %v1204_v33  ;;  %5671 = vmatpush3.bf16.msra.mxu1 %v6704_v6 }
 0x5f0   :  { %v1207_v1 = vpop.xlane.xlu0 %1206  ;;  %5672 = vmatprep.subr.bf16.mxu1 %v6706_v19 }
 0x5f1   :  { %6200 = vrcp.f32 %v1207_v1 }
 0x5f3   :  { %5673 = vmatpush3.bf16.msra.mxu1 %v6706_v19 }
 0x5f4   :  { %1619 = vmatprep.subr.bf16.mxu1 %v5903_v32 }
 0x5f5   :  { %v6195_v43 = vpop.eup %6194 }
 0x5f6   :  { %v1212_v40 = vmul.f32 %v6195_v43, %v6867_v5 }
 0x5f7   :  { %v6197_v47 = vpop.eup %6196 }
 0x5f8   :  { %v1213_v2 = vmul.f32 %v6197_v47, %v6871_v9 }
 0x5f9   :  { %v6199_v3 = vpop.eup %6198 }
 0x5fa   :  { %v1216_v39 = vpack.c.bf16 %v1213_v2, %v1212_v40  ;;  %v1214_v7 = vmul.f32 %v6199_v3, %v6875_v41 }
 0x5fb   :  { %v6201_v46 = vpop.eup %6200 }
 0x5fc   :  { %v1215_v14 = vmul.f32 %v6201_v46, %v6879_v12  ;;  %5674 = vmatprep.mubr.msk.bf16.mxu1 %vm586_vm0, %v1216_v39  ;;  %v6916_v12 = vld [vmem:[%s8249_s3] sm:$0x3f] }
 0x5fe   :  { %v1217_v6 = vpack.c.bf16 %v1215_v14, %v1214_v7 }
 0x600   :  { %5675 = vmatmul.mubr.msk.bf16.vlgmr.msra.gmra.mrb[20].mxu1 %vm586_vm0, %v1217_v6 }
 0x601   :  { %1651 = vmatprep.mubr.bf16.mxu1 %v8256_v0  ;;  %1620 = vmatpush1.bf16.msra.mxu1 %v5901_v62 }
 0x602   :  { %1621 = vmatprep.subr.bf16.mxu1 %v5909_v44 }
 0x605   :  { %1622 = vmatpush1.bf16.msra.mxu1 %v5907_v21 }
 0x6c1   :  { %v5644_v19 = vpop.f32.mrb[16].mxu1 }
 0x6c2   :  { %v5770_v4 = vadd.f32 %v6801_v31, %v5644_v19  ;;  %v910_v5 = vpop.f32.mrb[17].mxu1  ;;  %v1284_v31 = vrot.slane %v6916_v12, %v6628_v57 }
 0x6c3   :  { %v5772_v9 = vadd.f32 %v6804_v20, %v910_v5  ;;  %v5645_v15 = vpop.f32.mrb[18].mxu1 }
 0x6c4   :  { %v5774_v11 = vadd.f32 %v6806_v35, %v5645_v15  ;;  %v913_v10 = vpop.f32.mrb[19].mxu1  ;;  %v6426_v35 = vld [vmem:[%s8246_s0] sm:$0xff]  ;;  %v5915_v15 = vld [vmem:[#allocation4 + $0x4c] ss:$16 sps:$4 sm:$0xff]  }
 0x6c5   :  { %v5776_v41 = vadd.f32 %v6808_v36, %v913_v10  ;;  %v5913_v10 = vld [vmem:[#allocation4 + $0x48] ss:$16 sps:$4 sm:$0xff]   ;;  %1623 = vmatprep.subr.bf16.mxu1 %v5915_v15 }
 0x6c6   :  { %1624 = vmatpush1.bf16.msra.mxu1 %v5913_v10 }
 0x6d3   :  { %v5676_v28 = vpop.f32.mrb[20].mxu1 }
 0x6d4   :  { %v5771_v13 = vadd.f32 %v5770_v4, %v5676_v28  ;;  %v1258_v58 = vpop.f32.mrb[21].mxu1  ;;  %v5921_v28 = vld [vmem:[#allocation4 + $0x6c] ss:$16 sps:$4 sm:$0xff]  }
 0x6d5   :  { %v5773_v18 = vadd.f32 %v5772_v9, %v1258_v58  ;;  %v5677_v24 = vpop.f32.mrb[22].mxu1  ;;  %v5912_v9 = vld [vmem:[#allocation4 + $0x44] ss:$16 sps:$4 sm:$0xff]   ;;  %v5919_v58 = vld [vmem:[#allocation4 + $0x68] ss:$16 sps:$4 sm:$0xff]   ;;  %1625 = vmatprep.subr.bf16.mxu1 %v5921_v28 }
 0x6d6   :  { %v5775_v20 = vadd.f32 %v5774_v11, %v5677_v24  ;;  %v1261_v27 = vpop.f32.mrb[23].mxu1  ;;  %v1279_v8 = vadd.f32 %v6427_v23, %v5771_v13  ;;  %v5910_v11 = vld [vmem:[#allocation4 + $0x40] ss:$16 sps:$4 sm:$0xff]   ;;  %1570 = vmatprep.subr.bf16.mxu0 %v5912_v9  ;;  %1626 = vmatpush1.bf16.msra.mxu1 %v5919_v58  ;;  %v5927_v24 = vld [vmem:[#allocation4 + $0x8c] ss:$16 sps:$4 sm:$0xff]  }
 0x6d7   :  { %v1277_v36 = vadd.f32 %v6426_v35, %v5773_v18  ;;  %v5777_v30 = vadd.f32 %v5776_v41, %v1261_v27  ;;  %1571 = vmatpush1.bf16.msra.mxu0 %v5910_v11  ;;  %v5918_v41 = vld [vmem:[#allocation4 + $0x64] ss:$16 sps:$4 sm:$0xff]   ;;  %v5916_v13 = vld [vmem:[#allocation4 + $0x60] ss:$16 sps:$4 sm:$0xff]   ;;  %1627 = vmatprep.subr.bf16.mxu1 %v5927_v24  ;;  %v5933_v35 = vld [vmem:[#allocation4 + $0xac] ss:$16 sps:$4 sm:$0xff]  }
 0x6d8   :  { %v1280_v54 = vadd.f32 %v6429_v52, %v5775_v20  ;;  %v1287_v61 = vadd.f32 %v1284_v31, %v1279_v8  ;;  %1572 = vmatprep.subr.bf16.mxu0 %v5918_v41  ;;  %v5924_v18 = vld [vmem:[#allocation4 + $0x84] ss:$16 sps:$4 sm:$0xff]   ;;  %v5925_v20 = vld [vmem:[#allocation4 + $0x88] ss:$16 sps:$4 sm:$0xff]   ;;  %v5939_v8 = vld [vmem:[#allocation4 + $0xcc] ss:$16 sps:$4 sm:$0xff]  }
 0x6d9   :  { %v1278_v48 = vadd.f32 %v6428_v25, %v5777_v30  ;;  %v1285_v49 = vadd.f32 %v1284_v31, %v1277_v36  ;;  %v5930_v27 = vld [vmem:[#allocation4 + $0xa4] ss:$16 sps:$4 sm:$0xff]   ;;  %v5928_v36 = vld [vmem:[#allocation4 + $0xa0] ss:$16 sps:$4 sm:$0xff]   ;;  %v5931_v30 = vld [vmem:[#allocation4 + $0xa8] ss:$16 sps:$4 sm:$0xff]  }
 0x6da   :  { %v1288_v26 = vadd.f32 %v1284_v31, %v1280_v54  ;;  %1628 = vmatpush1.bf16.msra.mxu1 %v5925_v20  ;;  %v5936_v23 = vld [vmem:[#allocation4 + $0xc4] ss:$16 sps:$4 sm:$0xff]   ;;  %v5934_v25 = vld [vmem:[#allocation4 + $0xc0] ss:$16 sps:$4 sm:$0xff]   ;;  %v5943_v54 = vld [vmem:[#allocation4 + $0xe8] ss:$16 sps:$4 sm:$0xff]  }
 0x6db   :  { %1289 = vadd.xlane.f32.xlu1 %v1285_v49  ;;  %v1286_v60 = vadd.f32 %v1284_v31, %v1278_v48  ;;  %1573 = vmatpush1.bf16.msra.mxu0 %v5916_v13  ;;  %v5922_v31 = vld [vmem:[#allocation4 + $0x80] ss:$16 sps:$4 sm:$0xff]   ;;  %v5937_v48 = vld [vmem:[#allocation4 + $0xc8] ss:$16 sps:$4 sm:$0xff]  }
 0x6dc   :  { %1574 = vmatprep.subr.bf16.mxu0 %v5924_v18  ;;  %1629 = vmatprep.subr.bf16.mxu1 %v5933_v35  ;;  %v5940_v52 = vld [vmem:[#allocation4 + $0xe0] ss:$16 sps:$4 sm:$0xff]   ;;  %v5950_v24 = vld [vmem:[#allocation6 + $0x48] sm:$0xff]  }
 0x6dd   :  { %1291 = vadd.xlane.f32.xlu0 %v1286_v60  ;;  %v5947_v13 = vld [vmem:[#allocation6 + $0xc0] sm:$0xff]   ;;  %v5952_v20 = vld [vmem:[#allocation6 + $0x8] sm:$0xff]   ;;  %v5954_v35 = vld [vmem:[#allocation6 + $0x50] sm:$0xff]  }
 0x6de   :  { %1630 = vmatpush1.bf16.msra.mxu1 %v5931_v30  ;;  %v5948_v58 = vld [vmem:[#allocation6] sm:$0xff]   ;;  %v5956_v30 = vld [vmem:[#allocation6 + $0x10] sm:$0xff]  }
 0x6df   :  { %1293 = vadd.xlane.f32.xlu1 %v1287_v61  ;;  %1575 = vmatpush1.bf16.msra.mxu0 %v5922_v31  ;;  %v5949_v18 = vld [vmem:[#allocation6 + $0x80] sm:$0xff]   ;;  %v5951_v31 = vld [vmem:[#allocation6 + $0xc8] sm:$0xff]  }
 0x6e0   :  { %1576 = vmatprep.subr.bf16.mxu0 %v5930_v27  ;;  %1631 = vmatprep.subr.bf16.mxu1 %v5939_v8  ;;  %v5953_v27 = vld [vmem:[#allocation6 + $0x88] sm:$0xff]   ;;  %v5958_v8 = vld [vmem:[#allocation6 + $0x58] sm:$0xff]  }
 0x6e1   :  { %1295 = vadd.xlane.f32.xlu0 %v1288_v26 }
 0x6e2   :  { %1632 = vmatpush1.bf16.msra.mxu1 %v5937_v48  ;;  %v5960_v48 = vld [vmem:[#allocation6 + $0x18] sm:$0xff]  }
 0x6e3   :  { %1577 = vmatpush1.bf16.msra.mxu0 %v5928_v36  ;;  %v5955_v36 = vld [vmem:[#allocation6 + $0xd0] sm:$0xff]  }
 0x6e4   :  { %1578 = vmatprep.subr.bf16.mxu0 %v5936_v23  ;;  %v5957_v23 = vld [vmem:[#allocation6 + $0x90] sm:$0xff]  }
 0x6e7   :  { %1579 = vmatpush1.bf16.msra.mxu0 %v5934_v25  ;;  %v5959_v25 = vld [vmem:[#allocation6 + $0xd8] sm:$0xff]  }
 0x768   :  { %v1290_v63 = vpop.xlane.xlu1 %1289 }
 0x769   :  { %v1298_v33 = vmul.f32 0.0078125, %v1290_v63 }
 0x76a   :  { %v1292_v1 = vpop.xlane.xlu0 %1291 }
 0x76b   :  { %v6932_v43 = vsub.f32 %v1285_v49, %v1298_v33  ;;  %v1299_v47 = vmul.f32 0.0078125, %v1292_v1  ;;  %v5942_v49 = vld [vmem:[#allocation4 + $0xe4] ss:$16 sps:$4 sm:$0xff]   ;;  %v1337_v1 = vrot.slane %v6916_v12, %v6636_v59 }
 0x76c   :  { %v1294_v40 = vpop.xlane.xlu1 %1293  ;;  %1580 = vmatprep.subr.bf16.mxu0 %v5942_v49  ;;  %v5961_v49 = vld [vmem:[#allocation6 + $0x98] sm:$0xff]  }
 0x76d   :  { %v6934_v2 = vsub.f32 %v1286_v60, %v1299_v47  ;;  %v1300_v3 = vmul.f32 0.0078125, %v1294_v40  ;;  %v1306_v39 = vmul.f32 %v6932_v43, %v6932_v43  ;;  %v5945_v60 = vld [vmem:[#allocation4 + $0xec] ss:$16 sps:$4 sm:$0xff]   ;;  %1581 = vmatpush1.bf16.msra.mxu0 %v5940_v52  ;;  %v5962_v52 = vld [vmem:[#allocation6 + $0x60] sm:$0xff]  }
 0x76e   :  { %v1296_v46 = vpop.xlane.xlu0 %1295  ;;  %1633 = vmatprep.subr.bf16.mxu1 %v5945_v60  ;;  %v5964_v60 = vld [vmem:[#allocation6 + $0x20] sm:$0xff]  }
 0x76f   :  { %v6938_v7 = vsub.f32 %v1287_v61, %v1300_v3  ;;  %v1301_v14 = vmul.f32 0.0078125, %v1296_v46  ;;  %1310 = vadd.xlane.f32.xlu1 %v1306_v39  ;;  %v1307_v6 = vmul.f32 %v6934_v2, %v6934_v2  ;;  %1634 = vmatpush1.bf16.msra.mxu1 %v5943_v54  ;;  %v5963_v54 = vld [vmem:[#allocation6 + $0xe0] sm:$0xff]  }
 0x770   :  { %5486 = vmatprep.subr.bf16.mxu1 %v5947_v13 }
 0x771   :  { %v6942_v19 = vsub.f32 %v1288_v26, %v1301_v14  ;;  %1312 = vadd.xlane.f32.xlu0 %v1307_v6  ;;  %v1308_v4 = vmul.f32 %v6938_v7, %v6938_v7  ;;  %v1345_v14 = vrot.slane %v6916_v12, %v6657_v16 }
 0x773   :  { %1314 = vadd.xlane.f32.xlu1 %v1308_v4  ;;  %v1309_v5 = vmul.f32 %v6942_v19, %v6942_v19 }
 0x775   :  { %1316 = vadd.xlane.f32.xlu0 %v1309_v5 }
 0x7fc   :  { %v1311_v61 = vpop.xlane.xlu1 %1310 }
 0x7fd   :  { %v1318_v26 = vmul.f32 0.0078125, %v1311_v61  ;;  %v5965_v61 = vld [vmem:[#allocation6 + $0xa0] sm:$0xff]  }
 0x7fe   :  { %v1313_v22 = vpop.xlane.xlu0 %1312 }
 0x7ff   :  { %v1322_v34 = vadd.f32 1e-12, %v1318_v26  ;;  %v1319_v62 = vmul.f32 0.0078125, %v1313_v22  ;;  %v5966_v26 = vld [vmem:[#allocation6 + $0x68] sm:$0xff]  }
 0x800   :  { %v1315_v32 = vpop.xlane.xlu1 %1314  ;;  %v5967_v22 = vld [vmem:[#allocation6 + $0xe8] sm:$0xff]  }
 0x801   :  { %6202 = vrsqrt.f32 %v1322_v34  ;;  %v1323_v37 = vadd.f32 1e-12, %v1319_v62  ;;  %v1320_v44 = vmul.f32 0.0078125, %v1315_v32  ;;  %v5968_v34 = vld [vmem:[#allocation6 + $0x28] sm:$0xff]   ;;  %v5970_v32 = vld [vmem:[#allocation6 + $0x70] sm:$0xff]  }
 0x802   :  { %v1317_v55 = vpop.xlane.xlu0 %1316  ;;  %v5969_v62 = vld [vmem:[#allocation6 + $0xa8] sm:$0xff]  }
 0x803   :  { %6204 = vrsqrt.f32 %v1323_v37  ;;  %v1324_v21 = vadd.f32 1e-12, %v1320_v44  ;;  %v1321_v63 = vmul.f32 0.0078125, %v1317_v55  ;;  %v5971_v37 = vld [vmem:[#allocation6 + $0xf0] sm:$0xff]  }
 0x804   :  { %v5972_v44 = vld [vmem:[#allocation6 + $0x30] sm:$0xff]  }
 0x805   :  { %6206 = vrsqrt.f32 %v1324_v21  ;;  %v1325_v33 = vadd.f32 1e-12, %v1321_v63  ;;  %v5973_v55 = vld [vmem:[#allocation6 + $0xb0] sm:$0xff]   ;;  %v1384_v21 = vld [vmem:[%s8251_s5] sm:$0xf]  ;;  %v5974_v63 = vld [vmem:[#allocation6 + $0x78] sm:$0xff]  }
 0x807   :  { %6208 = vrsqrt.f32 %v1325_v33  ;;  %v5975_v33 = vld [vmem:[#allocation6 + $0xf8] sm:$0xff]  }
 0x80b   :  { %v6203_v47 = vpop.eup %6202 }
 0x80c   :  { %v1330_v40 = vmul.f32 %v6203_v47, %v6932_v43  ;;  %v5977_v47 = vld [vmem:[#allocation6 + $0xb8] sm:$0xff]  }
 0x80d   :  { %v6205_v3 = vpop.eup %6204 }
 0x80e   :  { %v1331_v39 = vmul.f32 %v6205_v3, %v6934_v2  ;;  %v1338_v46 = vmul.f32 %v1337_v1, %v1330_v40  ;;  %v6974_v40 = vrot.slane %v1384_v21, %v6628_v57  ;;  %v6977_v3 = vrot.slane %v1384_v21, %v6657_v16 }
 0x80f   :  { %v6207_v6 = vpop.eup %6206  ;;  %v8317_v57 = vmov -1.0  }
 0x810   :  { %v1339_v4 = vmul.f32 %v1337_v1, %v1331_v39  ;;  %v6954_v9 = vadd.f32 %v1345_v14, %v1338_v46  ;;  %v1332_v11 = vmul.f32 %v6207_v6, %v6938_v7  ;;  %v6980_v39 = vrot.slane %v1384_v21, %v6636_v59 }
 0x811   :  { %v6209_v5 = vpop.eup %6208  ;;  %v6983_v46 = vrot.slane %v1384_v21, %v6660_v17 }
 0x812   :  { %8313 = vst [vmem:[#allocation21_spill] sm:$0xff] %v6954_v9  ;;  %v6956_v15 = vadd.f32 %v1345_v14, %v1339_v4  ;;  %v1333_v10 = vmul.f32 %v6209_v5, %v6942_v19  ;;  %v1340_v2 = vmul.f32 %v1337_v1, %v1332_v11  ;;  %v5946_v19 = vld [vmem:[#allocation6 + $0x40] sm:$0xff]  }
 0x813   :  { %5458 = vmatprep.subr.bf16.mxu0 %v5946_v19 }
 0x814   :  { %8314 = vst [vmem:[#allocation22_spill] sm:$0xff] %v6956_v15  ;;  %v1350_v43 = vpack.c.bf16 %v6956_v15, %v6954_v9  ;;  %v1341_v41 = vmul.f32 %v1337_v1, %v1333_v10  ;;  %v6966_v28 = vadd.f32 %v1345_v14, %v1340_v2  ;;  %v5976_v1 = vld [vmem:[#allocation6 + $0x38] sm:$0xff]  }
 0x816   :  { %1599 = vmatmul.mubr.bf16.vlgmr.msra.gmra.mrb[28].mxu0 %v1350_v43  ;;  %1652 = vmatmul.mubr.bf16.vlgmr.msra.gmra.mrb[24].mxu1 %v1350_v43  ;;  %v6964_v12 = vadd.f32 %v1345_v14, %v1341_v41  ;;  %8316 = vst [vmem:[#allocation24_spill] sm:$0xff] %v6966_v28 }
 0x817   :  { %1608 = vmatprep.mubr.bf16.mxu0 %v8256_v0  ;;  %1661 = vmatprep.mubr.bf16.mxu1 %v8256_v0 }
 0x818   :  { %8315 = vst [vmem:[#allocation23_spill] sm:$0xff] %v6964_v12  ;;  %v1351_v7 = vpack.c.bf16 %v6964_v12, %v6966_v28  ;;  %5459 = vmatpush3.bf16.msra.mxu0 %v5948_v58  ;;  %5487 = vmatpush3.bf16.msra.mxu1 %v5949_v18 }
 0x819   :  { %5460 = vmatprep.subr.bf16.mxu0 %v5950_v24  ;;  %5488 = vmatprep.subr.bf16.mxu1 %v5951_v31 }
 0x81c   :  { %5461 = vmatpush3.bf16.msra.mxu0 %v5952_v20  ;;  %5489 = vmatpush3.bf16.msra.mxu1 %v5953_v27 }
 0x81d   :  { %5462 = vmatprep.subr.bf16.mxu0 %v5954_v35  ;;  %5490 = vmatprep.subr.bf16.mxu1 %v5955_v36 }
 0x81e   :  { %1609 = vmatmul.mubr.bf16.gmra.mrb[32].mxu0 %v1351_v7  ;;  %1662 = vmatmul.mubr.bf16.gmra.mrb[28].mxu1 %v1351_v7 }
 0x820   :  { %5463 = vmatpush3.bf16.msra.mxu0 %v5956_v30  ;;  %5491 = vmatpush3.bf16.msra.mxu1 %v5957_v23 }
 0x821   :  { %5464 = vmatprep.subr.bf16.mxu0 %v5958_v8  ;;  %5492 = vmatprep.subr.bf16.mxu1 %v5959_v25 }
 0x824   :  { %5465 = vmatpush3.bf16.msra.mxu0 %v5960_v48  ;;  %5493 = vmatpush3.bf16.msra.mxu1 %v5961_v49 }
 0x825   :  { %5466 = vmatprep.subr.bf16.mxu0 %v5962_v52  ;;  %5494 = vmatprep.subr.bf16.mxu1 %v5963_v54 }
 0x828   :  { %5467 = vmatpush3.bf16.msra.mxu0 %v5964_v60  ;;  %5495 = vmatpush3.bf16.msra.mxu1 %v5965_v61 }
 0x829   :  { %5468 = vmatprep.subr.bf16.mxu0 %v5966_v26  ;;  %5496 = vmatprep.subr.bf16.mxu1 %v5967_v22 }
 0x82c   :  { %5469 = vmatpush3.bf16.msra.mxu0 %v5968_v34  ;;  %5497 = vmatpush3.bf16.msra.mxu1 %v5969_v62 }
 0x82d   :  { %5470 = vmatprep.subr.bf16.mxu0 %v5970_v32  ;;  %5498 = vmatprep.subr.bf16.mxu1 %v5971_v37 }
 0x830   :  { %5471 = vmatpush3.bf16.msra.mxu0 %v5972_v44  ;;  %5499 = vmatpush3.bf16.msra.mxu1 %v5973_v55 }
 0x831   :  { %5472 = vmatprep.subr.bf16.mxu0 %v5974_v63  ;;  %5500 = vmatprep.subr.bf16.mxu1 %v5975_v33 }
 0x834   :  { %5473 = vmatpush3.bf16.msra.mxu0 %v5976_v1  ;;  %5501 = vmatpush3.bf16.msra.mxu1 %v5977_v47 }
 0x8e9   :  { %v1600_v14 = vpop.f32.mrb[28].mxu0  ;;  %v1653_v6 = vpop.f32.mrb[24].mxu1 }
 0x8ea   :  { %v1601_v4 = vadd.f32 %v1600_v14, %v6974_v40  ;;  %v6987_v5 = vadd.f32 %v1653_v6, %v6977_v3  ;;  %v1602_v11 = vpop.f32.mrb[29].mxu0  ;;  %v1655_v10 = vpop.f32.mrb[25].mxu1 }
 0x8eb   :  { %v6990_v43 = vadd.f32 %v1602_v11, %v6980_v39  ;;  %v6993_v41 = vadd.f32 %v1655_v10, %v6983_v46  ;;  %v1604_v2 = vpop.f32.mrb[30].mxu0  ;;  %v1657_v7 = vpop.f32.mrb[26].mxu1 }
 0x8ec   :  { %v6995_v19 = vmul.f32 0.70710677, %v1601_v4  ;;  %v6998_v13 = vmul.f32 0.70710677, %v6987_v5  ;;  %v1606_v27 = vpop.f32.mrb[31].mxu0  ;;  %v1659_v23 = vpop.f32.mrb[27].mxu1  ;;  %v7024_v26 = vadd.f32 %v1604_v2, %v6974_v40  ;;  %v7037_v44 = vadd.f32 %v1657_v7, %v6977_v3 }
 0x8ed   :  { %v7001_v58 = vmul.f32 0.70710677, %v6990_v43  ;;  %v7009_v20 = vmul.f32 0.70710677, %v6993_v41  ;;  %v7042_v63 = vadd.f32 %v1606_v27, %v6980_v39  ;;  %v7053_v2 = vadd.f32 %v1659_v23, %v6983_v46 }
 0x8ee   :  { %v1736_v18 = vand.u32 2147483647, %v6995_v19  ;;  %v1738_v24 = vand.u32 2147483647, %v6998_v13  ;;  %v7034_v37 = vmul.f32 0.70710677, %v7024_v26 }
 0x8ef   :  { %v7006_v31 = vand.u32 2147483647, %v7001_v58  ;;  %v7017_v52 = vand.u32 2147483647, %v7009_v20  ;;  %v7046_v1 = vmul.f32 0.70710677, %v7037_v44 }
 0x8f0   :  { %v1752_v35 = vmul.f32 0.3275911, %v1736_v18  ;;  %v1754_v36 = vmul.f32 0.3275911, %v1738_v24  ;;  %v1740_v33 = vand.u32 2147483647, %v7034_v37 }
 0x8f1   :  { %v1753_v30 = vmul.f32 0.3275911, %v7006_v31  ;;  %v7012_v48 = vpop.f32.mrb[32].mxu0  ;;  %v7014_v49 = vpop.f32.mrb[28].mxu1  ;;  %v1755_v62 = vmul.f32 0.3275911, %v7017_v52 }
 0x8f2   :  { %v1768_v8 = vadd.f32 1.0, %v1752_v35  ;;  %v1770_v25 = vadd.f32 1.0, %v1754_v36  ;;  %v7019_v54 = vpop.f32.mrb[33].mxu0  ;;  %v7021_v60 = vpop.f32.mrb[29].mxu1  ;;  %v1960_v47 = vsub.f32 0.0, %v1736_v18  ;;  %v1962_v7 = vsub.f32 0.0, %v1738_v24 }
 0x8f3   :  { %v1769_v61 = vadd.f32 1.0, %v1753_v30  ;;  %v7026_v22 = vpop.f32.mrb[34].mxu0  ;;  %v7028_v34 = vpop.f32.mrb[30].mxu1  ;;  %v1771_v21 = vadd.f32 1.0, %v1755_v62  ;;  %v1756_v14 = vmul.f32 0.3275911, %v1740_v33 }
 0x8f4   :  { %6210 = vrcp.f32 %v1768_v8  ;;  %v7031_v32 = vpop.f32.mrb[35].mxu0  ;;  %v7039_v55 = vpop.f32.mrb[31].mxu1  ;;  %v1742_v6 = vand.u32 2147483647, %v7046_v1  ;;  %v7050_v11 = vmul.f32 0.70710677, %v7042_v63  ;;  %v1976_v30 = vmul.f32 %v1960_v47, %v1736_v18 }
 0x8f5   :  { %6212 = vrcp.f32 %v1770_v25  ;;  %v1772_v10 = vadd.f32 1.0, %v1756_v14  ;;  %v7062_v25 = vmul.f32 0.5, %v1601_v4  ;;  %vm1704_vm5 = vcmp.ge.f32.partialorder %v6995_v19, 0.0 }
 0x8f6   :  { %6214 = vrcp.f32 %v1769_v61  ;;  %v1758_v27 = vmul.f32 0.3275911, %v1742_v6  ;;  %v7056_v35 = vand.u32 2147483647, %v7050_v11  ;;  %v1961_v14 = vsub.f32 0.0, %v7006_v31 }
 0x8f7   :  { %6216 = vrcp.f32 %v1771_v21  ;;  %v7070_v0 = vmul.f32 0.70710677, %v7053_v2  ;;  %v1978_v47 = vmul.f32 %v1962_v7, %v1738_v24  ;;  %v1992_v29 = vmul.f32 1.442695, %v1976_v30 }
 0x8f8   :  { %6218 = vrcp.f32 %v1772_v10  ;;  %v1774_v62 = vadd.f32 1.0, %v1758_v27  ;;  %v1757_v21 = vmul.f32 0.3275911, %v7056_v35  ;;  %v7078_v19 = vsel %vm1704_vm5, 1.0, %v8268_v53 }
 0x8f9   :  { %v7075_v27 = vand.u32 2147483647, %v7070_v0  ;;  %vm1706_vm6 = vcmp.ge.f32.partialorder %v6998_v13, 0.0  ;;  %v1964_v7 = vsub.f32 0.0, %v1740_v33  ;;  %v1977_v42 = vmul.f32 %v1961_v14, %v7006_v31 }
 0x8fa   :  { %6220 = vrcp.f32 %v1774_v62  ;;  %v1773_v10 = vadd.f32 1.0, %v1757_v21  ;;  %v1963_v53 = vsub.f32 0.0, %v7017_v52  ;;  %v1966_v38 = vsub.f32 0.0, %v1742_v6 }
 0x8fb   :  { %v1759_v30 = vmul.f32 0.3275911, %v7075_v27  ;;  %v1980_v14 = vmul.f32 %v1964_v7, %v1740_v33  ;;  %vm1708_vm7 = vcmp.ge.f32.partialorder %v7034_v37, 0.0  ;;  %vm1710_vm8 = vcmp.ge.f32.partialorder %v7046_v1, 0.0 }
 0x8fc   :  { %6222 = vrcp.f32 %v1773_v10  ;;  %vm1705_vm9 = vcmp.ge.f32.partialorder %v7001_v58, 0.0  ;;  %vm1709_vm10 = vcmp.ge.f32.partialorder %v7050_v11, 0.0  ;;  %v7229_v58 = vmul.f32 0.5, %v6993_v41 }
 0x8fd   :  { %6224 = vpow2.f32 %v1992_v29  ;;  %v1775_v59 = vadd.f32 1.0, %v1759_v30  ;;  %v1994_v30 = vmul.f32 1.442695, %v1977_v42  ;;  %vm1711_vm11 = vcmp.ge.f32.partialorder %v7070_v0, 0.0 }
 0x8fe   :  { %v7058_v36 = vpop.eup %6210  ;;  %vm1707_vm12 = vcmp.ge.f32.partialorder %v7009_v20, 0.0 }
 0x8ff   :  { %v7060_v8 = vpop.eup %6212  ;;  %v1816_v61 = vmul.f32 1.0614054, %v7058_v36  ;;  %6226 = vrcp.f32 %v1775_v59 }
 0x900   :  { %v1818_v23 = vmul.f32 1.0614054, %v7060_v8  ;;  %v7072_v4 = vpop.eup %6214 }
 0x901   :  { %v1832_v18 = vadd.f32 -1.4531521, %v1816_v61  ;;  %v1817_v61 = vmul.f32 1.0614054, %v7072_v4  ;;  %v7085_v62 = vpop.eup %6216 }
 0x902   :  { %v1834_v56 = vadd.f32 -1.4531521, %v1818_v23  ;;  %v1996_v23 = vmul.f32 1.442695, %v1978_v47  ;;  %v7099_v47 = vpop.eup %6218  ;;  %v1819_v29 = vmul.f32 1.0614054, %v7085_v62 }
 0x903   :  { %v1848_v45 = vmul.f32 %v7058_v36, %v1832_v18  ;;  %v1833_v10 = vadd.f32 -1.4531521, %v1817_v61  ;;  %v1820_v13 = vmul.f32 1.0614054, %v7099_v47  ;;  %v7106_v61 = vmul.f32 0.5, %v7024_v26 }
 0x904   :  { %v1850_v24 = vmul.f32 %v7060_v8, %v1834_v56  ;;  %v7093_v56 = vsel %vm1706_vm6, 1.0, %v8317_v57  ;;  %6228 = vpow2.f32 %v1996_v23  ;;  %v7108_v17 = vpop.eup %6220  ;;  %v1835_v42 = vadd.f32 -1.4531521, %v1819_v29 }
 0x905   :  { %v1864_v21 = vadd.f32 1.4214138, %v1848_v45  ;;  %v7097_v45 = vadd.f32 %v7012_v48, %v6974_v40  ;;  %v1982_v48 = vmul.f32 %v1966_v38, %v1742_v6  ;;  %v1849_v12 = vmul.f32 %v7072_v4, %v1833_v10 }
 0x906   :  { %v1866_v18 = vadd.f32 1.4214138, %v1850_v24  ;;  %v1836_v33 = vadd.f32 -1.4531521, %v1820_v13  ;;  %v7119_v6 = vpop.eup %6222 }
 0x907   :  { %v1880_v16 = vmul.f32 %v7058_v36, %v1864_v21  ;;  %8318 = vst [vmem:[#allocation25_spill] sm:$0xff] %v7097_v45  ;;  %v1979_v21 = vmul.f32 %v1963_v53, %v7017_v52  ;;  %v7113_v59 = vmul.f32 0.70710677, %v7097_v45  ;;  %v2000_v53 = vmul.f32 1.442695, %v1980_v14  ;;  %v6225_v29 = vpop.eup %6224 }
 0x908   :  { %v1882_v31 = vmul.f32 %v7060_v8, %v1866_v18  ;;  %v1822_v52 = vmul.f32 1.0614054, %v7108_v17  ;;  %v1852_v38 = vmul.f32 %v7099_v47, %v1836_v33  ;;  %v1865_v13 = vadd.f32 1.4214138, %v1849_v12 }
 0x909   :  { %v1896_v24 = vadd.f32 -0.28449672, %v1880_v16  ;;  %8319 = vst [vmem:[#allocation26_spill] sm:$0xff] %v7113_v59  ;;  %v1998_v26 = vmul.f32 1.442695, %v1979_v21  ;;  %v1851_v14 = vmul.f32 %v7085_v62, %v1835_v42  ;;  %6230 = vpow2.f32 %v2000_v53  ;;  %v7131_v12 = vpop.eup %6226 }
 0x90a   :  { %v1898_v50 = vadd.f32 -0.28449672, %v1882_v31  ;;  %v1838_v10 = vadd.f32 -1.4531521, %v1822_v52  ;;  %v2004_v31 = vmul.f32 1.442695, %v1982_v48  ;;  %v1881_v53 = vmul.f32 %v7072_v4, %v1865_v13 }
 0x90b   :  { %v1912_v18 = vmul.f32 %v7058_v36, %v1896_v24  ;;  %v1868_v28 = vadd.f32 1.4214138, %v1852_v38  ;;  %v1724_v52 = vsel %vm1708_vm7, 1.0, %v8317_v57  ;;  %v1823_v15 = vmul.f32 1.0614054, %v7131_v12 }
 0x90c   :  { %v1914_v16 = vmul.f32 %v7060_v8, %v1898_v50  ;;  %v7123_v50 = vand.u32 2147483647, %v7113_v59  ;;  %v1854_v21 = vmul.f32 %v7108_v17, %v1838_v10  ;;  %6232 = vpow2.f32 %v2004_v31 }
 0x90d   :  { %v1928_v7 = vadd.f32 0.2548296, %v1912_v18  ;;  %v1821_v18 = vmul.f32 1.0614054, %v7119_v6  ;;  %v1884_v48 = vmul.f32 %v7099_v47, %v1868_v28  ;;  %v1967_v10 = vsub.f32 0.0, %v7075_v27 }
 0x90e   :  { %v1930_v23 = vadd.f32 0.2548296, %v1914_v16  ;;  %v1867_v28 = vadd.f32 1.4214138, %v1851_v14  ;;  %6234 = vpow2.f32 %v1994_v30  ;;  %v1897_v51 = vadd.f32 -0.28449672, %v1881_v53 }
 0x90f   :  { %v1944_v24 = vmul.f32 %v7058_v36, %v1928_v7  ;;  %v1965_v36 = vsub.f32 0.0, %v7056_v35  ;;  %v1870_v7 = vadd.f32 1.4214138, %v1854_v21  ;;  %v1837_v42 = vadd.f32 -1.4531521, %v1821_v18 }
 0x910   :  { %v1946_v16 = vmul.f32 %v7060_v8, %v1930_v23  ;;  %v1900_v38 = vadd.f32 -0.28449672, %v1884_v48  ;;  %v1760_v8 = vmul.f32 0.3275911, %v7123_v50  ;;  %v6229_v23 = vpop.eup %6228  ;;  %v1839_v48 = vadd.f32 -1.4531521, %v1823_v15 }
 0x911   :  { %v2024_v33 = vmul.f32 %v6225_v29, %v1944_v24  ;;  %v1886_v24 = vmul.f32 %v7108_v17, %v1870_v7  ;;  %v1853_v29 = vmul.f32 %v7119_v6, %v1837_v42  ;;  %v1981_v21 = vmul.f32 %v1965_v36, %v7056_v35 }
 0x912   :  { %v2026_v9 = vmul.f32 %v6229_v23, %v1946_v16  ;;  %v1916_v31 = vmul.f32 %v7099_v47, %v1900_v38  ;;  %v1983_v14 = vmul.f32 %v1967_v10, %v7075_v27  ;;  %v1776_v45 = vadd.f32 1.0, %v1760_v8 }
 0x913   :  { %v2040_v37 = vsub.f32 1.0, %v2024_v33  ;;  %v1902_v13 = vadd.f32 -0.28449672, %v1886_v24  ;;  %v1869_v18 = vadd.f32 1.4214138, %v1853_v29  ;;  %v1883_v7 = vmul.f32 %v7085_v62, %v1867_v28  ;;  %v6231_v36 = vpop.eup %6230 }
 0x914   :  { %v1932_v59 = vadd.f32 0.2548296, %v1916_v31  ;;  %v1855_v16 = vmul.f32 %v7131_v12, %v1839_v48  ;;  %v2042_v38 = vsub.f32 1.0, %v2026_v9  ;;  %6236 = vpow2.f32 %v1998_v26 }
 0x915   :  { %v1918_v42 = vmul.f32 %v7108_v17, %v1902_v13  ;;  %v1885_v33 = vmul.f32 %v7119_v6, %v1869_v18  ;;  %v2002_v30 = vmul.f32 1.442695, %v1981_v21  ;;  %v2056_v15 = vmul.f32 %v2040_v37, %v7078_v19 }
 0x916   :  { %v1948_v35 = vmul.f32 %v7099_v47, %v1932_v59  ;;  %v1871_v27 = vadd.f32 1.4214138, %v1855_v16  ;;  %v2006_v8 = vmul.f32 1.442695, %v1983_v14  ;;  %6238 = vrcp.f32 %v1776_v45  ;;  %v6233_v24 = vpop.eup %6232 }
 0x917   :  { %v1934_v53 = vadd.f32 0.2548296, %v1918_v42  ;;  %v1901_v23 = vadd.f32 -0.28449672, %v1885_v33  ;;  %v7153_v28 = vadd.f32 %v7014_v49, %v6977_v3  ;;  %v1913_v9 = vmul.f32 %v7072_v4, %v1897_v51 }
 0x918   :  { %v2028_v10 = vmul.f32 %v6231_v36, %v1948_v35  ;;  %v1899_v26 = vadd.f32 -0.28449672, %v1883_v7  ;;  %v1887_v59 = vmul.f32 %v7131_v12, %v1871_v27  ;;  %6240 = vpow2.f32 %v2002_v30  ;;  %v6235_v13 = vpop.eup %6234 }
 0x919   :  { %v1950_v47 = vmul.f32 %v7108_v17, %v1934_v53  ;;  %v1917_v19 = vmul.f32 %v7119_v6, %v1901_v23  ;;  %v2072_v37 = vadd.f32 1.0, %v2056_v15  ;;  %v2058_v45 = vmul.f32 %v2042_v38, %v7093_v56 }
 0x91a   :  { %v2044_v29 = vsub.f32 1.0, %v2028_v10  ;;  %v1903_v49 = vadd.f32 -0.28449672, %v1887_v59  ;;  %6242 = vpow2.f32 %v2006_v8  ;;  %v7162_v51 = vmul.f32 0.70710677, %v7153_v28 }
 0x91b   :  { %v2030_v31 = vmul.f32 %v6233_v24, %v1950_v47  ;;  %v7166_v17 = vadd.f32 %v7019_v54, %v6980_v39  ;;  %v1929_v18 = vadd.f32 0.2548296, %v1913_v9  ;;  %v1915_v48 = vmul.f32 %v7085_v62, %v1899_v26 }
 0x91c   :  { %v2060_v21 = vmul.f32 %v2044_v29, %v1724_v52  ;;  %v1919_v7 = vmul.f32 %v7131_v12, %v1903_v49  ;;  %v1726_v56 = vsel %vm1710_vm8, 1.0, %v8317_v57  ;;  %v1933_v52 = vadd.f32 0.2548296, %v1917_v19 }
 0x91d   :  { %v2046_v14 = vsub.f32 1.0, %v2030_v31  ;;  %v7174_v33 = vand.u32 2147483647, %v7162_v51  ;;  %v7177_v16 = vmul.f32 %v2072_v37, %v7062_v25  ;;  %v1674_v54 = vmul.f32 0.5, %v6987_v5 }
 0x91e   :  { %v2076_v42 = vadd.f32 1.0, %v2060_v21  ;;  %v2074_v38 = vadd.f32 1.0, %v2058_v45  ;;  %v6237_v30 = vpop.eup %6236  ;;  %v1935_v15 = vadd.f32 0.2548296, %v1919_v7  ;;  %v7185_v1 = vmul.f32 0.70710677, %v7166_v17 }
 0x91f   :  { %v2062_v35 = vmul.f32 %v2046_v14, %v1726_v56  ;;  %v1762_v53 = vmul.f32 0.3275911, %v7174_v33  ;;  %v1945_v23 = vmul.f32 %v7072_v4, %v1929_v18  ;;  %v1931_v27 = vadd.f32 0.2548296, %v1915_v48 }
 0x920   :  { %v7181_v36 = vmul.f32 %v2076_v42, %v7106_v61  ;;  %v1678_v25 = vmul.f32 0.5, %v7037_v44  ;;  %v7189_v8 = vpop.eup %6238  ;;  %v1949_v61 = vmul.f32 %v7119_v6, %v1933_v52  ;;  %v7194_v9 = vmul.f32 %v2074_v38, %v1674_v54 }
 0x921   :  { %v2078_v10 = vadd.f32 1.0, %v2062_v35  ;;  %v1778_v24 = vadd.f32 1.0, %v1762_v53  ;;  %v1824_v47 = vmul.f32 1.0614054, %v7189_v8  ;;  %v1951_v4 = vmul.f32 %v7131_v12, %v1935_v15 }
 0x922   :  { %v2104_v5 = vpack.c.bf16 %v7181_v36, %v7177_v16  ;;  %v6241_v59 = vpop.eup %6240  ;;  %v7201_v44 = vand.u32 2147483647, %v7185_v1  ;;  %v7205_v29 = vadd.f32 %v7021_v60, %v6983_v46  ;;  %v2025_v19 = vmul.f32 %v6235_v13, %v1945_v23 }
 0x923   :  { %v7196_v26 = vmul.f32 %v2078_v10, %v1678_v25  ;;  %6244 = vrcp.f32 %v1778_v24  ;;  %v1947_v6 = vmul.f32 %v7085_v62, %v1931_v27  ;;  %v2029_v31 = vmul.f32 %v6241_v59, %v1949_v61 }
 0x924   :  { %v6243_v45 = vpop.eup %6242  ;;  %v1761_v49 = vmul.f32 0.3275911, %v7201_v44  ;;  %v1673_v12 = vmul.f32 0.5, %v6990_v43  ;;  %v1840_v21 = vadd.f32 -1.4531521, %v1824_v47  ;;  %v7218_v62 = vadd.f32 %v7026_v22, %v6974_v40 }
 0x925   :  { %v2106_v37 = vpack.c.bf16 %v7196_v26, %v7194_v9  ;;  %v7214_v18 = vmul.f32 0.70710677, %v7205_v29  ;;  %v2031_v60 = vmul.f32 %v6243_v45, %v1951_v4  ;;  %v7222_v13 = vadd.f32 %v7028_v34, %v6977_v3 }
 0x926   :  { %v1777_v48 = vadd.f32 1.0, %v1761_v49  ;;  %v2041_v14 = vsub.f32 1.0, %v2025_v19  ;;  %v2027_v7 = vmul.f32 %v6237_v30, %v1947_v6  ;;  %v2045_v42 = vsub.f32 1.0, %v2029_v31 }
 0x927   :  { %v7226_v43 = vand.u32 2147483647, %v7214_v18  ;;  %v1721_v40 = vsel %vm1705_vm9, 1.0, %v8317_v57  ;;  %v1856_v3 = vmul.f32 %v7189_v8, %v1840_v21  ;;  %v1725_v34 = vsel %vm1709_vm10, 1.0, %v8317_v57 }
 0x928   :  { %6246 = vrcp.f32 %v1777_v48  ;;  %v2047_v11 = vsub.f32 1.0, %v2031_v60  ;;  %v7238_v56 = vmul.f32 0.70710677, %v7218_v62  ;;  %v7241_v41 = vmul.f32 0.70710677, %v7222_v13 }
 0x929   :  { %v1763_v22 = vmul.f32 0.3275911, %v7226_v43  ;;  %v2057_v52 = vmul.f32 %v2041_v14, %v1721_v40  ;;  %v2043_v0 = vsub.f32 1.0, %v2027_v7  ;;  %v1727_v54 = vsel %vm1711_vm11, 1.0, %v8317_v57 }
 0x92a   :  { %v2061_v30 = vmul.f32 %v2045_v42, %v1725_v34  ;;  %v1968_v15 = vsub.f32 0.0, %v7123_v50  ;;  %v1748_v53 = vand.u32 2147483647, %v7238_v56  ;;  %v7249_v23 = vand.u32 2147483647, %v7241_v41 }
 0x92b   :  { %v1779_v38 = vadd.f32 1.0, %v1763_v22  ;;  %v1872_v27 = vadd.f32 1.4214138, %v1856_v3  ;;  %v7254_v10 = vadd.f32 %v7031_v32, %v6980_v39  ;;  %v1723_v61 = vsel %vm1707_vm12, 1.0, %v8317_v57 }
 0x92c   :  { %v2063_v24 = vmul.f32 %v2047_v11, %v1727_v54  ;;  %v1970_v47 = vsub.f32 0.0, %v7174_v33  ;;  %v1764_v59 = vmul.f32 0.3275911, %v1748_v53  ;;  %v2073_v4 = vadd.f32 1.0, %v2057_v52 }
 0x92d   :  { %v7244_v35 = vpop.eup %6244  ;;  %6248 = vrcp.f32 %v1779_v38  ;;  %v1677_v19 = vmul.f32 0.5, %v7042_v63  ;;  %v1766_v45 = vmul.f32 0.3275911, %v7249_v23  ;;  %v2059_v31 = vmul.f32 %v2043_v0, %v1723_v61 }
 0x92e   :  { %v1826_v25 = vmul.f32 1.0614054, %v7244_v35  ;;  %v2077_v49 = vadd.f32 1.0, %v2061_v30  ;;  %v1984_v21 = vmul.f32 %v1968_v15, %v7123_v50  ;;  %v1780_v39 = vadd.f32 1.0, %v1764_v59 }
 0x92f   :  { %v1888_v32 = vmul.f32 %v7189_v8, %v1872_v27  ;;  %v1782_v60 = vadd.f32 1.0, %v1766_v45  ;;  %v7266_v48 = vmul.f32 0.70710677, %v7254_v10  ;;  %v2079_v7 = vadd.f32 1.0, %v2063_v24 }
 0x930   :  { %v1842_v6 = vadd.f32 -1.4531521, %v1826_v25  ;;  %v1986_v63 = vmul.f32 %v1970_v47, %v7174_v33  ;;  %v1969_v42 = vsub.f32 0.0, %v7201_v44  ;;  %6250 = vrcp.f32 %v1780_v39 }
 0x931   :  { %6252 = vrcp.f32 %v1782_v60  ;;  %v7275_v3 = vadd.f32 %v7039_v55, %v6983_v46  ;;  %v2089_v22 = vmul.f32 %v2073_v4, %v1673_v12  ;;  %v2093_v34 = vmul.f32 %v2077_v49, %v1677_v19 }
 0x932   :  { %v1858_v20 = vmul.f32 %v7244_v35, %v1842_v6  ;;  %v7268_v14 = vpop.eup %6246  ;;  %v1679_v11 = vmul.f32 0.5, %v7053_v2  ;;  %v7279_v52 = vand.u32 2147483647, %v7266_v48  ;;  %v1904_v0 = vadd.f32 -0.28449672, %v1888_v32 }
 0x933   :  { %v1825_v50 = vmul.f32 1.0614054, %v7268_v14  ;;  %v2008_v33 = vmul.f32 1.442695, %v1984_v21  ;;  %v2075_v30 = vadd.f32 1.0, %v2059_v31  ;;  %v1972_v27 = vsub.f32 0.0, %v1748_v53 }
 0x934   :  { %v1874_v40 = vadd.f32 1.4214138, %v1858_v20  ;;  %v2012_v15 = vmul.f32 1.442695, %v1986_v63  ;;  %v1765_v25 = vmul.f32 0.3275911, %v7279_v52  ;;  %v2095_v46 = vmul.f32 %v2079_v7, %v1679_v11 }
 0x935   :  { %v1841_v38 = vadd.f32 -1.4531521, %v1825_v50  ;;  %v1985_v2 = vmul.f32 %v1969_v42, %v7201_v44  ;;  %v7288_v12 = vmul.f32 0.70710677, %v7275_v3  ;;  %v2105_v4 = vpack.c.bf16 %v2093_v34, %v2089_v22 }
 0x936   :  { %v1890_v54 = vmul.f32 %v7244_v35, %v1874_v40  ;;  %v1781_v59 = vadd.f32 1.0, %v1765_v25  ;;  %v1920_v19 = vmul.f32 %v7189_v8, %v1904_v0  ;;  %6254 = vpow2.f32 %v2008_v33  ;;  %v8320_v33 = vld [vmem:[#allocation25_spill] sm:$0xff] }
 0x937   :  { %v7283_v61 = vpop.eup %6248  ;;  %v1857_v55 = vmul.f32 %v7268_v14, %v1841_v38  ;;  %v1974_v45 = vsub.f32 0.0, %v7249_v23  ;;  %v2091_v31 = vmul.f32 %v2075_v30, %v7229_v58  ;;  %v1988_v21 = vmul.f32 %v1972_v27, %v1748_v53  ;;  %2404 = vmatprep.mubr.bf16.mxu0 %v2105_v4 }
 0x938   :  { %v1906_v24 = vadd.f32 -0.28449672, %v1890_v54  ;;  %v1827_v47 = vmul.f32 1.0614054, %v7283_v61  ;;  %6256 = vrcp.f32 %v1781_v59  ;;  %v2010_v39 = vmul.f32 1.442695, %v1985_v2  ;;  %2405 = vmatmul.mubr.bf16.vlgmr.msra.gmra.mrb[36].mxu0 %v2104_v5 }
 0x939   :  { %v1873_v6 = vadd.f32 1.4214138, %v1857_v55  ;;  %6258 = vpow2.f32 %v2012_v15  ;;  %v7296_v32 = vand.u32 2147483647, %v7288_v12  ;;  %v1971_v53 = vsub.f32 0.0, %v7226_v43 }
 0x93a   :  { %v1843_v49 = vadd.f32 -1.4531521, %v1827_v47  ;;  %v7301_v20 = vpop.eup %6250  ;;  %v1922_v60 = vmul.f32 %v7244_v35, %v1906_v24  ;;  %v2107_v7 = vpack.c.bf16 %v2095_v46, %v2091_v31  ;;  %v1936_v42 = vadd.f32 0.2548296, %v1920_v19  ;;  %v8321_v46 = vld [vmem:[#allocation26_spill] sm:$0xff] }
 0x93b   :  { %v1889_v44 = vmul.f32 %v7268_v14, %v1873_v6  ;;  %v7306_v63 = vpop.eup %6252  ;;  %v1828_v40 = vmul.f32 1.0614054, %v7301_v20  ;;  %v1990_v50 = vmul.f32 %v1974_v45, %v7249_v23  ;;  %v1767_v22 = vmul.f32 0.3275911, %v7296_v32 }
 0x93c   :  { %v1859_v58 = vmul.f32 %v7283_v61, %v1843_v49  ;;  %v2016_v36 = vmul.f32 1.442695, %v1988_v21  ;;  %v1830_v5 = vmul.f32 1.0614054, %v7306_v63  ;;  %2453 = vmatprep.mubr.bf16.mxu1 %v2107_v7  ;;  %v7316_v54 = vmul.f32 0.5, %v8320_v33 }
 0x93d   :  { %v1905_v34 = vadd.f32 -0.28449672, %v1889_v44  ;;  %v1844_v11 = vadd.f32 -1.4531521, %v1828_v40  ;;  %v1783_v0 = vadd.f32 1.0, %v1767_v22  ;;  %2454 = vmatmul.mubr.bf16.vlgmr.msra.gmra.mrb[32].mxu1 %v2106_v37  ;;  %v1973_v23 = vsub.f32 0.0, %v7279_v52 }
 0x93e   :  { %v1875_v16 = vadd.f32 1.4214138, %v1859_v58  ;;  %v1938_v38 = vadd.f32 0.2548296, %v1922_v60  ;;  %v1846_v30 = vadd.f32 -1.4531521, %v1830_v5  ;;  %v1987_v15 = vmul.f32 %v1971_v53, %v7226_v43 }
 0x93f   :  { %v1860_v27 = vmul.f32 %v7301_v20, %v1844_v11  ;;  %v2020_v25 = vmul.f32 1.442695, %v1990_v50  ;;  %6260 = vrcp.f32 %v1783_v0  ;;  %vm1712_vm13 = vcmp.ge.f32.partialorder %v8321_v46, 0.0 }
 0x940   :  { %v1952_v55 = vmul.f32 %v7189_v8, %v1936_v42  ;;  %v1891_v9 = vmul.f32 %v7283_v61, %v1875_v16  ;;  %v1862_v26 = vmul.f32 %v7306_v63, %v1846_v30  ;;  %v6255_v37 = vpop.eup %6254  ;;  %vm1714_vm14 = vcmp.ge.f32.partialorder %v7162_v51, 0.0 }
 0x941   :  { %v1921_v2 = vmul.f32 %v7268_v14, %v1905_v34  ;;  %6262 = vpow2.f32 %v2010_v39  ;;  %v1876_v24 = vadd.f32 1.4214138, %v1860_v27  ;;  %v1954_v47 = vmul.f32 %v7244_v35, %v1938_v38 }
 0x942   :  { %v7327_v43 = vpop.eup %6256  ;;  %6264 = vpow2.f32 %v2016_v36  ;;  %v1878_v59 = vadd.f32 1.4214138, %v1862_v26  ;;  %v1989_v4 = vmul.f32 %v1973_v23, %v7279_v52  ;;  %v2014_v19 = vmul.f32 1.442695, %v1987_v15 }
 0x943   :  { %v6259_v8 = vpop.eup %6258  ;;  %v1892_v6 = vmul.f32 %v7301_v20, %v1876_v24  ;;  %6266 = vpow2.f32 %v2020_v25  ;;  %v1829_v45 = vmul.f32 1.0614054, %v7327_v43  ;;  %v2032_v31 = vmul.f32 %v6255_v37, %v1952_v55 }
 0x944   :  { %v1907_v49 = vadd.f32 -0.28449672, %v1891_v9  ;;  %v1894_v21 = vmul.f32 %v7306_v63, %v1878_v59  ;;  %v1975_v44 = vsub.f32 0.0, %v7296_v32  ;;  %v1937_v39 = vadd.f32 0.2548296, %v1921_v2 }
 0x945   :  { %v1908_v60 = vadd.f32 -0.28449672, %v1892_v6  ;;  %v1845_v35 = vadd.f32 -1.4531521, %v1829_v45  ;;  %v1728_v52 = vsel %vm1712_vm13, 1.0, %v8317_v57  ;;  %v2034_v58 = vmul.f32 %v6259_v8, %v1954_v47 }
 0x946   :  { %v1910_v53 = vadd.f32 -0.28449672, %v1894_v21  ;;  %v2018_v7 = vmul.f32 1.442695, %v1989_v4  ;;  %v7339_v42 = vmul.f32 0.5, %v7153_v28  ;;  %v1730_v40 = vsel %vm1714_vm14, 1.0, %v8317_v57 }
 0x947   :  { %v1924_v50 = vmul.f32 %v7301_v20, %v1908_v60  ;;  %v1861_v22 = vmul.f32 %v7327_v43, %v1845_v35  ;;  %v2048_v16 = vsub.f32 1.0, %v2032_v31  ;;  %v1923_v36 = vmul.f32 %v7283_v61, %v1907_v49 }
 0x948   :  { %6268 = vpow2.f32 %v2014_v19  ;;  %v1926_v5 = vmul.f32 %v7306_v63, %v1910_v53  ;;  %v1953_v11 = vmul.f32 %v7268_v14, %v1937_v39  ;;  %v1991_v33 = vmul.f32 %v1975_v44, %v7296_v32 }
 0x949   :  { %v7348_v34 = vpop.eup %6260  ;;  %v1940_v28 = vadd.f32 0.2548296, %v1924_v50  ;;  %v1877_v0 = vadd.f32 1.4214138, %v1861_v22  ;;  %v2050_v51 = vsub.f32 1.0, %v2034_v58  ;;  %6270 = vpow2.f32 %v2018_v7 }
 0x94a   :  { %v1942_v38 = vadd.f32 0.2548296, %v1926_v5  ;;  %v1831_v30 = vmul.f32 1.0614054, %v7348_v34  ;;  %vm1716_vm15 = vcmp.ge.f32.partialorder %v7238_v56, 0.0  ;;  %vm1718_vm1 = vcmp.ge.f32.partialorder %v7241_v41, 0.0 }
 0x94b   :  { %v6263_v23 = vpop.eup %6262  ;;  %v1956_v15 = vmul.f32 %v7301_v20, %v1940_v28  ;;  %v1893_v27 = vmul.f32 %v7327_v43, %v1877_v0  ;;  %v2064_v14 = vmul.f32 %v2048_v16, %v1728_v52  ;;  %v1939_v46 = vadd.f32 0.2548296, %v1923_v36 }
 0x94c   :  { %v6265_v25 = vpop.eup %6264  ;;  %v1958_v55 = vmul.f32 %v7306_v63, %v1942_v38  ;;  %v1847_v32 = vadd.f32 -1.4531521, %v1831_v30  ;;  %v2033_v26 = vmul.f32 %v6263_v23, %v1953_v11  ;;  %v2022_v24 = vmul.f32 1.442695, %v1991_v33 }
 0x94d   :  { %v6267_v9 = vpop.eup %6266  ;;  %v2036_v37 = vmul.f32 %v6265_v25, %v1956_v15  ;;  %v1909_v2 = vadd.f32 -0.28449672, %v1893_v27  ;;  %v2066_v47 = vmul.f32 %v2050_v51, %v1730_v40  ;;  %vm1713_vm2 = vcmp.ge.f32.partialorder %v7185_v1, 0.0 }
 0x94e   :  { %v2038_v59 = vmul.f32 %v6267_v9, %v1958_v55  ;;  %v1863_v20 = vmul.f32 %v7348_v34, %v1847_v32  ;;  %v1732_v4 = vsel %vm1716_vm15, 1.0, %v8317_v57  ;;  %v1734_v63 = vsel %vm1718_vm1, 1.0, %v8317_v57 }
 0x94f   :  { %v2052_v8 = vsub.f32 1.0, %v2036_v37  ;;  %v1925_v19 = vmul.f32 %v7327_v43, %v1909_v2  ;;  %v2080_v6 = vadd.f32 1.0, %v2064_v14  ;;  %v1955_v45 = vmul.f32 %v7283_v61, %v1939_v46 }
 0x950   :  { %v2054_v31 = vsub.f32 1.0, %v2038_v59  ;;  %v1879_v49 = vadd.f32 1.4214138, %v1863_v20  ;;  %v2049_v21 = vsub.f32 1.0, %v2033_v26  ;;  %6272 = vpow2.f32 %v2022_v24 }
 0x951   :  { %v2068_v44 = vmul.f32 %v2052_v8, %v1732_v4  ;;  %v1941_v39 = vadd.f32 0.2548296, %v1925_v19  ;;  %v2082_v35 = vadd.f32 1.0, %v2066_v47  ;;  %v1729_v56 = vsel %vm1713_vm2, 1.0, %v8317_v57  ;;  %v7394_v8 = vld [vmem:[%s8249_s3] sm:$0x3f] }
 0x952   :  { %v6269_v60 = vpop.eup %6268  ;;  %v2070_v52 = vmul.f32 %v2054_v31, %v1734_v63  ;;  %v1895_v41 = vmul.f32 %v7348_v34, %v1879_v49  ;;  %v1684_v58 = vmul.f32 0.5, %v7218_v62  ;;  %v1686_v61 = vmul.f32 0.5, %v7222_v13 }
 0x953   :  { %v2084_v53 = vadd.f32 1.0, %v2068_v44  ;;  %v1957_v7 = vmul.f32 %v7327_v43, %v1941_v39  ;;  %v6271_v40 = vpop.eup %6270  ;;  %v2035_v50 = vmul.f32 %v6269_v60, %v1955_v45  ;;  %vm1717_vm3 = vcmp.ge.f32.partialorder %v7266_v48, 0.0 }
 0x954   :  { %v2086_v22 = vadd.f32 1.0, %v2070_v52  ;;  %v1911_v16 = vadd.f32 -0.28449672, %v1895_v41  ;;  %v2096_v36 = vmul.f32 %v2080_v6, %v7316_v54  ;;  %v2065_v1 = vmul.f32 %v2049_v21, %v1729_v56 }
 0x955   :  { %v2100_v5 = vmul.f32 %v2084_v53, %v1684_v58  ;;  %v2037_v11 = vmul.f32 %v6271_v40, %v1957_v7  ;;  %v2098_v28 = vmul.f32 %v2082_v35, %v7339_v42  ;;  %vm1715_vm4 = vcmp.ge.f32.partialorder %v7214_v18, 0.0  ;;  %v8324_v53 = vld [vmem:[#allocation21_spill] sm:$0xff]  ;;  %v8325_v7 = vld [vmem:[#allocation22_spill] sm:$0xff] }
 0x956   :  { %v2102_v0 = vmul.f32 %v2086_v22, %v1686_v61  ;;  %v1927_v62 = vmul.f32 %v7348_v34, %v1911_v16  ;;  %v2051_v33 = vsub.f32 1.0, %v2035_v50  ;;  %v1733_v51 = vsel %vm1717_vm3, 1.0, %v8317_v57 }
 0x957   :  { %v2053_v13 = vsub.f32 1.0, %v2037_v11  ;;  %v2108_v43 = vpack.c.bf16 %v2100_v5, %v2096_v36  ;;  %v2081_v30 = vadd.f32 1.0, %v2065_v1  ;;  %v1681_v27 = vmul.f32 0.5, %v7166_v17 }
 0x958   :  { %v1943_v38 = vadd.f32 0.2548296, %v1927_v62  ;;  %v2110_v48 = vpack.c.bf16 %v2102_v0, %v2098_v28  ;;  %v1731_v42 = vsel %vm1715_vm4, 1.0, %v8317_v57  ;;  %v1685_v25 = vmul.f32 0.5, %v7254_v10 }
 0x959   :  { %v2069_v23 = vmul.f32 %v2053_v13, %v1733_v51  ;;  %v2067_v18 = vmul.f32 %v2051_v33, %v1731_v42  ;;  %vm1719_vm5 = vcmp.ge.f32.partialorder %v7288_v12, 0.0  ;;  %v2097_v55 = vmul.f32 %v2081_v30, %v1681_v27  ;;  %v8326_v30 = vld [vmem:[#allocation24_spill] sm:$0xff] }
 0x95a   :  { %v1959_v54 = vmul.f32 %v7348_v34, %v1943_v38  ;;  %v6273_v15 = vpop.eup %6272  ;;  %v1735_v26 = vsel %vm1719_vm5, 1.0, %v8317_v57  ;;  %v1683_v17 = vmul.f32 0.5, %v7205_v29  ;;  %v1687_v24 = vmul.f32 0.5, %v7275_v3  ;;  %v8323_v29 = vld [vmem:[#allocation15_spill] sm:$0xff]  ;;  %v5978_v27 = vld [vmem:[#allocation2 + $0x180] ss:$24 sps:$4 sm:$0xff]  }
 0x95b   :  { %v2085_v14 = vadd.f32 1.0, %v2069_v23  ;;  %v2083_v2 = vadd.f32 1.0, %v2067_v18  ;;  %v8322_v10 = vmov 0   ;;  %v2179_v3 = vrot.slane %v7394_v8, %v8323_v29  ;;  %v5980_v42 = vld [vmem:[#allocation2 + $0x184] ss:$24 sps:$4 sm:$0xff]  }
 0x95c   :  { %v2039_v46 = vmul.f32 %v6273_v15, %v1959_v54  ;;  %v8327_v54 = vld [vmem:[#allocation23_spill] sm:$0xff]  ;;  %2860 = vmatprep.subr.bf16.mxu0 %v5980_v42 }
 0x95d   :  { %v2101_v32 = vmul.f32 %v2085_v14, %v1685_v25  ;;  %v2099_v59 = vmul.f32 %v2083_v2, %v1683_v17  ;;  %v5981_v25 = vld [vmem:[#allocation2 + $0x188] ss:$24 sps:$4 sm:$0xff]   ;;  %v5983_v14 = vld [vmem:[#allocation2 + $0x18c] ss:$24 sps:$4 sm:$0xff]   ;;  %2861 = vmatpush1.bf16.msra.mxu0 %v5978_v27 }
 0x95e   :  { %v2055_v9 = vsub.f32 1.0, %v2039_v46  ;;  %v5986_v18 = vld [vmem:[#allocation2 + $0x1b4] ss:$24 sps:$4 sm:$0xff]   ;;  %2913 = vmatprep.subr.bf16.mxu1 %v5983_v14 }
 0x95f   :  { %v2109_v37 = vpack.c.bf16 %v2101_v32, %v2097_v55  ;;  %v5989_v46 = vld [vmem:[#allocation2 + $0x1bc] ss:$24 sps:$4 sm:$0xff]   ;;  %v5984_v55 = vld [vmem:[#allocation2 + $0x1b0] ss:$24 sps:$4 sm:$0xff]   ;;  %2914 = vmatpush1.bf16.msra.mxu1 %v5981_v25  ;;  %2862 = vmatprep.subr.bf16.mxu0 %v5986_v18 }
 0x960   :  { %v2071_v34 = vmul.f32 %v2055_v9, %v1735_v26  ;;  %v5987_v32 = vld [vmem:[#allocation2 + $0x1b8] ss:$24 sps:$4 sm:$0xff]   ;;  %2915 = vmatprep.subr.bf16.mxu1 %v5989_v46  ;;  %v8329_v25 = vld [vmem:[#allocation14_spill] sm:$0xff] }
 0x961   :  { %2412 = vmatprep.mubr.bf16.mxu0 %v2109_v37  ;;  %2863 = vmatpush1.bf16.msra.mxu0 %v5984_v55  ;;  %v2529_v14 = vrot.slane %v7394_v8, %v8329_v25 }
 0x962   :  { %v2087_v47 = vadd.f32 1.0, %v2071_v34  ;;  %2413 = vmatmul.mubr.bf16.gmra.mrb[40].mxu0 %v2108_v43 }
 0x963   :  { %2892 = vmatprep.mubr.bf16.mxu0 %v8322_v10  ;;  %2916 = vmatpush1.bf16.msra.mxu1 %v5987_v32  ;;  %v6026_v32 = vld [vmem:[#allocation2 + $0x190] ss:$24 sps:$4 sm:$0xff]  }
 0x964   :  { %v2103_v12 = vmul.f32 %v2087_v47, %v1687_v24 }
 0x966   :  { %v2111_v20 = vpack.c.bf16 %v2103_v12, %v2099_v59  ;;  %v5990_v59 = vld [vmem:[#allocation2 + $0x1e0] ss:$24 sps:$4 sm:$0xff]   ;;  %v5992_v12 = vld [vmem:[#allocation2 + $0x1e4] ss:$24 sps:$4 sm:$0xff]  }
 0x967   :  { %2864 = vmatprep.subr.bf16.mxu0 %v5992_v12  ;;  %v6041_v12 = vld [vmem:[#allocation2 + $0x280] ss:$24 sps:$4 sm:$0xff]  }
 0x968   :  { %2461 = vmatprep.mubr.bf16.mxu1 %v2111_v20  ;;  %v5993_v20 = vld [vmem:[#allocation2 + $0x1e8] ss:$24 sps:$4 sm:$0xff]   ;;  %2865 = vmatpush1.bf16.msra.mxu0 %v5990_v59  ;;  %v6043_v59 = vld [vmem:[#allocation2 + $0x284] ss:$24 sps:$4 sm:$0xff]  }
 0x969   :  { %2462 = vmatmul.mubr.bf16.gmra.mrb[36].mxu1 %v2110_v48 }
 0x96a   :  { %2945 = vmatprep.mubr.bf16.mxu1 %v8322_v10 }
 0xa0b   :  { %v5474_v4 = vpop.f32.mrb[36].mxu0 }
 0xa0c   :  { %v5475_v63 = vpop.f32.mrb[37].mxu0 }
 0xa0d   :  { %v5476_v19 = vadd.f32 %v5475_v63, %v5474_v4  ;;  %v5477_v6 = vpop.f32.mrb[38].mxu0  ;;  %v5995_v4 = vld [vmem:[#allocation2 + $0x1ec] ss:$24 sps:$4 sm:$0xff]   ;;  %v5996_v63 = vld [vmem:[#allocation2 + $0x210] ss:$24 sps:$4 sm:$0xff]  }
 0xa0e   :  { %v5478_v45 = vpop.f32.mrb[39].mxu0  ;;  %2917 = vmatprep.subr.bf16.mxu1 %v5995_v4  ;;  %v6046_v4 = vld [vmem:[#allocation2 + $0x2b4] ss:$24 sps:$4 sm:$0xff]  }
 0xa0f   :  { %v2407_v49 = vadd.f32 %v5476_v19, %v2179_v3  ;;  %v5479_v21 = vadd.f32 %v5478_v45, %v5477_v6  ;;  %v6001_v19 = vld [vmem:[#allocation2 + $0x21c] ss:$24 sps:$4 sm:$0xff]   ;;  %2918 = vmatpush1.bf16.msra.mxu1 %v5993_v20  ;;  %v5999_v6 = vld [vmem:[#allocation2 + $0x218] ss:$24 sps:$4 sm:$0xff]  }
 0xa10   :  { %v5502_v31 = vpop.f32.mrb[32].mxu1  ;;  %2919 = vmatprep.subr.bf16.mxu1 %v6001_v19 }
 0xa11   :  { %v5503_v44 = vpop.f32.mrb[33].mxu1  ;;  %v2410_v35 = vadd.f32 %v5479_v21, %v2179_v3 }
 0xa12   :  { %v5504_v39 = vadd.f32 %v5503_v44, %v5502_v31  ;;  %v5505_v60 = vpop.f32.mrb[34].mxu1 }
 0xa13   :  { %v5506_v56 = vpop.f32.mrb[35].mxu1  ;;  %2920 = vmatpush1.bf16.msra.mxu1 %v5999_v6 }
 0xa14   :  { %v2456_v52 = vadd.f32 %v5504_v39, %v2407_v49  ;;  %v5507_v41 = vadd.f32 %v5506_v56, %v5505_v60  ;;  %v6004_v56 = vld [vmem:[#allocation2 + $0x244] ss:$24 sps:$4 sm:$0xff]  }
 0xa16   :  { %v2459_v58 = vadd.f32 %v5507_v41, %v2410_v35  ;;  %v2470_v61 = vadd.f32 %v2456_v52, %v8324_v53  ;;  %v6002_v52 = vld [vmem:[#allocation2 + $0x240] ss:$24 sps:$4 sm:$0xff]   ;;  %v6007_v41 = vld [vmem:[#allocation2 + $0x24c] ss:$24 sps:$4 sm:$0xff]  }
 0xa17   :  { %2921 = vmatprep.subr.bf16.mxu1 %v6007_v41  ;;  %v6010_v53 = vld [vmem:[#allocation2 + $0x274] ss:$24 sps:$4 sm:$0xff]  }
 0xa18   :  { %2474 = vadd.xlane.f32.xlu1 %v2470_v61  ;;  %v2471_v40 = vadd.f32 %v2459_v58, %v8325_v7  ;;  %v6005_v58 = vld [vmem:[#allocation2 + $0x248] ss:$24 sps:$4 sm:$0xff]   ;;  %v6011_v7 = vld [vmem:[#allocation2 + $0x278] ss:$24 sps:$4 sm:$0xff]  }
 0xa19   :  { %2922 = vmatpush1.bf16.msra.mxu1 %v6005_v58 }
 0xa1a   :  { %2476 = vadd.xlane.f32.xlu0 %v2471_v40 }
 0xa35   :  { %v5480_v50 = vpop.f32.mrb[40].mxu0 }
 0xa36   :  { %v5481_v22 = vpop.f32.mrb[41].mxu0 }
 0xa37   :  { %v5482_v16 = vadd.f32 %v5481_v22, %v5480_v50  ;;  %v5483_v36 = vpop.f32.mrb[42].mxu0  ;;  %v6016_v50 = vld [vmem:[#allocation2 + $0x2a4] ss:$24 sps:$4 sm:$0xff]   ;;  %v6014_v22 = vld [vmem:[#allocation2 + $0x2a0] ss:$24 sps:$4 sm:$0xff]  }
 0xa38   :  { %v5484_v1 = vpop.f32.mrb[43].mxu0 }
 0xa39   :  { %v5485_v5 = vadd.f32 %v5484_v1, %v5483_v36  ;;  %v2415_v28 = vadd.f32 %v5482_v16, %v2179_v3  ;;  %v6019_v16 = vld [vmem:[#allocation2 + $0x2ac] ss:$24 sps:$4 sm:$0xff]   ;;  %v6017_v36 = vld [vmem:[#allocation2 + $0x2a8] ss:$24 sps:$4 sm:$0xff]  }
 0xa3a   :  { %v6022_v1 = vld [vmem:[#allocation2 + $0x2d4] ss:$24 sps:$4 sm:$0xff]  }
 0xa3b   :  { %v2418_v43 = vadd.f32 %v5485_v5, %v2179_v3  ;;  %v5998_v3 = vld [vmem:[#allocation2 + $0x214] ss:$24 sps:$4 sm:$0xff]  }
 0xa3c   :  { %v5508_v11 = vpop.f32.mrb[36].mxu1  ;;  %2866 = vmatprep.subr.bf16.mxu0 %v5998_v3  ;;  %v6025_v5 = vld [vmem:[#allocation2 + $0x2dc] ss:$24 sps:$4 sm:$0xff]  }
 0xa3d   :  { %v5509_v0 = vpop.f32.mrb[37].mxu1  ;;  %2867 = vmatpush1.bf16.msra.mxu0 %v5996_v63 }
 0xa3e   :  { %v5510_v62 = vadd.f32 %v5509_v0, %v5508_v11  ;;  %v5511_v13 = vpop.f32.mrb[38].mxu1  ;;  %2868 = vmatprep.subr.bf16.mxu0 %v6004_v56  ;;  %v6020_v11 = vld [vmem:[#allocation2 + $0x2d0] ss:$24 sps:$4 sm:$0xff]   ;;  %v6028_v0 = vld [vmem:[#allocation2 + $0x194] ss:$24 sps:$4 sm:$0xff]  }
 0xa3f   :  { %v5512_v33 = vpop.f32.mrb[39].mxu1 }
 0xa40   :  { %v2464_v51 = vadd.f32 %v5510_v62, %v2415_v28  ;;  %v5513_v38 = vadd.f32 %v5512_v33, %v5511_v13  ;;  %v6023_v28 = vld [vmem:[#allocation2 + $0x2d8] ss:$24 sps:$4 sm:$0xff]  }
 0xa41   :  { %2869 = vmatpush1.bf16.msra.mxu0 %v6002_v52 }
 0xa42   :  { %v2467_v48 = vadd.f32 %v5513_v38, %v2418_v43  ;;  %v2472_v23 = vadd.f32 %v2464_v51, %v8326_v30  ;;  %2870 = vmatprep.subr.bf16.mxu0 %v6010_v53 }
 0xa44   :  { %2478 = vadd.xlane.f32.xlu1 %v2472_v23  ;;  %v2473_v15 = vadd.f32 %v2467_v48, %v8327_v54  ;;  %v8328_v48 = vld [vmem:[#allocation13_spill] sm:$0xff] }
 0xa45   :  { %v2521_v30 = vrot.slane %v7394_v8, %v8328_v48  ;;  %v6034_v8 = vld [vmem:[#allocation2 + $0x1f4] ss:$24 sps:$4 sm:$0xff]  }
 0xa46   :  { %2480 = vadd.xlane.f32.xlu0 %v2473_v15 }
 0xaa5   :  { %v2475_v9 = vpop.xlane.xlu1 %2474 }
 0xaa6   :  { %v2482_v26 = vmul.f32 0.0078125, %v2475_v9 }
 0xaa7   :  { %v2477_v37 = vpop.xlane.xlu0 %2476 }
 0xaa8   :  { %v7402_v2 = vsub.f32 %v2470_v61, %v2482_v26  ;;  %v2483_v34 = vmul.f32 0.0078125, %v2477_v37  ;;  %v6008_v61 = vld [vmem:[#allocation2 + $0x270] ss:$24 sps:$4 sm:$0xff]   ;;  %v6031_v26 = vld [vmem:[#allocation2 + $0x1c4] ss:$24 sps:$4 sm:$0xff]  }
 0xaa9   :  { %2871 = vmatpush1.bf16.msra.mxu0 %v6008_v61  ;;  %v6029_v37 = vld [vmem:[#allocation2 + $0x1c0] ss:$24 sps:$4 sm:$0xff]  }
 0xaaa   :  { %v7404_v17 = vsub.f32 %v2471_v40, %v2483_v34  ;;  %v2490_v24 = vmul.f32 %v7402_v2, %v7402_v2  ;;  %v6013_v40 = vld [vmem:[#allocation2 + $0x27c] ss:$24 sps:$4 sm:$0xff]   ;;  %2872 = vmatprep.subr.bf16.mxu0 %v6016_v50 }
 0xaab   :  { %2923 = vmatprep.subr.bf16.mxu1 %v6013_v40  ;;  %v6037_v34 = vld [vmem:[#allocation2 + $0x224] ss:$24 sps:$4 sm:$0xff]  }
 0xaac   :  { %2494 = vadd.xlane.f32.xlu1 %v2490_v24  ;;  %v2491_v47 = vmul.f32 %v7404_v17, %v7404_v17  ;;  %2924 = vmatpush1.bf16.msra.mxu1 %v6011_v7  ;;  %v6040_v24 = vld [vmem:[#allocation2 + $0x254] ss:$24 sps:$4 sm:$0xff]   ;;  %v8331_v50 = vld [vmem:[#allocation12_spill] sm:$0xff] }
 0xaad   :  { %2925 = vmatprep.subr.bf16.mxu1 %v6019_v16  ;;  %2873 = vmatpush1.bf16.msra.mxu0 %v6014_v22 }
 0xaae   :  { %2496 = vadd.xlane.f32.xlu0 %v2491_v47  ;;  %2874 = vmatprep.subr.bf16.mxu0 %v6022_v1  ;;  %v6038_v47 = vld [vmem:[#allocation2 + $0x250] ss:$24 sps:$4 sm:$0xff]  }
 0xaaf   :  { %v8332_v1 = vld [vmem:[#allocation11_spill] sm:$0xff] }
 0xab0   :  { %2926 = vmatpush1.bf16.msra.mxu1 %v6017_v36 }
 0xab1   :  { %2927 = vmatprep.subr.bf16.mxu1 %v6025_v5  ;;  %2875 = vmatpush1.bf16.msra.mxu0 %v6020_v11 }
 0xab2   :  { %2966 = vmatprep.subr.bf16.mxu0 %v6028_v0 }
 0xab4   :  { %2928 = vmatpush1.bf16.msra.mxu1 %v6023_v28 }
 0xad1   :  { %v2479_v45 = vpop.xlane.xlu1 %2478 }
 0xad2   :  { %v2484_v31 = vmul.f32 0.0078125, %v2479_v45  ;;  %v6044_v45 = vld [vmem:[#allocation2 + $0x2b0] ss:$24 sps:$4 sm:$0xff]  }
 0xad3   :  { %v2481_v49 = vpop.xlane.xlu0 %2480 }
 0xad4   :  { %v7410_v21 = vsub.f32 %v2472_v23, %v2484_v31  ;;  %v2485_v44 = vmul.f32 0.0078125, %v2481_v49  ;;  %v6049_v31 = vld [vmem:[#allocation2 + $0x2e4] ss:$24 sps:$4 sm:$0xff]  }
 0xad6   :  { %v7412_v39 = vsub.f32 %v2473_v15, %v2485_v44  ;;  %v2492_v60 = vmul.f32 %v7410_v21, %v7410_v21  ;;  %v6047_v44 = vld [vmem:[#allocation2 + $0x2e0] ss:$24 sps:$4 sm:$0xff]  }
 0xad8   :  { %2498 = vadd.xlane.f32.xlu1 %v2492_v60  ;;  %v2493_v35 = vmul.f32 %v7412_v39, %v7412_v39 }
 0xada   :  { %2500 = vadd.xlane.f32.xlu0 %v2493_v35 }
 0xb39   :  { %v2495_v62 = vpop.xlane.xlu1 %2494 }
 0xb3a   :  { %v2502_v13 = vmul.f32 0.0078125, %v2495_v62 }
 0xb3b   :  { %v2497_v43 = vpop.xlane.xlu0 %2496 }
 0xb3c   :  { %v2506_v33 = vadd.f32 1e-12, %v2502_v13  ;;  %v2503_v51 = vmul.f32 0.0078125, %v2497_v43 }
 0xb3e   :  { %6274 = vrsqrt.f32 %v2506_v33  ;;  %v2507_v38 = vadd.f32 1e-12, %v2503_v51 }
 0xb40   :  { %6276 = vrsqrt.f32 %v2507_v38 }
 0xb48   :  { %v6275_v23 = vpop.eup %6274 }
 0xb49   :  { %v2514_v54 = vmul.f32 %v6275_v23, %v7402_v2  ;;  %v6032_v2 = vld [vmem:[#allocation2 + $0x1f0] ss:$24 sps:$4 sm:$0xff]  }
 0xb4a   :  { %v6277_v15 = vpop.eup %6276 }
 0xb4b   :  { %v2522_v27 = vmul.f32 %v2521_v30, %v2514_v54  ;;  %v2515_v42 = vmul.f32 %v6277_v15, %v7404_v17  ;;  %v6035_v17 = vld [vmem:[#allocation2 + $0x220] ss:$24 sps:$4 sm:$0xff]  }
 0xb4d   :  { %v2523_v18 = vmul.f32 %v2521_v30, %v2515_v42  ;;  %v7424_v46 = vadd.f32 %v2529_v14, %v2522_v27 }
 0xb4f   :  { %v7426_v55 = vadd.f32 %v2529_v14, %v2523_v18 }
 0xb51   :  { %v2536_v9 = vpack.c.bf16 %v7426_v55, %v7424_v46 }
 0xb53   :  { %2893 = vmatmul.mubr.bf16.vlgmr.msra.gmra.mrb[44].mxu0 %v2536_v9  ;;  %2946 = vmatmul.mubr.bf16.vlgmr.msra.gmra.mrb[40].mxu1 %v2536_v9 }
 0xb54   :  { %2967 = vmatpush1.bf16.msra.mxu0 %v6026_v32  ;;  %2902 = vmatprep.mubr.bf16.mxu0 %v8322_v10 }
 0xb55   :  { %2968 = vmatprep.subr.bf16.mxu0 %v6031_v26  ;;  %2955 = vmatprep.mubr.bf16.mxu1 %v8322_v10 }
 0xb58   :  { %2969 = vmatpush1.bf16.msra.mxu0 %v6029_v37 }
 0xb59   :  { %2970 = vmatprep.subr.bf16.mxu0 %v6034_v8 }
 0xb5c   :  { %2971 = vmatpush1.bf16.msra.mxu0 %v6032_v2 }
 0xb5d   :  { %2972 = vmatprep.subr.bf16.mxu0 %v6037_v34 }
 0xb60   :  { %2973 = vmatpush1.bf16.msra.mxu0 %v6035_v17 }
 0xb61   :  { %2974 = vmatprep.subr.bf16.mxu0 %v6040_v24 }
 0xb64   :  { %2975 = vmatpush1.bf16.msra.mxu0 %v6038_v47 }
 0xb65   :  { %v2499_v20 = vpop.xlane.xlu1 %2498  ;;  %2976 = vmatprep.subr.bf16.mxu0 %v6043_v59 }
 0xb66   :  { %v2504_v3 = vmul.f32 0.0078125, %v2499_v20 }
 0xb67   :  { %v2501_v63 = vpop.xlane.xlu0 %2500 }
 0xb68   :  { %v2508_v19 = vadd.f32 1e-12, %v2504_v3  ;;  %v2505_v6 = vmul.f32 0.0078125, %v2501_v63  ;;  %2977 = vmatpush1.bf16.msra.mxu0 %v6041_v12 }
 0xb69   :  { %2978 = vmatprep.subr.bf16.mxu0 %v6046_v4 }
 0xb6a   :  { %6278 = vrsqrt.f32 %v2508_v19  ;;  %v2509_v49 = vadd.f32 1e-12, %v2505_v6 }
 0xb6c   :  { %6280 = vrsqrt.f32 %v2509_v49  ;;  %2979 = vmatpush1.bf16.msra.mxu0 %v6044_v45 }
 0xb6d   :  { %2980 = vmatprep.subr.bf16.mxu0 %v6049_v31 }
 0xb70   :  { %2981 = vmatpush1.bf16.msra.mxu0 %v6047_v44 }
 0xb74   :  { %v6279_v60 = vpop.eup %6278 }
 0xb75   :  { %v2516_v35 = vmul.f32 %v6279_v60, %v7410_v21  ;;  %v5285_v21 = vld [vmem:[%s8248_s2 + $0x6] sm:$0x3f] }
 0xb76   :  { %v6281_v56 = vpop.eup %6280  ;;  %v2601_v22 = vrot.slane %v5285_v21, %v8331_v50  ;;  %v2597_v5 = vrot.slane %v5285_v21, %v8332_v1  ;;  %v2605_v11 = vrot.slane %v5285_v21, %v8328_v48 }
 0xb77   :  { %v2517_v52 = vmul.f32 %v6281_v56, %v7412_v39  ;;  %v2524_v41 = vmul.f32 %v2521_v30, %v2516_v35  ;;  %v8330_v39 = vld [vmem:[#allocation10_spill] sm:$0xff]  ;;  %v2609_v35 = vrot.slane %v5285_v21, %v8329_v25 }
 0xb78   :  { %v2593_v40 = vrot.slane %v5285_v21, %v8330_v39 }
 0xb79   :  { %v2525_v58 = vmul.f32 %v2521_v30, %v2517_v52  ;;  %v7434_v53 = vadd.f32 %v2529_v14, %v2524_v41  ;;  %v2613_v41 = vrot.slane %v5285_v21, %v8323_v29 }
 0xb7b   :  { %v7436_v61 = vadd.f32 %v2529_v14, %v2525_v58 }
 0xb7d   :  { %v2537_v7 = vpack.c.bf16 %v7436_v61, %v7434_v53 }
 0xb7f   :  { %2903 = vmatmul.mubr.bf16.gmra.mrb[48].mxu0 %v2537_v7  ;;  %2956 = vmatmul.mubr.bf16.gmra.mrb[44].mxu1 %v2537_v7 }
 0xb80   :  { %2998 = vmatprep.mubr.bf16.mxu0 %v8322_v10 }
 0xb87   :  { %2999 = vmatmul.mubr.bf16.vlgmr.msra.gmra.mrb[52].mxu0 %v2536_v9 }
 0xb88   :  { %3008 = vmatprep.mubr.bf16.mxu0 %v8322_v10 }
 0xb8f   :  { %3009 = vmatmul.mubr.bf16.gmra.mrb[56].mxu0 %v2537_v7 }
 0xc26   :  { %v2894_v16 = vpop.f32.mrb[44].mxu0  ;;  %v2947_v36 = vpop.f32.mrb[40].mxu1 }
 0xc27   :  { %v2896_v28 = vpop.f32.mrb[45].mxu0  ;;  %v2949_v0 = vpop.f32.mrb[41].mxu1  ;;  %v2895_v43 = vadd.f32 %v2894_v16, %v2593_v40  ;;  %v2948_v33 = vadd.f32 %v2947_v36, %v2601_v22 }
 0xc28   :  { %v2898_v62 = vpop.f32.mrb[46].mxu0  ;;  %v2951_v13 = vpop.f32.mrb[42].mxu1  ;;  %v2897_v54 = vadd.f32 %v2896_v28, %v2597_v5  ;;  %v2950_v15 = vadd.f32 %v2949_v0, %v2605_v11 }
 0xc29   :  { %v2899_v51 = vadd.f32 %v2898_v62, %v2593_v40  ;;  %v2952_v38 = vadd.f32 %v2951_v13, %v2601_v22  ;;  %v2900_v30 = vpop.f32.mrb[47].mxu0  ;;  %v2953_v23 = vpop.f32.mrb[43].mxu1 }
 0xc2a   :  { %v2901_v27 = vadd.f32 %v2900_v30, %v2597_v5  ;;  %v2954_v42 = vadd.f32 %v2953_v23, %v2605_v11 }
 0xc2b   :  { %v7449_v14 = vpack.c.bf16 %v2899_v51, %v2895_v43  ;;  %v7451_v18 = vpack.c.bf16 %v2952_v38, %v2948_v33 }
 0xc2c   :  { %v3021_v32 = vpack.c.bf16 %v2901_v27, %v2897_v54  ;;  %v7453_v9 = vpack.c.bf16 %v2954_v42, %v2950_v15 }
 0xc2d   :  { %5682 = vmatprep.mubr.msk.bf16.mxu1 %vm586_vm0, %v7449_v14 }
 0xc2e   :  { %3142 = vrot.lane.b32.xlu1 %v3021_v32, %s6513_s15  ;;  %5802 = vmatprep.subr.msk.bf16.mxu1 %vm586_vm0, %v3021_v32  ;;  %v3032_v26 = vsel %vm586_vm0, %v3021_v32, 0 }
 0xc2f   :  { %5679 = vmatpush3.bf16.xpose.msra.mxu1 %v3032_v26 }
 0xc32   :  { %3136 = vrot.lane.b32.xlu1 %v7449_v14, %s6513_s15 }
 0xc52   :  { %v2904_v37 = vpop.f32.mrb[48].mxu0  ;;  %v2957_v8 = vpop.f32.mrb[44].mxu1 }
 0xc53   :  { %v2958_v2 = vadd.f32 %v2957_v8, %v2601_v22  ;;  %v2906_v34 = vpop.f32.mrb[49].mxu0  ;;  %v2959_v17 = vpop.f32.mrb[45].mxu1  ;;  %v2905_v59 = vadd.f32 %v2904_v37, %v2593_v40 }
 0xc54   :  { %v2908_v24 = vpop.f32.mrb[50].mxu0  ;;  %v2961_v47 = vpop.f32.mrb[46].mxu1  ;;  %v2907_v63 = vadd.f32 %v2906_v34, %v2597_v5  ;;  %v2960_v19 = vadd.f32 %v2959_v17, %v2605_v11 }
 0xc55   :  { %v2909_v12 = vadd.f32 %v2908_v24, %v2593_v40  ;;  %v2962_v20 = vadd.f32 %v2961_v47, %v2601_v22  ;;  %v2910_v4 = vpop.f32.mrb[51].mxu0  ;;  %v2963_v3 = vpop.f32.mrb[47].mxu1 }
 0xc56   :  { %v2911_v6 = vadd.f32 %v2910_v4, %v2597_v5  ;;  %v2964_v45 = vadd.f32 %v2963_v3, %v2605_v11 }
 0xc57   :  { %v3020_v31 = vpack.c.bf16 %v2909_v12, %v2905_v59  ;;  %v7462_v49 = vpack.c.bf16 %v2962_v20, %v2958_v2 }
 0xc58   :  { %v3022_v44 = vpack.c.bf16 %v2911_v6, %v2907_v63  ;;  %v3133_v60 = vpack.c.bf16 %v2964_v45, %v2960_v19 }
 0xc59   :  { %3138 = vrot.lane.b32.xlu1 %v3020_v31, %s6513_s15 }
 0xc5a   :  { %3144 = vrot.lane.b32.xlu0 %v3022_v44, %s6513_s15  ;;  %5803 = vmatprep.subr.msk.bf16.mxu1 %vm586_vm0, %v3022_v44  ;;  %v3035_v56 = vsel %vm586_vm0, %v3022_v44, 0  ;;  %v3000_v52 = vpop.f32.mrb[52].mxu0 }
 0xc5b   :  { %5681 = vmatpush3.bf16.xpose.msra.mxu1 %v3035_v56  ;;  %v3002_v58 = vpop.f32.mrb[53].mxu0  ;;  %v3001_v40 = vadd.f32 %v3000_v52, %v2609_v35  ;;  %v8334_v56 = vld [vmem:[#allocation18_spill] sm:$0xff] }
 0xc5c   :  { %v3004_v7 = vpop.f32.mrb[54].mxu0  ;;  %v3003_v36 = vadd.f32 %v3002_v58, %v2613_v41 }
 0xc5d   :  { %3371 = vrot.lane.b32.xlu1 %v3022_v44, %s6509_s1  ;;  %v3005_v22 = vadd.f32 %v3004_v7, %v2609_v35  ;;  %v3006_v16 = vpop.f32.mrb[55].mxu0 }
 0xc5e   :  { %3369 = vrot.lane.b32.xlu0 %v3021_v32, %s6509_s1  ;;  %v3007_v5 = vadd.f32 %v3006_v16, %v2613_v41  ;;  %v8336_v16 = vld [vmem:[#allocation20_spill] sm:$0xff] }
 0xc5f   :  { %v7472_v11 = vpack.c.bf16 %v3005_v22, %v3001_v40 }
 0xc60   :  { %v7474_v28 = vpack.c.bf16 %v3007_v5, %v3003_v36 }
 0xc61   :  { %3545 = vrot.lane.b32.xlu1 %v3021_v32, %s6514_s16 }
 0xc62   :  { %3365 = vrot.lane.b32.xlu0 %v7449_v14, %s6509_s1  ;;  %5683 = vmatmul.mubr.msk.bf16.vlgmr.msra.gmra.mrb[48].mxu1 %vm586_vm0, %v3020_v31  ;;  %v3010_v21 = vpop.f32.mrb[56].mxu0 }
 0xc63   :  { %v3012_v0 = vpop.f32.mrb[57].mxu0  ;;  %v3011_v13 = vadd.f32 %v3010_v21, %v2609_v35 }
 0xc64   :  { %v3014_v62 = vpop.f32.mrb[58].mxu0  ;;  %v3013_v51 = vadd.f32 %v3012_v0, %v2613_v41 }
 0xc65   :  { %3547 = vrot.lane.b32.xlu1 %v3022_v44, %s6514_s16  ;;  %v3015_v43 = vadd.f32 %v3014_v62, %v2609_v35  ;;  %v3016_v33 = vpop.f32.mrb[59].mxu0 }
 0xc66   :  { %3367 = vrot.lane.b32.xlu0 %v3020_v31, %s6509_s1  ;;  %v3017_v38 = vadd.f32 %v3016_v33, %v2613_v41  ;;  %v8335_v41 = vld [vmem:[#allocation19_spill] sm:$0xff] }
 0xc67   :  { %v7482_v30 = vpack.c.bf16 %v3015_v43, %v3011_v13 }
 0xc68   :  { %v7484_v23 = vpack.c.bf16 %v3017_v38, %v3013_v51 }
 0xc69   :  { %3543 = vrot.lane.b32.xlu1 %v3020_v31, %s6514_s16  ;;  %v8333_v31 = vld [vmem:[#allocation17_spill] sm:$0xff] }
 0xc6a   :  { %3541 = vrot.lane.b32.xlu0 %v7449_v14, %s6514_s16 }
 0xca0   :  { %v3143_v54 = vpop.permute.xlu1 %3142 }
 0xca1   :  { %v3153_v15 = vsel %vm586_vm0, %v3143_v54, 0  ;;  %5804 = vmatprep.subr.msk.bf16.mxu1 %vm586_vm0, %v3143_v54 }
 0xca2   :  { %5687 = vmatpush3.bf16.xpose.msra.mxu1 %v3153_v15 }
 0xca4   :  { %v3137_v27 = vpop.permute.xlu1 %3136 }
 0xca5   :  { %5690 = vmatprep.mubr.msk.bf16.mxu1 %vm586_vm0, %v3137_v27 }
 0xccb   :  { %v3139_v32 = vpop.permute.xlu1 %3138 }
 0xccc   :  { %v3145_v42 = vpop.permute.xlu0 %3144 }
 0xccd   :  { %v3156_v26 = vsel %vm586_vm0, %v3145_v42, 0  ;;  %5805 = vmatprep.subr.msk.bf16.mxu1 %vm586_vm0, %v3145_v42 }
 0xcce   :  { %5689 = vmatpush3.bf16.xpose.msra.mxu1 %v3156_v26 }
 0xccf   :  { %5694 = vmatprep.subr.bf16.mxu1 %v7453_v9  ;;  %v3372_v8 = vpop.permute.xlu1 %3371 }
 0xcd0   :  { %v3370_v37 = vpop.permute.xlu0 %3369  ;;  %v3383_v34 = vsel %vm586_vm0, %v3372_v8, 0 }
 0xcd1   :  { %v3380_v14 = vsel %vm586_vm0, %v3370_v37, 0  ;;  %5806 = vmatprep.subr.msk.bf16.mxu0 %vm586_vm0, %v3370_v37 }
 0xcd2   :  { %5711 = vmatpush3.bf16.xpose.msra.mxu0 %v3380_v14 }
 0xcd3   :  { %5807 = vmatprep.subr.msk.bf16.mxu0 %vm586_vm0, %v3372_v8  ;;  %v3546_v17 = vpop.permute.xlu1 %3545 }
 0xcd4   :  { %v3366_v2 = vpop.permute.xlu0 %3365  ;;  %v3556_v47 = vsel %vm586_vm0, %v3546_v17, 0 }
 0xcd5   :  { %5691 = vmatmul.mubr.msk.bf16.vlgmr.msra.gmra.mrb[52].mxu1 %vm586_vm0, %v3139_v32  ;;  %5714 = vmatprep.mubr.msk.bf16.mxu0 %vm586_vm0, %v3366_v2 }
 0xcd6   :  { %5695 = vmatpush3.bf16.msra.mxu1 %v7453_v9 }
 0xcd7   :  { %5696 = vmatprep.subr.bf16.mxu1 %v3133_v60  ;;  %v3548_v12 = vpop.permute.xlu1 %3547 }
 0xcd8   :  { %v3368_v24 = vpop.permute.xlu0 %3367  ;;  %v3559_v9 = vsel %vm586_vm0, %v3548_v12, 0 }
 0xcda   :  { %5697 = vmatpush3.bf16.msra.mxu1 %v3133_v60  ;;  %5713 = vmatpush3.bf16.xpose.msra.mxu0 %v3383_v34 }
 0xcdb   :  { %5702 = vmatprep.subr.bf16.mxu1 %v7451_v18  ;;  %5808 = vmatprep.subr.msk.bf16.mxu0 %vm586_vm0, %v3546_v17  ;;  %v3544_v20 = vpop.permute.xlu1 %3543 }
 0xcdc   :  { %v3542_v59 = vpop.permute.xlu0 %3541 }
 0xce1   :  { %5715 = vmatmul.mubr.msk.bf16.vlgmr.msra.gmra.mrb[60].mxu0 %vm586_vm0, %v3368_v24 }
 0xce2   :  { %5727 = vmatpush3.bf16.xpose.msra.mxu0 %v3556_v47  ;;  %5730 = vmatprep.mubr.msk.bf16.mxu0 %vm586_vm0, %v3542_v59 }
 0xce3   :  { %5809 = vmatprep.subr.msk.bf16.mxu0 %vm586_vm0, %v3548_v12 }
 0xcea   :  { %5729 = vmatpush3.bf16.xpose.msra.mxu0 %v3559_v9 }
 0xcf1   :  { %5731 = vmatmul.mubr.msk.bf16.vlgmr.msra.gmra.mrb[64].mxu0 %vm586_vm0, %v3544_v20 }
 0xcf2   :  { %4037 = vmatprep.mubr.bf16.mxu0 %v8322_v10 }
 0xd35   :  { %v5684_v4 = vpop.f32.mrb[48].mxu1 }
 0xd36   :  { %v3071_v3 = vpop.f32.mrb[49].mxu1  ;;  %v7527_v21 = vadd.f32 %v5684_v4, %v8334_v56 }
 0xd37   :  { %v5685_v63 = vpop.f32.mrb[50].mxu1  ;;  %v7518_v40 = vadd.f32 %v3071_v3, %v8333_v31 }
 0xd38   :  { %v3074_v19 = vpop.f32.mrb[51].mxu1  ;;  %v3092_v54 = vsel %vm586_vm0, %v7527_v21, -inf  ;;  %v7542_v27 = vadd.f32 %v5685_v63, %v8336_v16 }
 0xd39   :  { %v3086_v0 = vsel %vm586_vm0, %v7518_v40, -inf  ;;  %v7532_v62 = vadd.f32 %v3074_v19, %v8335_v41 }
 0xd3a   :  { %v3095_v14 = vsel %vm586_vm0, %v7542_v27, -inf }
 0xd3b   :  { %v3089_v42 = vsel %vm586_vm0, %v7532_v62, -inf }
 0xda8   :  { %v5692_v6 = vpop.f32.mrb[52].mxu1 }
 0xda9   :  { %v3192_v45 = vpop.f32.mrb[53].mxu1  ;;  %v7513_v52 = vadd.f32 %v5692_v6, %v8334_v56 }
 0xdaa   :  { %v3193_v44 = vadd.f32 %v3192_v45, %v8333_v31  ;;  %v5693_v60 = vpop.f32.mrb[54].mxu1 }
 0xdab   :  { %v3195_v35 = vpop.f32.mrb[55].mxu1  ;;  %v7522_v36 = vadd.f32 %v5693_v60, %v8336_v16  ;;  %v3213_v5 = vsel %vm586_vm0, %v7513_v52, -inf }
 0xdac   :  { %v3196_v58 = vadd.f32 %v3195_v35, %v8335_v41  ;;  %v3207_v7 = vsel %vm586_vm0, %v3193_v44, -inf }
 0xdad   :  { %3208 = vmax.xlane.f32.xlu0 %v3207_v7  ;;  %v3216_v43 = vsel %vm586_vm0, %v7522_v36, -inf }
 0xdae   :  { %v3210_v22 = vsel %vm586_vm0, %v3196_v58, -inf }
 0xdaf   :  { %3211 = vmax.xlane.f32.xlu1 %v3210_v22 }
 0xdb1   :  { %3214 = vmax.xlane.f32.xlu0 %v3213_v5 }
 0xdb3   :  { %3087 = vmax.xlane.f32.xlu1 %v3086_v0 }
 0xdb4   :  { %v5716_v13 = vpop.f32.mrb[60].mxu0 }
 0xdb5   :  { %3217 = vmax.xlane.f32.xlu0 %v3216_v43  ;;  %v3419_v33 = vpop.f32.mrb[61].mxu0  ;;  %v7547_v32 = vadd.f32 %v5716_v13, %v8334_v56 }
 0xdb6   :  { %v7537_v51 = vadd.f32 %v3419_v33, %v8333_v31  ;;  %v5717_v38 = vpop.f32.mrb[62].mxu0 }
 0xdb7   :  { %3093 = vmax.xlane.f32.xlu1 %v3092_v54  ;;  %v3422_v15 = vpop.f32.mrb[63].mxu0  ;;  %v3440_v8 = vsel %vm586_vm0, %v7547_v32, -inf  ;;  %v7559_v2 = vadd.f32 %v5717_v38, %v8336_v16 }
 0xdb8   :  { %v3434_v26 = vsel %vm586_vm0, %v7537_v51, -inf  ;;  %v7552_v37 = vadd.f32 %v3422_v15, %v8335_v41 }
 0xdb9   :  { %3090 = vmax.xlane.f32.xlu0 %v3089_v42  ;;  %v3443_v24 = vsel %vm586_vm0, %v7559_v2, -inf }
 0xdba   :  { %v3437_v34 = vsel %vm586_vm0, %v7552_v37, -inf }
 0xdbb   :  { %3435 = vmax.xlane.f32.xlu1 %v3434_v26 }
 0xdbd   :  { %3096 = vmax.xlane.f32.xlu0 %v3095_v14 }
 0xdbf   :  { %3441 = vmax.xlane.f32.xlu1 %v3440_v8 }
 0xdc1   :  { %3438 = vmax.xlane.f32.xlu0 %v3437_v34 }
 0xdc4   :  { %v5732_v17 = vpop.f32.mrb[64].mxu0 }
 0xdc5   :  { %3444 = vmax.xlane.f32.xlu0 %v3443_v24  ;;  %v3595_v47 = vpop.f32.mrb[65].mxu0  ;;  %v7569_v20 = vadd.f32 %v5732_v17, %v8334_v56 }
 0xdc6   :  { %v7566_v59 = vadd.f32 %v3595_v47, %v8333_v31  ;;  %v5733_v12 = vpop.f32.mrb[66].mxu0 }
 0xdc7   :  { %v3598_v9 = vpop.f32.mrb[67].mxu0  ;;  %v7577_v63 = vadd.f32 %v5733_v12, %v8336_v16  ;;  %v3616_v6 = vsel %vm586_vm0, %v7569_v20, -inf }
 0xdc8   :  { %v7572_v4 = vadd.f32 %v3598_v9, %v8335_v41  ;;  %v3610_v3 = vsel %vm586_vm0, %v7566_v59, -inf }
 0xdc9   :  { %3611 = vmax.xlane.f32.xlu1 %v3610_v3  ;;  %v3619_v45 = vsel %vm586_vm0, %v7577_v63, -inf }
 0xdca   :  { %v3613_v19 = vsel %vm586_vm0, %v7572_v4, -inf }
 0xdcb   :  { %3614 = vmax.xlane.f32.xlu0 %v3613_v19 }
 0xdcd   :  { %3617 = vmax.xlane.f32.xlu1 %v3616_v6 }
 0xdcf   :  { %3620 = vmax.xlane.f32.xlu0 %v3619_v45 }
 0xe3a   :  { %v3209_v31 = vpop.xlane.xlu0 %3208 }
 0xe3b   :  { %v3219_v60 = vsub.f32 %v3193_v44, %v3209_v31 }
 0xe3c   :  { %v3212_v35 = vpop.xlane.xlu1 %3211 }
 0xe3d   :  { %v3223_v56 = vmul.f32 1.442695, %v3219_v60  ;;  %v3220_v41 = vsub.f32 %v3196_v58, %v3212_v35 }
 0xe3e   :  { %v3215_v7 = vpop.xlane.xlu0 %3214 }
 0xe3f   :  { %6282 = vpow2.f32 %v3223_v56  ;;  %v3225_v22 = vmul.f32 1.442695, %v3220_v41  ;;  %v3221_v16 = vsub.f32 %v7513_v52, %v3215_v7 }
 0xe40   :  { %v3088_v5 = vpop.xlane.xlu1 %3087 }
 0xe41   :  { %6284 = vpow2.f32 %v3225_v22  ;;  %v3227_v0 = vmul.f32 1.442695, %v3221_v16  ;;  %v3098_v13 = vsub.f32 %v7518_v40, %v3088_v5 }
 0xe42   :  { %v3218_v43 = vpop.xlane.xlu0 %3217 }
 0xe43   :  { %6286 = vpow2.f32 %v3227_v0  ;;  %v3102_v33 = vmul.f32 1.442695, %v3098_v13  ;;  %v3222_v38 = vsub.f32 %v7522_v36, %v3218_v43 }
 0xe44   :  { %v3094_v54 = vpop.xlane.xlu1 %3093 }
 0xe45   :  { %6288 = vpow2.f32 %v3102_v33  ;;  %v3229_v44 = vmul.f32 1.442695, %v3222_v38  ;;  %v3100_v58 = vsub.f32 %v7527_v21, %v3094_v54 }
 0xe46   :  { %v3091_v15 = vpop.xlane.xlu0 %3090 }
 0xe47   :  { %6290 = vpow2.f32 %v3229_v44  ;;  %v3106_v42 = vmul.f32 1.442695, %v3100_v58  ;;  %v3099_v52 = vsub.f32 %v7532_v62, %v3091_v15 }
 0xe48   :  { %v3436_v26 = vpop.xlane.xlu1 %3435 }
 0xe49   :  { %v7590_v14 = vpop.eup %6282  ;;  %6292 = vpow2.f32 %v3106_v42  ;;  %v3104_v40 = vmul.f32 1.442695, %v3099_v52  ;;  %v3446_v8 = vsub.f32 %v7537_v51, %v3436_v26 }
 0xe4a   :  { %v3097_v34 = vpop.xlane.xlu0 %3096  ;;  %v3231_v36 = vsel %vm586_vm0, %v7590_v14, 0.0 }
 0xe4b   :  { %v7595_v17 = vpop.eup %6284  ;;  %6294 = vpow2.f32 %v3104_v40  ;;  %v3450_v21 = vmul.f32 1.442695, %v3446_v8  ;;  %v3101_v24 = vsub.f32 %v7542_v27, %v3097_v34  ;;  %3232 = vadd.xlane.f32.xlu1 %v3231_v36 }
 0xe4c   :  { %v3442_v47 = vpop.xlane.xlu1 %3441  ;;  %v3234_v62 = vsel %vm586_vm0, %v7595_v17, 0.0 }
 0xe4d   :  { %v7600_v12 = vpop.eup %6286  ;;  %6296 = vpow2.f32 %v3450_v21  ;;  %v3108_v9 = vmul.f32 1.442695, %v3101_v24  ;;  %v3448_v51 = vsub.f32 %v7547_v32, %v3442_v47  ;;  %3235 = vadd.xlane.f32.xlu0 %v3234_v62 }
 0xe4e   :  { %v3439_v3 = vpop.xlane.xlu0 %3438  ;;  %v3237_v19 = vsel %vm586_vm0, %v7600_v12, 0.0 }
 0xe4f   :  { %v7605_v6 = vpop.eup %6288  ;;  %6298 = vpow2.f32 %v3108_v9  ;;  %v3454_v27 = vmul.f32 1.442695, %v3448_v51  ;;  %v3447_v45 = vsub.f32 %v7552_v37, %v3439_v3  ;;  %3238 = vadd.xlane.f32.xlu1 %v3237_v19 }
 0xe50   :  { %v3110_v56 = vsel %vm586_vm0, %v7605_v6, 0.0 }
 0xe51   :  { %v7608_v31 = vpop.eup %6290  ;;  %6300 = vpow2.f32 %v3454_v27  ;;  %v3452_v60 = vmul.f32 1.442695, %v3447_v45 }
 0xe52   :  { %v3445_v35 = vpop.xlane.xlu0 %3444  ;;  %v3240_v32 = vsel %vm586_vm0, %v7608_v31, 0.0 }
 0xe53   :  { %v7614_v41 = vpop.eup %6292  ;;  %6302 = vpow2.f32 %v3452_v60  ;;  %v3449_v7 = vsub.f32 %v7559_v2, %v3445_v35  ;;  %3241 = vadd.xlane.f32.xlu0 %v3240_v32  ;;  %3111 = vadd.xlane.f32.xlu1 %v3110_v56 }
 0xe54   :  { %v3116_v0 = vsel %vm586_vm0, %v7614_v41, 0.0 }
 0xe55   :  { %v7617_v37 = vpop.eup %6294  ;;  %v3456_v22 = vmul.f32 1.442695, %v3449_v7 }
 0xe56   :  { %v3612_v16 = vpop.xlane.xlu1 %3611  ;;  %v3113_v5 = vsel %vm586_vm0, %v7617_v37, 0.0 }
 0xe57   :  { %v7623_v13 = vpop.eup %6296  ;;  %6304 = vpow2.f32 %v3456_v22  ;;  %v3622_v43 = vsub.f32 %v7566_v59, %v3612_v16  ;;  %3114 = vadd.xlane.f32.xlu0 %v3113_v5  ;;  %3117 = vadd.xlane.f32.xlu1 %v3116_v0 }
 0xe58   :  { %v3615_v2 = vpop.xlane.xlu0 %3614  ;;  %v3458_v15 = vsel %vm586_vm0, %v7623_v13, 0.0 }
 0xe59   :  { %v7626_v33 = vpop.eup %6298  ;;  %v3626_v38 = vmul.f32 1.442695, %v3622_v43  ;;  %v3623_v54 = vsub.f32 %v7572_v4, %v3615_v2 }
 0xe5a   :  { %v3618_v44 = vpop.xlane.xlu1 %3617  ;;  %v3119_v58 = vsel %vm586_vm0, %v7626_v33, 0.0 }
 0xe5b   :  { %v7633_v42 = vpop.eup %6300  ;;  %6306 = vpow2.f32 %v3626_v38  ;;  %v3628_v52 = vmul.f32 1.442695, %v3623_v54  ;;  %v3624_v59 = vsub.f32 %v7569_v20, %v3618_v44  ;;  %3120 = vadd.xlane.f32.xlu0 %v3119_v58  ;;  %3459 = vadd.xlane.f32.xlu1 %v3458_v15 }
 0xe5c   :  { %v3621_v26 = vpop.xlane.xlu0 %3620  ;;  %v3464_v36 = vsel %vm586_vm0, %v7633_v42, 0.0 }
 0xe5d   :  { %v7636_v40 = vpop.eup %6302  ;;  %6308 = vpow2.f32 %v3628_v52  ;;  %v3630_v4 = vmul.f32 1.442695, %v3624_v59  ;;  %v3625_v8 = vsub.f32 %v7577_v63, %v3621_v26 }
 0xe5e   :  { %v3461_v34 = vsel %vm586_vm0, %v7636_v40, 0.0 }
 0xe5f   :  { %6310 = vpow2.f32 %v3630_v4  ;;  %v3632_v21 = vmul.f32 1.442695, %v3625_v8  ;;  %3462 = vadd.xlane.f32.xlu0 %v3461_v34  ;;  %3465 = vadd.xlane.f32.xlu1 %v3464_v36 }
 0xe61   :  { %v7643_v20 = vpop.eup %6304  ;;  %6312 = vpow2.f32 %v3632_v21 }
 0xe62   :  { %v3467_v24 = vsel %vm586_vm0, %v7643_v20, 0.0 }
 0xe63   :  { %3468 = vadd.xlane.f32.xlu0 %v3467_v24 }
 0xe65   :  { %v7647_v47 = vpop.eup %6306 }
 0xe66   :  { %v3634_v63 = vsel %vm586_vm0, %v7647_v47, 0.0 }
 0xe67   :  { %v7651_v62 = vpop.eup %6308  ;;  %3635 = vadd.xlane.f32.xlu1 %v3634_v63 }
 0xe68   :  { %v3637_v9 = vsel %vm586_vm0, %v7651_v62, 0.0 }
 0xe69   :  { %v7655_v51 = vpop.eup %6310  ;;  %3638 = vadd.xlane.f32.xlu0 %v3637_v9 }
 0xe6a   :  { %v3640_v3 = vsel %vm586_vm0, %v7655_v51, 0.0 }
 0xe6b   :  { %v7659_v19 = vpop.eup %6312  ;;  %3641 = vadd.xlane.f32.xlu1 %v3640_v3 }
 0xe6c   :  { %v3643_v27 = vsel %vm586_vm0, %v7659_v19, 0.0 }
 0xe6d   :  { %3644 = vadd.xlane.f32.xlu0 %v3643_v27 }
 0xed8   :  { %v3233_v45 = vpop.xlane.xlu1 %3232 }
 0xed9   :  { %6314 = vrcp.f32 %v3233_v45 }
 0xeda   :  { %v3236_v60 = vpop.xlane.xlu0 %3235 }
 0xedb   :  { %6316 = vrcp.f32 %v3236_v60 }
 0xedc   :  { %v3239_v35 = vpop.xlane.xlu1 %3238 }
 0xedd   :  { %6318 = vrcp.f32 %v3239_v35 }
 0xee0   :  { %v3242_v32 = vpop.xlane.xlu0 %3241  ;;  %v3112_v56 = vpop.xlane.xlu1 %3111 }
 0xee1   :  { %6320 = vrcp.f32 %v3242_v32 }
 0xee2   :  { %6322 = vrcp.f32 %v3112_v56 }
 0xee3   :  { %v6315_v7 = vpop.eup %6314 }
 0xee4   :  { %v3115_v22 = vpop.xlane.xlu0 %3114  ;;  %v3118_v16 = vpop.xlane.xlu1 %3117  ;;  %v3247_v0 = vmul.f32 %v6315_v7, %v7590_v14 }
 0xee5   :  { %v6317_v5 = vpop.eup %6316  ;;  %6324 = vrcp.f32 %v3115_v22 }
 0xee6   :  { %v3248_v43 = vmul.f32 %v6317_v5, %v7595_v17 }
 0xee7   :  { %v6319_v44 = vpop.eup %6318 }
 0xee8   :  { %v3121_v2 = vpop.xlane.xlu0 %3120  ;;  %v3460_v38 = vpop.xlane.xlu1 %3459  ;;  %v3251_v54 = vpack.c.bf16 %v3248_v43, %v3247_v0  ;;  %v3249_v15 = vmul.f32 %v6319_v44, %v7600_v12 }
 0xee9   :  { %6326 = vrcp.f32 %v3121_v2 }
 0xeea   :  { %6328 = vrcp.f32 %v3118_v16  ;;  %5698 = vmatprep.mubr.msk.bf16.mxu1 %vm586_vm0, %v3251_v54 }
 0xeeb   :  { %v6321_v58 = vpop.eup %6320  ;;  %6330 = vrcp.f32 %v3460_v38 }
 0xeec   :  { %v3250_v52 = vmul.f32 %v6321_v58, %v7608_v31  ;;  %v3463_v59 = vpop.xlane.xlu0 %3462  ;;  %v6323_v26 = vpop.eup %6322 }
 0xeed   :  { %6332 = vrcp.f32 %v3463_v59  ;;  %v3126_v17 = vmul.f32 %v6323_v26, %v7605_v6  ;;  %v3466_v34 = vpop.xlane.xlu1 %3465  ;;  %v6050_v59 = vld [vmem:[#allocation4 + $0x100] ss:$16 sps:$4 sm:$0xff]   ;;  %v6052_v26 = vld [vmem:[#allocation4 + $0x104] ss:$16 sps:$4 sm:$0xff]  }
 0xeee   :  { %v3252_v14 = vpack.c.bf16 %v3250_v52, %v3249_v15  ;;  %4005 = vmatprep.subr.bf16.mxu0 %v6052_v26 }
 0xeef   :  { %v6325_v4 = vpop.eup %6324  ;;  %4006 = vmatpush1.bf16.msra.mxu0 %v6050_v59 }
 0xef0   :  { %5699 = vmatmul.mubr.msk.bf16.vlgmr.msra.gmra.mrb[56].mxu1 %vm586_vm0, %v3252_v14  ;;  %v3127_v8 = vmul.f32 %v6325_v4, %v7617_v37  ;;  %v3469_v36 = vpop.xlane.xlu0 %3468  ;;  %v6053_v14 = vld [vmem:[#allocation4 + $0x108] ss:$16 sps:$4 sm:$0xff]   ;;  %v6058_v4 = vld [vmem:[#allocation4 + $0x124] ss:$16 sps:$4 sm:$0xff]  }
 0xef1   :  { %5703 = vmatpush3.bf16.msra.mxu1 %v7451_v18  ;;  %6334 = vrcp.f32 %v3469_v36  ;;  %4007 = vmatprep.subr.bf16.mxu0 %v6058_v4 }
 0xef2   :  { %5704 = vmatprep.subr.bf16.mxu1 %v7462_v49  ;;  %v3130_v12 = vpack.c.bf16 %v3127_v8, %v3126_v17  ;;  %6336 = vrcp.f32 %v3466_v34  ;;  %v6061_v17 = vld [vmem:[#allocation4 + $0x12c] ss:$16 sps:$4 sm:$0xff]  }
 0xef3   :  { %v6327_v21 = vpop.eup %6326 }
 0xef4   :  { %v6329_v31 = vpop.eup %6328  ;;  %5706 = vmatprep.mubr.msk.bf16.mxu1 %vm586_vm0, %v3130_v12  ;;  %v3636_v63 = vpop.xlane.xlu1 %3635  ;;  %v3129_v6 = vmul.f32 %v6327_v21, %v7626_v33 }
 0xef5   :  { %v6331_v24 = vpop.eup %6330  ;;  %5705 = vmatpush3.bf16.msra.mxu1 %v7462_v49  ;;  %v3128_v9 = vmul.f32 %v6329_v31, %v7614_v41 }
 0xef6   :  { %5718 = vmatprep.subr.bf16.mxu1 %v7472_v11  ;;  %v3639_v37 = vpop.xlane.xlu0 %3638  ;;  %v3474_v3 = vmul.f32 %v6331_v24, %v7623_v13 }
 0xef7   :  { %v6333_v18 = vpop.eup %6332  ;;  %6338 = vrcp.f32 %v3639_v37  ;;  %v3131_v45 = vpack.c.bf16 %v3129_v6, %v3128_v9 }
 0xef8   :  { %6340 = vrcp.f32 %v3636_v63  ;;  %v3475_v27 = vmul.f32 %v6333_v18, %v7636_v40  ;;  %v3642_v32 = vpop.xlane.xlu1 %3641 }
 0xefa   :  { %v3478_v60 = vpack.c.bf16 %v3475_v27, %v3474_v3  ;;  %v3645_v49 = vpop.xlane.xlu0 %3644 }
 0xefb   :  { %v6335_v33 = vpop.eup %6334  ;;  %6342 = vrcp.f32 %v3645_v49  ;;  %v6067_v49 = vld [vmem:[#allocation4 + $0x14c] ss:$16 sps:$4 sm:$0xff]  }
 0xefc   :  { %5707 = vmatmul.mubr.msk.bf16.vlgmr.msra.gmra.mrb[56].mxu1 %vm586_vm0, %v3131_v45  ;;  %v6337_v35 = vpop.eup %6336  ;;  %v3477_v40 = vmul.f32 %v6335_v33, %v7643_v20  ;;  %6344 = vrcp.f32 %v3642_v32  ;;  %v6062_v33 = vld [vmem:[#allocation4 + $0x140] ss:$16 sps:$4 sm:$0xff]   ;;  %v6070_v32 = vld [vmem:[#allocation4 + $0x164] ss:$16 sps:$4 sm:$0xff]  }
 0xefd   :  { %5719 = vmatpush3.bf16.msra.mxu1 %v7472_v11  ;;  %5722 = vmatprep.mubr.msk.bf16.mxu1 %vm586_vm0, %v3478_v60  ;;  %v3476_v56 = vmul.f32 %v6337_v35, %v7633_v42  ;;  %v6064_v60 = vld [vmem:[#allocation4 + $0x144] ss:$16 sps:$4 sm:$0xff]   ;;  %v6065_v35 = vld [vmem:[#allocation4 + $0x148] ss:$16 sps:$4 sm:$0xff]  }
 0xefe   :  { %5720 = vmatprep.subr.bf16.mxu1 %v7482_v30 }
 0xeff   :  { %v3479_v22 = vpack.c.bf16 %v3477_v40, %v3476_v56  ;;  %v6071_v40 = vld [vmem:[#allocation4 + $0x168] ss:$16 sps:$4 sm:$0xff]   ;;  %v6079_v56 = vld [vmem:[#allocation4 + $0x18c] ss:$16 sps:$4 sm:$0xff]  }
 0xf01   :  { %v6339_v41 = vpop.eup %6338  ;;  %5721 = vmatpush3.bf16.msra.mxu1 %v7482_v30 }
 0xf02   :  { %v6341_v13 = vpop.eup %6340  ;;  %5734 = vmatprep.subr.bf16.mxu1 %v7474_v28  ;;  %v3651_v11 = vmul.f32 %v6339_v41, %v7651_v62  ;;  %v6073_v41 = vld [vmem:[#allocation4 + $0x16c] ss:$16 sps:$4 sm:$0xff]  }
 0xf03   :  { %v3650_v7 = vmul.f32 %v6341_v13, %v7647_v47  ;;  %v6068_v13 = vld [vmem:[#allocation4 + $0x160] ss:$16 sps:$4 sm:$0xff]  }
 0xf05   :  { %v3654_v16 = vpack.c.bf16 %v3651_v11, %v3650_v7  ;;  %v6343_v30 = vpop.eup %6342  ;;  %v6076_v11 = vld [vmem:[#allocation4 + $0x184] ss:$16 sps:$4 sm:$0xff]   ;;  %v6074_v7 = vld [vmem:[#allocation4 + $0x180] ss:$16 sps:$4 sm:$0xff]  }
 0xf06   :  { %v6345_v20 = vpop.eup %6344  ;;  %v3653_v62 = vmul.f32 %v6343_v30, %v7659_v19  ;;  %v6085_v30 = vld [vmem:[#allocation4 + $0x1ac] ss:$16 sps:$4 sm:$0xff]  }
 0xf07   :  { %v3652_v42 = vmul.f32 %v6345_v20, %v7655_v51  ;;  %v6080_v20 = vld [vmem:[#allocation4 + $0x1a0] ss:$16 sps:$4 sm:$0xff]  }
 0xf08   :  { %5723 = vmatmul.mubr.msk.bf16.vlgmr.msra.gmra.mrb[56].mxu1 %vm586_vm0, %v3479_v22  ;;  %v6077_v22 = vld [vmem:[#allocation4 + $0x188] ss:$16 sps:$4 sm:$0xff]  }
 0xf09   :  { %5735 = vmatpush3.bf16.msra.mxu1 %v7474_v28  ;;  %5738 = vmatprep.mubr.msk.bf16.mxu1 %vm586_vm0, %v3654_v16  ;;  %v3655_v5 = vpack.c.bf16 %v3653_v62, %v3652_v42  ;;  %v7702_v28 = vld [vmem:[%s8249_s3 + $0x8] sm:$0x3f]  ;;  %v6082_v16 = vld [vmem:[#allocation4 + $0x1a4] ss:$16 sps:$4 sm:$0xff]   ;;  %v6086_v42 = vld [vmem:[#allocation4 + $0x1c0] ss:$16 sps:$4 sm:$0xff]  }
 0xf0a   :  { %5736 = vmatprep.subr.bf16.mxu1 %v7484_v23  ;;  %v3722_v0 = vrot.slane %v7702_v28, %v8330_v39  ;;  %v6083_v62 = vld [vmem:[#allocation4 + $0x1a8] ss:$16 sps:$4 sm:$0xff]  }
 0xf0d   :  { %5737 = vmatpush3.bf16.msra.mxu1 %v7484_v23 }
 0xf14   :  { %5739 = vmatmul.mubr.msk.bf16.vlgmr.msra.gmra.mrb[56].mxu1 %vm586_vm0, %v3655_v5  ;;  %v6088_v5 = vld [vmem:[#allocation4 + $0x1c4] ss:$16 sps:$4 sm:$0xff]  }
 0xf15   :  { %4090 = vmatprep.mubr.bf16.mxu1 %v8322_v10 }
 0xfe7   :  { %v5740_v47 = vpop.f32.mrb[56].mxu1 }
 0xfe8   :  { %v3696_v43 = vpop.f32.mrb[57].mxu1  ;;  %v3717_v51 = vadd.f32 %v5740_v47, %v7434_v53  ;;  %v6056_v53 = vld [vmem:[#allocation4 + $0x120] ss:$16 sps:$4 sm:$0xff]   ;;  %v6089_v47 = vld [vmem:[#allocation4 + $0x1c8] ss:$16 sps:$4 sm:$0xff]  }
 0xfe9   :  { %v3715_v23 = vadd.f32 %v3696_v43, %v7424_v46  ;;  %v5741_v19 = vpop.f32.mrb[58].mxu1  ;;  %v6055_v46 = vld [vmem:[#allocation4 + $0x10c] ss:$16 sps:$4 sm:$0xff]   ;;  %4008 = vmatpush1.bf16.msra.mxu0 %v6056_v53  ;;  %v6094_v43 = vld [vmem:[#allocation4 + $0x1e4] ss:$16 sps:$4 sm:$0xff]  }
 0xfea   :  { %v3699_v2 = vpop.f32.mrb[59].mxu1  ;;  %v3718_v44 = vadd.f32 %v5741_v19, %v7436_v61  ;;  %v3725_v15 = vadd.f32 %v3722_v0, %v3717_v51  ;;  %4058 = vmatprep.subr.bf16.mxu1 %v6055_v46  ;;  %4009 = vmatprep.subr.bf16.mxu0 %v6064_v60  ;;  %v6092_v19 = vld [vmem:[#allocation4 + $0x1e0] ss:$16 sps:$4 sm:$0xff]  }
 0xfeb   :  { %v3723_v38 = vadd.f32 %v3722_v0, %v3715_v23  ;;  %v3716_v54 = vadd.f32 %v3699_v2, %v7426_v55  ;;  %4059 = vmatpush1.bf16.msra.mxu1 %v6053_v14  ;;  %v6059_v55 = vld [vmem:[#allocation4 + $0x128] ss:$16 sps:$4 sm:$0xff]   ;;  %v6097_v23 = vld [vmem:[#allocation4 + $0x1ec] ss:$16 sps:$4 sm:$0xff]  }
 0xfec   :  { %v3726_v52 = vadd.f32 %v3722_v0, %v3718_v44  ;;  %4060 = vmatprep.subr.bf16.mxu1 %v6061_v17  ;;  %v6095_v2 = vld [vmem:[#allocation4 + $0x1e8] ss:$16 sps:$4 sm:$0xff]   ;;  %v3774_v17 = vrot.slane %v7702_v28, %v8332_v1 }
 0xfed   :  { %v3724_v58 = vadd.f32 %v3722_v0, %v3716_v54  ;;  %3727 = vadd.xlane.f32.xlu1 %v3723_v38  ;;  %4010 = vmatpush1.bf16.msra.mxu0 %v6062_v33  ;;  %v6091_v0 = vld [vmem:[#allocation4 + $0x1cc] ss:$16 sps:$4 sm:$0xff]   ;;  %v6100_v33 = vld [vmem:[#allocation6 + $0x100] sm:$0xff]  }
 0xfee   :  { %4011 = vmatprep.subr.bf16.mxu0 %v6070_v32  ;;  %v6102_v32 = vld [vmem:[#allocation6 + $0x148] sm:$0xff]  }
 0xfef   :  { %3729 = vadd.xlane.f32.xlu0 %v3724_v58  ;;  %4061 = vmatpush1.bf16.msra.mxu1 %v6059_v55 }
 0xff0   :  { %4062 = vmatprep.subr.bf16.mxu1 %v6067_v49  ;;  %v6099_v49 = vld [vmem:[#allocation6 + $0x1c0] sm:$0xff]  }
 0xff1   :  { %3731 = vadd.xlane.f32.xlu1 %v3725_v15  ;;  %4012 = vmatpush1.bf16.msra.mxu0 %v6068_v13  ;;  %v6105_v13 = vld [vmem:[#allocation6 + $0x188] sm:$0xff]  }
 0xff2   :  { %4013 = vmatprep.subr.bf16.mxu0 %v6076_v11  ;;  %v6107_v11 = vld [vmem:[#allocation6 + $0x1d0] sm:$0xff]  }
 0xff3   :  { %3733 = vadd.xlane.f32.xlu0 %v3726_v52  ;;  %4063 = vmatpush1.bf16.msra.mxu1 %v6065_v35  ;;  %v6101_v35 = vld [vmem:[#allocation6 + $0x180] sm:$0xff]  }
 0xff4   :  { %4064 = vmatprep.subr.bf16.mxu1 %v6073_v41  ;;  %v6103_v41 = vld [vmem:[#allocation6 + $0x1c8] sm:$0xff]  }
 0xff5   :  { %4014 = vmatpush1.bf16.msra.mxu0 %v6074_v7  ;;  %v6109_v7 = vld [vmem:[#allocation6 + $0x190] sm:$0xff]  }
 0xff6   :  { %4015 = vmatprep.subr.bf16.mxu0 %v6082_v16  ;;  %v6111_v16 = vld [vmem:[#allocation6 + $0x1d8] sm:$0xff]  }
 0xff7   :  { %4065 = vmatpush1.bf16.msra.mxu1 %v6071_v40  ;;  %v6106_v40 = vld [vmem:[#allocation6 + $0x150] sm:$0xff]  }
 0xff8   :  { %4066 = vmatprep.subr.bf16.mxu1 %v6079_v56  ;;  %v6108_v56 = vld [vmem:[#allocation6 + $0x110] sm:$0xff]  }
 0xff9   :  { %4016 = vmatpush1.bf16.msra.mxu0 %v6080_v20  ;;  %v6113_v20 = vld [vmem:[#allocation6 + $0x198] sm:$0xff]  }
 0xffa   :  { %4017 = vmatprep.subr.bf16.mxu0 %v6088_v5  ;;  %v6116_v5 = vld [vmem:[#allocation6 + $0x120] sm:$0xff]  }
 0xffb   :  { %4067 = vmatpush1.bf16.msra.mxu1 %v6077_v22  ;;  %v6110_v22 = vld [vmem:[#allocation6 + $0x158] sm:$0xff]  }
 0xffc   :  { %4068 = vmatprep.subr.bf16.mxu1 %v6085_v30  ;;  %v6112_v30 = vld [vmem:[#allocation6 + $0x118] sm:$0xff]  }
 0xffd   :  { %4018 = vmatpush1.bf16.msra.mxu0 %v6086_v42  ;;  %v6115_v42 = vld [vmem:[#allocation6 + $0x1e0] sm:$0xff]  }
 0xffe   :  { %4019 = vmatprep.subr.bf16.mxu0 %v6094_v43  ;;  %v6119_v43 = vld [vmem:[#allocation6 + $0x1e8] sm:$0xff]  }
 0xfff   :  { %4069 = vmatpush1.bf16.msra.mxu1 %v6083_v62  ;;  %v6114_v62 = vld [vmem:[#allocation6 + $0x160] sm:$0xff]  }
0x1000   :  { %4070 = vmatprep.subr.bf16.mxu1 %v6091_v0  ;;  %v6118_v0 = vld [vmem:[#allocation6 + $0x168] sm:$0xff]  }
0x1001   :  { %4020 = vmatpush1.bf16.msra.mxu0 %v6092_v19  ;;  %v6121_v19 = vld [vmem:[#allocation6 + $0x1a8] sm:$0xff]  }
0x1003   :  { %4071 = vmatpush1.bf16.msra.mxu1 %v6089_v47  ;;  %v6117_v47 = vld [vmem:[#allocation6 + $0x1a0] sm:$0xff]  }
0x1004   :  { %4072 = vmatprep.subr.bf16.mxu1 %v6097_v23  ;;  %v6120_v23 = vld [vmem:[#allocation6 + $0x128] sm:$0xff]  }
0x1007   :  { %4073 = vmatpush1.bf16.msra.mxu1 %v6095_v2  ;;  %v6122_v2 = vld [vmem:[#allocation6 + $0x170] sm:$0xff]  }
0x1008   :  { %5574 = vmatprep.subr.bf16.mxu1 %v6099_v49 }
0x107a   :  { %v3728_v61 = vpop.xlane.xlu1 %3727 }
0x107b   :  { %v3735_v8 = vmul.f32 0.0078125, %v3728_v61 }
0x107c   :  { %v3730_v34 = vpop.xlane.xlu0 %3729 }
0x107d   :  { %v7710_v36 = vsub.f32 %v3723_v38, %v3735_v8  ;;  %v3736_v12 = vmul.f32 0.0078125, %v3730_v34 }
0x107e   :  { %v3732_v21 = vpop.xlane.xlu1 %3731 }
0x107f   :  { %v7712_v31 = vsub.f32 %v3724_v58, %v3736_v12  ;;  %v3737_v24 = vmul.f32 0.0078125, %v3732_v21  ;;  %v3743_v63 = vmul.f32 %v7710_v36, %v7710_v36  ;;  %v3782_v12 = vrot.slane %v7702_v28, %v8331_v50 }
0x1080   :  { %v3734_v6 = vpop.xlane.xlu0 %3733 }
0x1081   :  { %v7716_v37 = vsub.f32 %v3725_v15, %v3737_v24  ;;  %v3738_v18 = vmul.f32 0.0078125, %v3734_v6  ;;  %3747 = vadd.xlane.f32.xlu1 %v3743_v63  ;;  %v3744_v9 = vmul.f32 %v7712_v31, %v7712_v31 }
0x1083   :  { %v7720_v3 = vsub.f32 %v3726_v52, %v3738_v18  ;;  %3749 = vadd.xlane.f32.xlu0 %v3744_v9  ;;  %v3745_v27 = vmul.f32 %v7716_v37, %v7716_v37 }
0x1085   :  { %3751 = vadd.xlane.f32.xlu1 %v3745_v27  ;;  %v3746_v45 = vmul.f32 %v7720_v3, %v7720_v3 }
0x1087   :  { %3753 = vadd.xlane.f32.xlu0 %v3746_v45 }
0x110e   :  { %v3748_v51 = vpop.xlane.xlu1 %3747 }
0x110f   :  { %v3755_v38 = vmul.f32 0.0078125, %v3748_v51  ;;  %v6123_v51 = vld [vmem:[#allocation6 + $0x1f0] sm:$0xff]  }
0x1110   :  { %v3750_v54 = vpop.xlane.xlu0 %3749 }
0x1111   :  { %v3759_v44 = vadd.f32 1e-12, %v3755_v38  ;;  %v3756_v58 = vmul.f32 0.0078125, %v3750_v54  ;;  %v6124_v38 = vld [vmem:[#allocation6 + $0x130] sm:$0xff]  }
0x1112   :  { %v3752_v15 = vpop.xlane.xlu1 %3751  ;;  %v6125_v54 = vld [vmem:[#allocation6 + $0x1b0] sm:$0xff]  }
0x1113   :  { %6346 = vrsqrt.f32 %v3759_v44  ;;  %v3760_v52 = vadd.f32 1e-12, %v3756_v58  ;;  %v3757_v59 = vmul.f32 0.0078125, %v3752_v15  ;;  %v5350_v44 = vld [vmem:[%s8251_s5 + $0x4] sm:$0xf]  ;;  %v6126_v58 = vld [vmem:[#allocation6 + $0x178] sm:$0xff]  }
0x1114   :  { %v3754_v26 = vpop.xlane.xlu0 %3753  ;;  %v6127_v15 = vld [vmem:[#allocation6 + $0x1f8] sm:$0xff]  }
0x1115   :  { %6348 = vrsqrt.f32 %v3760_v52  ;;  %v3761_v14 = vadd.f32 1e-12, %v3757_v59  ;;  %v3758_v46 = vmul.f32 0.0078125, %v3754_v26  ;;  %v6128_v52 = vld [vmem:[#allocation6 + $0x138] sm:$0xff]   ;;  %v7752_v26 = vrot.slane %v5350_v44, %v8330_v39 }
0x1116   :  { %v6129_v59 = vld [vmem:[#allocation6 + $0x1b8] sm:$0xff]  }
0x1117   :  { %6350 = vrsqrt.f32 %v3761_v14  ;;  %v3762_v4 = vadd.f32 1e-12, %v3758_v46  ;;  %v7755_v14 = vrot.slane %v5350_v44, %v8331_v50  ;;  %v7758_v46 = vrot.slane %v5350_v44, %v8332_v1 }
0x1119   :  { %6352 = vrsqrt.f32 %v3762_v4  ;;  %v7761_v4 = vrot.slane %v5350_v44, %v8328_v48 }
0x111d   :  { %v6347_v53 = vpop.eup %6346 }
0x111e   :  { %v3767_v55 = vmul.f32 %v6347_v53, %v7710_v36 }
0x111f   :  { %v6349_v61 = vpop.eup %6348 }
0x1120   :  { %v3768_v8 = vmul.f32 %v6349_v61, %v7712_v31  ;;  %v3775_v34 = vmul.f32 %v3774_v17, %v3767_v55 }
0x1121   :  { %v6351_v21 = vpop.eup %6350 }
0x1122   :  { %v3776_v24 = vmul.f32 %v3774_v17, %v3768_v8  ;;  %v7732_v6 = vadd.f32 %v3782_v12, %v3775_v34  ;;  %v3769_v9 = vmul.f32 %v6351_v21, %v7716_v37 }
0x1123   :  { %v6353_v63 = vpop.eup %6352 }
0x1124   :  { %8337 = vst [vmem:[#allocation25_spill] sm:$0xff] %v7732_v6  ;;  %v7734_v18 = vadd.f32 %v3782_v12, %v3776_v24  ;;  %v3770_v27 = vmul.f32 %v6353_v63, %v7720_v3  ;;  %v3777_v31 = vmul.f32 %v3774_v17, %v3769_v9  ;;  %v6098_v3 = vld [vmem:[#allocation6 + $0x140] sm:$0xff]  }
0x1125   :  { %5546 = vmatprep.subr.bf16.mxu0 %v6098_v3 }
0x1126   :  { %8338 = vst [vmem:[#allocation26_spill] sm:$0xff] %v7734_v18  ;;  %v3787_v36 = vpack.c.bf16 %v7734_v18, %v7732_v6  ;;  %v3778_v45 = vmul.f32 %v3774_v17, %v3770_v27  ;;  %v7744_v60 = vadd.f32 %v3782_v12, %v3777_v31 }
0x1128   :  { %4038 = vmatmul.mubr.bf16.vlgmr.msra.gmra.mrb[68].mxu0 %v3787_v36  ;;  %4091 = vmatmul.mubr.bf16.vlgmr.msra.gmra.mrb[60].mxu1 %v3787_v36  ;;  %v7742_v28 = vadd.f32 %v3782_v12, %v3778_v45  ;;  %8340 = vst [vmem:[#allocation22_spill] sm:$0xff] %v7744_v60 }
0x1129   :  { %4047 = vmatprep.mubr.bf16.mxu0 %v8322_v10  ;;  %4100 = vmatprep.mubr.bf16.mxu1 %v8322_v10  ;;  %v6104_v10 = vld [vmem:[#allocation6 + $0x108] sm:$0xff]  }
0x112a   :  { %8339 = vst [vmem:[#allocation21_spill] sm:$0xff] %v7742_v28  ;;  %v3788_v37 = vpack.c.bf16 %v7742_v28, %v7744_v60  ;;  %5547 = vmatpush3.bf16.msra.mxu0 %v6100_v33  ;;  %5575 = vmatpush3.bf16.msra.mxu1 %v6101_v35 }
0x112b   :  { %5548 = vmatprep.subr.bf16.mxu0 %v6102_v32  ;;  %5576 = vmatprep.subr.bf16.mxu1 %v6103_v41 }
0x112e   :  { %5549 = vmatpush3.bf16.msra.mxu0 %v6104_v10  ;;  %5577 = vmatpush3.bf16.msra.mxu1 %v6105_v13 }
0x112f   :  { %5550 = vmatprep.subr.bf16.mxu0 %v6106_v40  ;;  %5578 = vmatprep.subr.bf16.mxu1 %v6107_v11 }
0x1130   :  { %4048 = vmatmul.mubr.bf16.gmra.mrb[72].mxu0 %v3788_v37  ;;  %4101 = vmatmul.mubr.bf16.gmra.mrb[64].mxu1 %v3788_v37 }
0x1132   :  { %5551 = vmatpush3.bf16.msra.mxu0 %v6108_v56  ;;  %5579 = vmatpush3.bf16.msra.mxu1 %v6109_v7 }
0x1133   :  { %5552 = vmatprep.subr.bf16.mxu0 %v6110_v22  ;;  %5580 = vmatprep.subr.bf16.mxu1 %v6111_v16 }
0x1136   :  { %5553 = vmatpush3.bf16.msra.mxu0 %v6112_v30  ;;  %5581 = vmatpush3.bf16.msra.mxu1 %v6113_v20 }
0x1137   :  { %5554 = vmatprep.subr.bf16.mxu0 %v6114_v62  ;;  %5582 = vmatprep.subr.bf16.mxu1 %v6115_v42 }
0x113a   :  { %5555 = vmatpush3.bf16.msra.mxu0 %v6116_v5  ;;  %5583 = vmatpush3.bf16.msra.mxu1 %v6117_v47 }
0x113b   :  { %5556 = vmatprep.subr.bf16.mxu0 %v6118_v0  ;;  %5584 = vmatprep.subr.bf16.mxu1 %v6119_v43 }
0x113e   :  { %5557 = vmatpush3.bf16.msra.mxu0 %v6120_v23  ;;  %5585 = vmatpush3.bf16.msra.mxu1 %v6121_v19 }
0x113f   :  { %5558 = vmatprep.subr.bf16.mxu0 %v6122_v2  ;;  %5586 = vmatprep.subr.bf16.mxu1 %v6123_v51 }
0x1142   :  { %5559 = vmatpush3.bf16.msra.mxu0 %v6124_v38  ;;  %5587 = vmatpush3.bf16.msra.mxu1 %v6125_v54 }
0x1143   :  { %5560 = vmatprep.subr.bf16.mxu0 %v6126_v58  ;;  %5588 = vmatprep.subr.bf16.mxu1 %v6127_v15 }
0x1146   :  { %5561 = vmatpush3.bf16.msra.mxu0 %v6128_v52  ;;  %5589 = vmatpush3.bf16.msra.mxu1 %v6129_v59 }
0x11fb   :  { %v4039_v17 = vpop.f32.mrb[68].mxu0  ;;  %v4092_v53 = vpop.f32.mrb[60].mxu1 }
0x11fc   :  { %v4040_v55 = vadd.f32 %v4039_v17, %v7752_v26  ;;  %v7765_v61 = vadd.f32 %v4092_v53, %v7755_v14  ;;  %v4041_v39 = vpop.f32.mrb[69].mxu0  ;;  %v4094_v8 = vpop.f32.mrb[61].mxu1 }
0x11fd   :  { %v7768_v50 = vadd.f32 %v4041_v39, %v7758_v46  ;;  %v7771_v34 = vadd.f32 %v4094_v8, %v7761_v4  ;;  %v4043_v1 = vpop.f32.mrb[70].mxu0  ;;  %v4096_v12 = vpop.f32.mrb[62].mxu1 }
0x11fe   :  { %v7773_v21 = vmul.f32 0.70710677, %v4040_v55  ;;  %v7776_v24 = vmul.f32 0.70710677, %v7765_v61  ;;  %v4045_v31 = vpop.f32.mrb[71].mxu0  ;;  %v4098_v33 = vpop.f32.mrb[63].mxu1  ;;  %v7802_v7 = vadd.f32 %v4043_v1, %v7752_v26  ;;  %v7815_v42 = vadd.f32 %v4096_v12, %v7755_v14 }
0x11ff   :  { %v7779_v63 = vmul.f32 0.70710677, %v7768_v50  ;;  %v7787_v45 = vmul.f32 0.70710677, %v7771_v34  ;;  %v7820_v0 = vadd.f32 %v4045_v31, %v7758_v46  ;;  %v7831_v44 = vadd.f32 %v4098_v33, %v7761_v4 }
0x1200   :  { %v4175_v9 = vand.u32 2147483647, %v7773_v21  ;;  %v4177_v27 = vand.u32 2147483647, %v7776_v24  ;;  %v7812_v62 = vmul.f32 0.70710677, %v7802_v7 }
0x1201   :  { %v7784_v36 = vand.u32 2147483647, %v7779_v63  ;;  %v7795_v13 = vand.u32 2147483647, %v7787_v45  ;;  %v7824_v23 = vmul.f32 0.70710677, %v7815_v42 }
0x1202   :  { %v4191_v37 = vmul.f32 0.3275911, %v4175_v9  ;;  %v4193_v3 = vmul.f32 0.3275911, %v4177_v27  ;;  %v4179_v43 = vand.u32 2147483647, %v7812_v62 }
0x1203   :  { %v4192_v49 = vmul.f32 0.3275911, %v7784_v36  ;;  %v7790_v41 = vpop.f32.mrb[72].mxu0  ;;  %v7792_v10 = vpop.f32.mrb[64].mxu1  ;;  %v4194_v30 = vmul.f32 0.3275911, %v7795_v13 }
0x1204   :  { %v4207_v35 = vadd.f32 1.0, %v4191_v37  ;;  %v4209_v32 = vadd.f32 1.0, %v4193_v3  ;;  %v7797_v40 = vpop.f32.mrb[73].mxu0  ;;  %v7799_v11 = vpop.f32.mrb[65].mxu1  ;;  %v4399_v19 = vsub.f32 0.0, %v4175_v9  ;;  %v4401_v58 = vsub.f32 0.0, %v4177_v27 }
0x1205   :  { %v4208_v56 = vadd.f32 1.0, %v4192_v49  ;;  %v7804_v22 = vpop.f32.mrb[74].mxu0  ;;  %v7806_v16 = vpop.f32.mrb[66].mxu1  ;;  %v4210_v47 = vadd.f32 1.0, %v4194_v30  ;;  %v4195_v2 = vmul.f32 0.3275911, %v4179_v43 }
0x1206   :  { %6354 = vrcp.f32 %v4207_v35  ;;  %v7809_v20 = vpop.f32.mrb[75].mxu0  ;;  %v7817_v5 = vpop.f32.mrb[67].mxu1  ;;  %v4181_v51 = vand.u32 2147483647, %v7824_v23  ;;  %v7828_v38 = vmul.f32 0.70710677, %v7820_v0  ;;  %v4415_v17 = vmul.f32 %v4399_v19, %v4175_v9 }
0x1207   :  { %6356 = vrcp.f32 %v4209_v32  ;;  %v4211_v54 = vadd.f32 1.0, %v4195_v2  ;;  %v7840_v39 = vmul.f32 0.5, %v4040_v55  ;;  %vm4143_vm6 = vcmp.ge.f32.partialorder %v7773_v21, 0.0 }
0x1208   :  { %6358 = vrcp.f32 %v4208_v56  ;;  %v4197_v15 = vmul.f32 0.3275911, %v4181_v51  ;;  %v7834_v52 = vand.u32 2147483647, %v7828_v38  ;;  %v4400_v37 = vsub.f32 0.0, %v7784_v36 }
0x1209   :  { %6360 = vrcp.f32 %v4210_v47  ;;  %v7848_v3 = vmul.f32 0.70710677, %v7831_v44  ;;  %v4417_v49 = vmul.f32 %v4401_v58, %v4177_v27  ;;  %v4431_v35 = vmul.f32 1.442695, %v4415_v17 }
0x120a   :  { %6362 = vrcp.f32 %v4211_v54  ;;  %v4213_v1 = vadd.f32 1.0, %v4197_v15  ;;  %v4196_v12 = vmul.f32 0.3275911, %v7834_v52  ;;  %v7856_v21 = vsel %vm4143_vm6, 1.0, %v8317_v57 }
0x120b   :  { %v7853_v56 = vand.u32 2147483647, %v7848_v3  ;;  %vm4145_vm7 = vcmp.ge.f32.partialorder %v7776_v24, 0.0  ;;  %v4403_v19 = vsub.f32 0.0, %v4179_v43  ;;  %v4435_v15 = vmul.f32 1.442695, %v4417_v49 }
0x120c   :  { %6364 = vrcp.f32 %v4213_v1  ;;  %v4212_v33 = vadd.f32 1.0, %v4196_v12  ;;  %v4416_v17 = vmul.f32 %v4400_v37, %v7784_v36  ;;  %v4405_v12 = vsub.f32 0.0, %v4181_v51 }
0x120d   :  { %v4198_v2 = vmul.f32 0.3275911, %v7853_v56  ;;  %vm4147_vm8 = vcmp.ge.f32.partialorder %v7812_v62, 0.0  ;;  %vm4149_vm9 = vcmp.ge.f32.partialorder %v7824_v23, 0.0  ;;  %vm4144_vm10 = vcmp.ge.f32.partialorder %v7779_v63, 0.0 }
0x120e   :  { %6366 = vrcp.f32 %v4212_v33  ;;  %v7871_v33 = vsel %vm4145_vm7, 1.0, %v8317_v57  ;;  %vm4148_vm11 = vcmp.ge.f32.partialorder %v7828_v38, 0.0  ;;  %v8007_v63 = vmul.f32 0.5, %v7771_v34 }
0x120f   :  { %6368 = vpow2.f32 %v4431_v35  ;;  %v4419_v35 = vmul.f32 %v4403_v19, %v4179_v43  ;;  %vm4150_vm12 = vcmp.ge.f32.partialorder %v7848_v3, 0.0  ;;  %vm4146_vm13 = vcmp.ge.f32.partialorder %v7787_v45, 0.0 }
0x1210   :  { %v7836_v59 = vpop.eup %6354  ;;  %vm6517_vm7 = vmmov 0  }
0x1211   :  { %v7838_v53 = vpop.eup %6356  ;;  %v4255_v8 = vmul.f32 1.0614054, %v7836_v59 }
0x1212   :  { %v4257_v31 = vmul.f32 1.0614054, %v7838_v53  ;;  %v7850_v55 = vpop.eup %6358 }
0x1213   :  { %v4271_v9 = vadd.f32 -1.4531521, %v4255_v8  ;;  %v4256_v47 = vmul.f32 1.0614054, %v7850_v55  ;;  %v7863_v54 = vpop.eup %6360  ;;  %v4402_v8 = vsub.f32 0.0, %v7795_v13 }
0x1214   :  { %v4273_v32 = vadd.f32 -1.4531521, %v4257_v31  ;;  %v4214_v31 = vadd.f32 1.0, %v4198_v2  ;;  %v7877_v49 = vpop.eup %6362  ;;  %v4258_v37 = vmul.f32 1.0614054, %v7863_v54 }
0x1215   :  { %v4287_v30 = vmul.f32 %v7836_v59, %v4271_v9  ;;  %v4433_v2 = vmul.f32 1.442695, %v4416_v17  ;;  %v4259_v24 = vmul.f32 1.0614054, %v7877_v49 }
0x1216   :  { %v4289_v27 = vmul.f32 %v7838_v53, %v4273_v32  ;;  %v4272_v32 = vadd.f32 -1.4531521, %v4256_v47  ;;  %6370 = vrcp.f32 %v4214_v31  ;;  %v7884_v47 = vmul.f32 0.5, %v7802_v7  ;;  %v7886_v48 = vpop.eup %6364 }
0x1217   :  { %v4303_v58 = vadd.f32 1.4214138, %v4287_v30  ;;  %v7875_v30 = vadd.f32 %v7790_v41, %v7752_v26  ;;  %6372 = vpow2.f32 %v4435_v15  ;;  %v4421_v41 = vmul.f32 %v4405_v12, %v4181_v51 }
0x1218   :  { %v4305_v1 = vadd.f32 1.4214138, %v4289_v27  ;;  %v4288_v28 = vmul.f32 %v7850_v55, %v4272_v32  ;;  %v4275_v43 = vadd.f32 -1.4531521, %v4259_v24  ;;  %v4274_v17 = vadd.f32 -1.4531521, %v4258_v37  ;;  %v7897_v12 = vpop.eup %6366 }
0x1219   :  { %v4319_v9 = vmul.f32 %v7836_v59, %v4303_v58  ;;  %8341 = vst [vmem:[#allocation24_spill] sm:$0xff] %v7875_v30  ;;  %v4418_v58 = vmul.f32 %v4402_v8, %v7795_v13  ;;  %v7891_v19 = vmul.f32 0.70710677, %v7875_v30  ;;  %v4439_v8 = vmul.f32 1.442695, %v4419_v35  ;;  %v6369_v37 = vpop.eup %6368 }
0x121a   :  { %v4321_v36 = vmul.f32 %v7838_v53, %v4305_v1  ;;  %v4261_v15 = vmul.f32 1.0614054, %v7886_v48  ;;  %v4291_v51 = vmul.f32 %v7877_v49, %v4275_v43  ;;  %v4304_v24 = vadd.f32 1.4214138, %v4288_v28 }
0x121b   :  { %v4335_v27 = vadd.f32 -0.28449672, %v4319_v9  ;;  %8342 = vst [vmem:[#allocation23_spill] sm:$0xff] %v7891_v19  ;;  %v4437_v7 = vmul.f32 1.442695, %v4418_v58  ;;  %v4290_v35 = vmul.f32 %v7863_v54, %v4274_v17  ;;  %6374 = vpow2.f32 %v4439_v8 }
0x121c   :  { %v4337_v25 = vadd.f32 -0.28449672, %v4321_v36  ;;  %v4277_v32 = vadd.f32 -1.4531521, %v4261_v15  ;;  %v4443_v36 = vmul.f32 1.442695, %v4421_v41  ;;  %v4320_v8 = vmul.f32 %v7850_v55, %v4304_v24 }
0x121d   :  { %v4351_v1 = vmul.f32 %v7836_v59, %v4335_v27  ;;  %v4307_v60 = vadd.f32 1.4214138, %v4291_v51  ;;  %v4163_v15 = vsel %vm4147_vm8, 1.0, %v8317_v57 }
0x121e   :  { %v4353_v13 = vmul.f32 %v7838_v53, %v4337_v25  ;;  %v7901_v25 = vand.u32 2147483647, %v7891_v19  ;;  %v4293_v58 = vmul.f32 %v7886_v48, %v4277_v32  ;;  %6376 = vpow2.f32 %v4443_v36 }
0x121f   :  { %v4367_v31 = vadd.f32 0.2548296, %v4351_v1  ;;  %v4260_v1 = vmul.f32 1.0614054, %v7897_v12  ;;  %v4323_v41 = vmul.f32 %v7877_v49, %v4307_v60  ;;  %v4406_v32 = vsub.f32 0.0, %v7853_v56 }
0x1220   :  { %v4369_v9 = vadd.f32 0.2548296, %v4353_v13  ;;  %v7909_v28 = vpop.eup %6370  ;;  %v4306_v60 = vadd.f32 1.4214138, %v4290_v35  ;;  %6378 = vpow2.f32 %v4433_v2  ;;  %v4336_v29 = vadd.f32 -0.28449672, %v4320_v8 }
0x1221   :  { %v4383_v27 = vmul.f32 %v7836_v59, %v4367_v31  ;;  %v4404_v59 = vsub.f32 0.0, %v7834_v52  ;;  %v4309_v31 = vadd.f32 1.4214138, %v4293_v58  ;;  %v4276_v17 = vadd.f32 -1.4531521, %v4260_v1 }
0x1222   :  { %v4385_v13 = vmul.f32 %v7838_v53, %v4369_v9  ;;  %v4339_v51 = vadd.f32 -0.28449672, %v4323_v41  ;;  %v4199_v53 = vmul.f32 0.3275911, %v7901_v25  ;;  %v6373_v9 = vpop.eup %6372  ;;  %v4262_v18 = vmul.f32 1.0614054, %v7909_v28 }
0x1223   :  { %v4463_v43 = vmul.f32 %v6369_v37, %v4383_v27  ;;  %v4325_v27 = vmul.f32 %v7886_v48, %v4309_v31  ;;  %v4292_v37 = vmul.f32 %v7897_v12, %v4276_v17  ;;  %v4420_v58 = vmul.f32 %v4404_v59, %v7834_v52 }
0x1224   :  { %v4465_v6 = vmul.f32 %v6373_v9, %v4385_v13  ;;  %v4355_v36 = vmul.f32 %v7877_v49, %v4339_v51  ;;  %v4278_v41 = vadd.f32 -1.4531521, %v4262_v18  ;;  %v4422_v35 = vmul.f32 %v4406_v32, %v7853_v56 }
0x1225   :  { %v4479_v62 = vsub.f32 1.0, %v4463_v43  ;;  %v4341_v24 = vadd.f32 -0.28449672, %v4325_v27  ;;  %v4308_v1 = vadd.f32 1.4214138, %v4292_v37  ;;  %v4215_v30 = vadd.f32 1.0, %v4199_v53  ;;  %v6375_v59 = vpop.eup %6374 }
0x1226   :  { %v4371_v19 = vadd.f32 0.2548296, %v4355_v36  ;;  %v4322_v31 = vmul.f32 %v7863_v54, %v4306_v60  ;;  %v4294_v13 = vmul.f32 %v7909_v28, %v4278_v41  ;;  %v4481_v51 = vsub.f32 1.0, %v4465_v6 }
0x1227   :  { %v4357_v17 = vmul.f32 %v7886_v48, %v4341_v24  ;;  %v4324_v43 = vmul.f32 %v7897_v12, %v4308_v1  ;;  %6380 = vpow2.f32 %v4437_v7  ;;  %v4441_v2 = vmul.f32 1.442695, %v4420_v58 }
0x1228   :  { %v4387_v52 = vmul.f32 %v7877_v49, %v4371_v19  ;;  %v4495_v18 = vmul.f32 %v4479_v62, %v7856_v21  ;;  %v4310_v56 = vadd.f32 1.4214138, %v4294_v13  ;;  %v4445_v53 = vmul.f32 1.442695, %v4422_v35  ;;  %v6377_v27 = vpop.eup %6376 }
0x1229   :  { %v4373_v8 = vadd.f32 0.2548296, %v4357_v17  ;;  %v4340_v9 = vadd.f32 -0.28449672, %v4324_v43  ;;  %6382 = vrcp.f32 %v4215_v30  ;;  %v7931_v60 = vadd.f32 %v7792_v10, %v7755_v14 }
0x122a   :  { %v4467_v32 = vmul.f32 %v6375_v59, %v4387_v52  ;;  %v4352_v6 = vmul.f32 %v7850_v55, %v4336_v29  ;;  %v4338_v7 = vadd.f32 -0.28449672, %v4322_v31  ;;  %v4326_v19 = vmul.f32 %v7909_v28, %v4310_v56  ;;  %v6379_v24 = vpop.eup %6378 }
0x122b   :  { %v4389_v49 = vmul.f32 %v7886_v48, %v4373_v8  ;;  %v4356_v21 = vmul.f32 %v7897_v12, %v4340_v9  ;;  %6384 = vpow2.f32 %v4441_v2  ;;  %v4511_v62 = vadd.f32 1.0, %v4495_v18 }
0x122c   :  { %v4483_v37 = vsub.f32 1.0, %v4467_v32  ;;  %v4497_v30 = vmul.f32 %v4481_v51, %v7871_v33  ;;  %v4342_v10 = vadd.f32 -0.28449672, %v4326_v19  ;;  %6386 = vpow2.f32 %v4445_v53 }
0x122d   :  { %v4469_v36 = vmul.f32 %v6377_v27, %v4389_v49  ;;  %v7940_v29 = vmul.f32 0.70710677, %v7931_v60  ;;  %v7944_v48 = vadd.f32 %v7797_v40, %v7758_v46  ;;  %v4368_v1 = vadd.f32 0.2548296, %v4352_v6 }
0x122e   :  { %v4499_v58 = vmul.f32 %v4483_v37, %v4163_v15  ;;  %v4354_v41 = vmul.f32 %v7863_v54, %v4338_v7  ;;  %v4358_v31 = vmul.f32 %v7909_v28, %v4342_v10  ;;  %v4165_v33 = vsel %vm4149_vm9, 1.0, %v8317_v57 }
0x122f   :  { %v4485_v35 = vsub.f32 1.0, %v4469_v36  ;;  %v4372_v15 = vadd.f32 0.2548296, %v4356_v21  ;;  %v7952_v43 = vand.u32 2147483647, %v7940_v29  ;;  %v7955_v13 = vmul.f32 %v4511_v62, %v7840_v39 }
0x1230   :  { %v4515_v17 = vadd.f32 1.0, %v4499_v58  ;;  %v4113_v40 = vmul.f32 0.5, %v7765_v61  ;;  %v4513_v51 = vadd.f32 1.0, %v4497_v30  ;;  %v4374_v18 = vadd.f32 0.2548296, %v4358_v31 }
0x1231   :  { %v4501_v52 = vmul.f32 %v4485_v35, %v4165_v33  ;;  %v6381_v2 = vpop.eup %6380  ;;  %v4201_v8 = vmul.f32 0.3275911, %v7952_v43  ;;  %v7963_v23 = vmul.f32 0.70710677, %v7944_v48  ;;  %v4384_v9 = vmul.f32 %v7850_v55, %v4368_v1 }
0x1232   :  { %v7959_v59 = vmul.f32 %v4515_v17, %v7884_v47  ;;  %v4370_v56 = vadd.f32 0.2548296, %v4354_v41  ;;  %v4117_v39 = vmul.f32 0.5, %v7815_v42  ;;  %v4388_v47 = vmul.f32 %v7897_v12, %v4372_v15 }
0x1233   :  { %v4517_v32 = vadd.f32 1.0, %v4501_v52  ;;  %v7967_v53 = vpop.eup %6382  ;;  %v4217_v27 = vadd.f32 1.0, %v4201_v8  ;;  %v7972_v6 = vmul.f32 %v4513_v51, %v4113_v40  ;;  %v4390_v55 = vmul.f32 %v7909_v28, %v4374_v18 }
0x1234   :  { %v4543_v61 = vpack.c.bf16 %v7959_v59, %v7955_v13  ;;  %v4263_v49 = vmul.f32 1.0614054, %v7967_v53  ;;  %v7979_v42 = vand.u32 2147483647, %v7963_v23  ;;  %v7983_v37 = vadd.f32 %v7799_v11, %v7761_v4 }
0x1235   :  { %v7974_v7 = vmul.f32 %v4517_v32, %v4117_v39  ;;  %v6385_v19 = vpop.eup %6384  ;;  %6388 = vrcp.f32 %v4217_v27  ;;  %v4464_v21 = vmul.f32 %v6379_v24, %v4384_v9  ;;  %v4386_v12 = vmul.f32 %v7863_v54, %v4370_v56 }
0x1236   :  { %v6387_v30 = vpop.eup %6386  ;;  %v4468_v36 = vmul.f32 %v6385_v19, %v4388_v47  ;;  %v4200_v10 = vmul.f32 0.3275911, %v7979_v42  ;;  %v4112_v28 = vmul.f32 0.5, %v7768_v50  ;;  %v4279_v58 = vadd.f32 -1.4531521, %v4263_v49 }
0x1237   :  { %v4545_v62 = vpack.c.bf16 %v7974_v7, %v7972_v6  ;;  %v7992_v1 = vmul.f32 0.70710677, %v7983_v37  ;;  %v4470_v11 = vmul.f32 %v6387_v30, %v4390_v55  ;;  %v7996_v54 = vadd.f32 %v7804_v22, %v7752_v26 }
0x1238   :  { %v4216_v41 = vadd.f32 1.0, %v4200_v10  ;;  %v8000_v24 = vadd.f32 %v7806_v16, %v7755_v14  ;;  %v4480_v35 = vsub.f32 1.0, %v4464_v21  ;;  %v4466_v31 = vmul.f32 %v6381_v2, %v4386_v12 }
0x1239   :  { %v8004_v50 = vand.u32 2147483647, %v7992_v1  ;;  %v4484_v17 = vsub.f32 1.0, %v4468_v36  ;;  %v4160_v26 = vsel %vm4144_vm10, 1.0, %v8317_v57  ;;  %v4295_v14 = vmul.f32 %v7967_v53, %v4279_v58 }
0x123a   :  { %6390 = vrcp.f32 %v4216_v41  ;;  %v4164_v16 = vsel %vm4148_vm11, 1.0, %v8317_v57  ;;  %v4486_v38 = vsub.f32 1.0, %v4470_v11  ;;  %v8016_v33 = vmul.f32 0.70710677, %v7996_v54 }
0x123b   :  { %v4202_v22 = vmul.f32 0.3275911, %v8004_v50  ;;  %v8019_v34 = vmul.f32 0.70710677, %v8000_v24  ;;  %v4496_v15 = vmul.f32 %v4480_v35, %v4160_v26  ;;  %v4482_v3 = vsub.f32 1.0, %v4466_v31 }
0x123c   :  { %v4166_v40 = vsel %vm4150_vm12, 1.0, %v8317_v57  ;;  %v4500_v2 = vmul.f32 %v4484_v17, %v4164_v16  ;;  %v4407_v18 = vsub.f32 0.0, %v7901_v25  ;;  %v4187_v8 = vand.u32 2147483647, %v8016_v33 }
0x123d   :  { %v4218_v51 = vadd.f32 1.0, %v4202_v22  ;;  %v8027_v9 = vand.u32 2147483647, %v8019_v34  ;;  %v4311_v56 = vadd.f32 1.4214138, %v4295_v14  ;;  %v8032_v32 = vadd.f32 %v7809_v20, %v7758_v46 }
0x123e   :  { %v4162_v47 = vsel %vm4146_vm13, 1.0, %v8317_v57  ;;  %v4502_v27 = vmul.f32 %v4486_v38, %v4166_v40  ;;  %v4409_v49 = vsub.f32 0.0, %v7952_v43  ;;  %v4203_v19 = vmul.f32 0.3275911, %v4187_v8 }
0x123f   :  { %v8022_v52 = vpop.eup %6388  ;;  %6392 = vrcp.f32 %v4218_v51  ;;  %v4512_v55 = vadd.f32 1.0, %v4496_v15  ;;  %v4116_v21 = vmul.f32 0.5, %v7820_v0  ;;  %v4205_v30 = vmul.f32 0.3275911, %v8027_v9 }
0x1240   :  { %v4265_v39 = vmul.f32 1.0614054, %v8022_v52  ;;  %v4498_v36 = vmul.f32 %v4482_v3, %v4162_v47  ;;  %v4516_v10 = vadd.f32 1.0, %v4500_v2  ;;  %v4423_v58 = vmul.f32 %v4407_v18, %v7901_v25 }
0x1241   :  { %v4219_v46 = vadd.f32 1.0, %v4203_v19  ;;  %v4327_v20 = vmul.f32 %v7967_v53, %v4311_v56  ;;  %v4221_v11 = vadd.f32 1.0, %v4205_v30  ;;  %v8044_v41 = vmul.f32 0.70710677, %v8032_v32 }
0x1242   :  { %v4281_v12 = vadd.f32 -1.4531521, %v4265_v39  ;;  %v4518_v31 = vadd.f32 1.0, %v4502_v27  ;;  %v4425_v0 = vmul.f32 %v4409_v49, %v7952_v43  ;;  %v4408_v17 = vsub.f32 0.0, %v7979_v42 }
0x1243   :  { %6394 = vrcp.f32 %v4219_v46  ;;  %v8053_v14 = vadd.f32 %v7817_v5, %v7761_v4  ;;  %v4528_v22 = vmul.f32 %v4512_v55, %v4112_v28  ;;  %v4532_v16 = vmul.f32 %v4516_v10, %v4116_v21 }
0x1244   :  { %v4297_v45 = vmul.f32 %v8022_v52, %v4281_v12  ;;  %v8046_v35 = vpop.eup %6390  ;;  %6396 = vrcp.f32 %v4221_v11  ;;  %v4118_v38 = vmul.f32 0.5, %v7831_v44  ;;  %v8057_v15 = vand.u32 2147483647, %v8044_v41 }
0x1245   :  { %v4264_v25 = vmul.f32 1.0614054, %v8046_v35  ;;  %v4343_v3 = vadd.f32 -0.28449672, %v4327_v20  ;;  %v4447_v43 = vmul.f32 1.442695, %v4423_v58  ;;  %v4424_v44 = vmul.f32 %v4408_v17, %v7979_v42 }
0x1246   :  { %v4313_v26 = vadd.f32 1.4214138, %v4297_v45  ;;  %v4514_v2 = vadd.f32 1.0, %v4498_v36  ;;  %v4451_v18 = vmul.f32 1.442695, %v4425_v0  ;;  %v4411_v56 = vsub.f32 0.0, %v4187_v8 }
0x1247   :  { %v4280_v51 = vadd.f32 -1.4531521, %v4264_v25  ;;  %v4204_v39 = vmul.f32 0.3275911, %v8057_v15  ;;  %v4534_v4 = vmul.f32 %v4518_v31, %v4118_v38  ;;  %v8066_v28 = vmul.f32 0.70710677, %v8053_v14 }
0x1248   :  { %v4329_v40 = vmul.f32 %v8022_v52, %v4313_v26  ;;  %v4544_v55 = vpack.c.bf16 %v4532_v16, %v4528_v22  ;;  %v4359_v21 = vmul.f32 %v7967_v53, %v4343_v3  ;;  %6398 = vpow2.f32 %v4447_v43  ;;  %v8343_v43 = vld [vmem:[#allocation24_spill] sm:$0xff] }
0x1249   :  { %v8061_v47 = vpop.eup %6392  ;;  %v4296_v5 = vmul.f32 %v8046_v35, %v4280_v51  ;;  %v4220_v19 = vadd.f32 1.0, %v4204_v39  ;;  %v4413_v30 = vsub.f32 0.0, %v8027_v9  ;;  %v4530_v36 = vmul.f32 %v4514_v2, %v8007_v63 }
0x124a   :  { %v4345_v27 = vadd.f32 -0.28449672, %v4329_v40  ;;  %v4266_v49 = vmul.f32 1.0614054, %v8061_v47  ;;  %v4427_v58 = vmul.f32 %v4411_v56, %v4187_v8  ;;  %4844 = vmatprep.mubr.bf16.mxu0 %v4544_v55  ;;  %v4449_v46 = vmul.f32 1.442695, %v4424_v44 }
0x124b   :  { %v4312_v12 = vadd.f32 1.4214138, %v4296_v5  ;;  %6400 = vrcp.f32 %v4220_v19  ;;  %v8074_v20 = vand.u32 2147483647, %v8066_v28  ;;  %4845 = vmatmul.mubr.bf16.vlgmr.msra.gmra.mrb[76].mxu0 %v4543_v61  ;;  %v4410_v8 = vsub.f32 0.0, %v8004_v50 }
0x124c   :  { %v4282_v10 = vadd.f32 -1.4531521, %v4266_v49  ;;  %6402 = vpow2.f32 %v4451_v18  ;;  %v4361_v11 = vmul.f32 %v8022_v52, %v4345_v27  ;;  %v4546_v31 = vpack.c.bf16 %v4534_v4, %v4530_v36  ;;  %v8344_v4 = vld [vmem:[#allocation23_spill] sm:$0xff] }
0x124d   :  { %v4328_v42 = vmul.f32 %v8046_v35, %v4312_v12  ;;  %v8079_v45 = vpop.eup %6394  ;;  %v4375_v17 = vadd.f32 0.2548296, %v4359_v21  ;;  %v4429_v25 = vmul.f32 %v4413_v30, %v8027_v9  ;;  %v4206_v22 = vmul.f32 0.3275911, %v8074_v20 }
0x124e   :  { %v4298_v63 = vmul.f32 %v8061_v47, %v4282_v10  ;;  %v8084_v0 = vpop.eup %6396  ;;  %v4267_v26 = vmul.f32 1.0614054, %v8079_v45  ;;  %v4455_v59 = vmul.f32 1.442695, %v4427_v58  ;;  %4893 = vmatprep.mubr.bf16.mxu1 %v4546_v31  ;;  %v8094_v40 = vmul.f32 0.5, %v8343_v43 }
0x124f   :  { %v4269_v61 = vmul.f32 1.0614054, %v8084_v0  ;;  %v4344_v16 = vadd.f32 -0.28449672, %v4328_v42  ;;  %v4222_v3 = vadd.f32 1.0, %v4206_v22  ;;  %4894 = vmatmul.mubr.bf16.vlgmr.msra.gmra.mrb[68].mxu1 %v4545_v62  ;;  %v4412_v9 = vsub.f32 0.0, %v8057_v15 }
0x1250   :  { %v4314_v13 = vadd.f32 1.4214138, %v4298_v63  ;;  %v4283_v38 = vadd.f32 -1.4531521, %v4267_v26  ;;  %v4377_v51 = vadd.f32 0.2548296, %v4361_v11  ;;  %v4426_v18 = vmul.f32 %v4410_v8, %v8004_v50 }
0x1251   :  { %v4285_v2 = vadd.f32 -1.4531521, %v4269_v61  ;;  %v4459_v39 = vmul.f32 1.442695, %v4429_v25  ;;  %6404 = vrcp.f32 %v4222_v3  ;;  %vm4151_vm14 = vcmp.ge.f32.partialorder %v8344_v4, 0.0 }
0x1252   :  { %v4299_v56 = vmul.f32 %v8079_v45, %v4283_v38  ;;  %v4391_v5 = vmul.f32 %v7967_v53, %v4375_v17  ;;  %v4330_v6 = vmul.f32 %v8061_v47, %v4314_v13  ;;  %v6399_v62 = vpop.eup %6398  ;;  %vm4153_vm15 = vcmp.ge.f32.partialorder %v7940_v29, 0.0 }
0x1253   :  { %v4301_v7 = vmul.f32 %v8084_v0, %v4285_v2  ;;  %v4360_v44 = vmul.f32 %v8046_v35, %v4344_v16  ;;  %6406 = vpow2.f32 %v4449_v46  ;;  %v4393_v49 = vmul.f32 %v8022_v52, %v4377_v51 }
0x1254   :  { %v4315_v27 = vadd.f32 1.4214138, %v4299_v56  ;;  %6408 = vpow2.f32 %v4455_v59  ;;  %v4428_v55 = vmul.f32 %v4412_v9, %v8057_v15  ;;  %v4453_v21 = vmul.f32 1.442695, %v4426_v18 }
0x1255   :  { %v8105_v50 = vpop.eup %6400  ;;  %v4317_v19 = vadd.f32 1.4214138, %v4301_v7  ;;  %6410 = vpow2.f32 %v4459_v39  ;;  %v4471_v36 = vmul.f32 %v6399_v62, %v4391_v5  ;;  %v4346_v10 = vadd.f32 -0.28449672, %v4330_v6 }
0x1256   :  { %v6403_v53 = vpop.eup %6402  ;;  %v4331_v12 = vmul.f32 %v8079_v45, %v4315_v27  ;;  %v4268_v30 = vmul.f32 1.0614054, %v8105_v50  ;;  %v4414_v42 = vsub.f32 0.0, %v8074_v20  ;;  %v4376_v46 = vadd.f32 0.2548296, %v4360_v44 }
0x1257   :  { %v4333_v58 = vmul.f32 %v8084_v0, %v4317_v19  ;;  %v4167_v15 = vsel %vm4151_vm14, 1.0, %v8317_v57  ;;  %v4473_v63 = vmul.f32 %v6403_v53, %v4393_v49  ;;  %v4457_v31 = vmul.f32 1.442695, %v4428_v55 }
0x1258   :  { %v4347_v11 = vadd.f32 -0.28449672, %v4331_v12  ;;  %v4284_v52 = vadd.f32 -1.4531521, %v4268_v30  ;;  %v8117_v17 = vmul.f32 0.5, %v7931_v60  ;;  %v4169_v26 = vsel %vm4153_vm15, 1.0, %v8317_v57 }
0x1259   :  { %v4349_v8 = vadd.f32 -0.28449672, %v4333_v58  ;;  %v4487_v13 = vsub.f32 1.0, %v4471_v36  ;;  %v4362_v59 = vmul.f32 %v8061_v47, %v4346_v10  ;;  %6412 = vpow2.f32 %v4453_v21 }
0x125a   :  { %v4363_v25 = vmul.f32 %v8079_v45, %v4347_v11  ;;  %v4300_v22 = vmul.f32 %v8105_v50, %v4284_v52  ;;  %v4392_v38 = vmul.f32 %v8046_v35, %v4376_v46  ;;  %v4430_v43 = vmul.f32 %v4414_v42, %v8074_v20 }
0x125b   :  { %v4365_v61 = vmul.f32 %v8084_v0, %v4349_v8  ;;  %v8126_v16 = vpop.eup %6404  ;;  %v4489_v29 = vsub.f32 1.0, %v4473_v63  ;;  %6414 = vpow2.f32 %v4457_v31  ;;  %vm4155_vm1 = vcmp.ge.f32.partialorder %v8016_v33, 0.0 }
0x125c   :  { %v4379_v60 = vadd.f32 0.2548296, %v4363_v25  ;;  %v4316_v3 = vadd.f32 1.4214138, %v4300_v22  ;;  %v4270_v2 = vmul.f32 1.0614054, %v8126_v16  ;;  %v4503_v35 = vmul.f32 %v4487_v13, %v4167_v15 }
0x125d   :  { %v4381_v51 = vadd.f32 0.2548296, %v4365_v61  ;;  %v6407_v9 = vpop.eup %6406  ;;  %vm4157_vm2 = vcmp.ge.f32.partialorder %v8019_v34, 0.0  ;;  %v4378_v4 = vadd.f32 0.2548296, %v4362_v59  ;;  %v4505_v49 = vmul.f32 %v4489_v29, %v4169_v26 }
0x125e   :  { %v4395_v18 = vmul.f32 %v8079_v45, %v4379_v60  ;;  %v4332_v56 = vmul.f32 %v8105_v50, %v4316_v3  ;;  %v6409_v39 = vpop.eup %6408  ;;  %v4286_v20 = vadd.f32 -1.4531521, %v4270_v2  ;;  %v4472_v7 = vmul.f32 %v6407_v9, %v4392_v38 }
0x125f   :  { %v4397_v5 = vmul.f32 %v8084_v0, %v4381_v51  ;;  %v6411_v6 = vpop.eup %6410  ;;  %v4461_v27 = vmul.f32 1.442695, %v4430_v43  ;;  %vm4152_vm3 = vcmp.ge.f32.partialorder %v7963_v23, 0.0  ;;  %v4171_v55 = vsel %vm4155_vm1, 1.0, %v8317_v57 }
0x1260   :  { %v4475_v62 = vmul.f32 %v6409_v39, %v4395_v18  ;;  %v4348_v44 = vadd.f32 -0.28449672, %v4332_v56  ;;  %v4302_v45 = vmul.f32 %v8126_v16, %v4286_v20  ;;  %v4173_v0 = vsel %vm4157_vm2, 1.0, %v8317_v57 }
0x1261   :  { %v4477_v19 = vmul.f32 %v6411_v6, %v4397_v5  ;;  %v4519_v12 = vadd.f32 1.0, %v4503_v35  ;;  %v4394_v30 = vmul.f32 %v8061_v47, %v4378_v4  ;;  %v4488_v58 = vsub.f32 1.0, %v4472_v7 }
0x1262   :  { %v4491_v53 = vsub.f32 1.0, %v4475_v62  ;;  %v4364_v21 = vmul.f32 %v8105_v50, %v4348_v44  ;;  %v4318_v10 = vadd.f32 1.4214138, %v4302_v45  ;;  %6416 = vpow2.f32 %v4461_v27 }
0x1263   :  { %v4493_v36 = vsub.f32 1.0, %v4477_v19  ;;  %v6413_v11 = vpop.eup %6412  ;;  %v4521_v52 = vadd.f32 1.0, %v4505_v49  ;;  %v4168_v33 = vsel %vm4152_vm3, 1.0, %v8317_v57  ;;  %v4123_v63 = vmul.f32 0.5, %v7996_v54 }
0x1264   :  { %v4507_v42 = vmul.f32 %v4491_v53, %v4171_v55  ;;  %v4380_v46 = vadd.f32 0.2548296, %v4364_v21  ;;  %v4334_v34 = vmul.f32 %v8126_v16, %v4318_v10  ;;  %v4125_v47 = vmul.f32 0.5, %v8000_v24  ;;  %v8345_v55 = vld [vmem:[#allocation15_spill] sm:$0xff] }
0x1265   :  { %v4509_v15 = vmul.f32 %v4493_v36, %v4173_v0  ;;  %v6415_v26 = vpop.eup %6414  ;;  %v4474_v25 = vmul.f32 %v6413_v11, %v4394_v30  ;;  %vm4156_vm4 = vcmp.ge.f32.partialorder %v8044_v41, 0.0  ;;  %v4535_v59 = vmul.f32 %v4519_v12, %v8094_v40 }
0x1266   :  { %v4523_v8 = vadd.f32 1.0, %v4507_v42  ;;  %v4396_v31 = vmul.f32 %v8105_v50, %v4380_v46  ;;  %v4350_v13 = vadd.f32 -0.28449672, %v4334_v34  ;;  %v4504_v23 = vmul.f32 %v4488_v58, %v4168_v33  ;;  %v8346_v34 = vld [vmem:[#allocation25_spill] sm:$0xff] }
0x1267   :  { %v4525_v22 = vadd.f32 1.0, %v4509_v15  ;;  %v4537_v60 = vmul.f32 %v4521_v52, %v8117_v17  ;;  %vm4154_vm5 = vcmp.ge.f32.partialorder %v7992_v1, 0.0  ;;  %v4490_v43 = vsub.f32 1.0, %v4474_v25 }
0x1268   :  { %v4539_v61 = vmul.f32 %v4523_v8, %v4123_v63  ;;  %v4476_v38 = vmul.f32 %v6415_v26, %v4396_v31  ;;  %v4366_v54 = vmul.f32 %v8126_v16, %v4350_v13  ;;  %v4172_v29 = vsel %vm4156_vm4, 1.0, %v8317_v57  ;;  %v8347_v8 = vld [vmem:[#allocation26_spill] sm:$0xff] }
0x1269   :  { %v4541_v3 = vmul.f32 %v4525_v22, %v4125_v47  ;;  %v4520_v2 = vadd.f32 1.0, %v4504_v23  ;;  %v4120_v56 = vmul.f32 0.5, %v7944_v48  ;;  %v4170_v17 = vsel %vm4154_vm5, 1.0, %v8317_v57 }
0x126a   :  { %v4492_v24 = vsub.f32 1.0, %v4476_v38  ;;  %v4547_v50 = vpack.c.bf16 %v4539_v61, %v4535_v59  ;;  %v4382_v51 = vadd.f32 0.2548296, %v4366_v54  ;;  %v4124_v39 = vmul.f32 0.5, %v8032_v32 }
0x126b   :  { %v4549_v41 = vpack.c.bf16 %v4541_v3, %v4537_v60  ;;  %v4506_v1 = vmul.f32 %v4490_v43, %v4170_v17  ;;  %vm4158_vm6 = vcmp.ge.f32.partialorder %v8066_v28, 0.0  ;;  %v4536_v5 = vmul.f32 %v4520_v2, %v4120_v56  ;;  %v8349_v2 = vld [vmem:[#allocation21_spill] sm:$0xff] }
0x126c   :  { %v4508_v9 = vmul.f32 %v4492_v24, %v4172_v29  ;;  %v4398_v40 = vmul.f32 %v8126_v16, %v4382_v51  ;;  %v6417_v18 = vpop.eup %6416  ;;  %v4174_v7 = vsel %vm4158_vm6, 1.0, %v8317_v57  ;;  %v4122_v48 = vmul.f32 0.5, %v7983_v37  ;;  %v8170_v57 = vld [vmem:[%s8249_s3 + $0x8] sm:$0x3f] }
0x126d   :  { %v4522_v44 = vadd.f32 1.0, %v4506_v1  ;;  %v4126_v27 = vmul.f32 0.5, %v8053_v14  ;;  %v4619_v53 = vrot.slane %v8170_v57, %v8345_v55  ;;  %v8348_v51 = vld [vmem:[#allocation22_spill] sm:$0xff] }
0x126e   :  { %v4524_v35 = vadd.f32 1.0, %v4508_v9  ;;  %v4478_v4 = vmul.f32 %v6417_v18, %v4398_v40  ;;  %v6135_v55 = vld [vmem:[%s8253_s7 + $0x28] sm:$0xff]  }
0x126f   :  { %v4538_v32 = vmul.f32 %v4522_v44, %v4122_v48 }
0x1270   :  { %v4540_v20 = vmul.f32 %v4524_v35, %v4124_v39  ;;  %v4494_v6 = vsub.f32 1.0, %v4478_v4 }
0x1272   :  { %v4548_v62 = vpack.c.bf16 %v4540_v20, %v4536_v5  ;;  %v4510_v16 = vmul.f32 %v4494_v6, %v4174_v7 }
0x1274   :  { %4852 = vmatprep.mubr.bf16.mxu0 %v4548_v62  ;;  %v4526_v49 = vadd.f32 1.0, %v4510_v16 }
0x1275   :  { %4853 = vmatmul.mubr.bf16.gmra.mrb[80].mxu0 %v4547_v50 }
0x1276   :  { %v4542_v19 = vmul.f32 %v4526_v49, %v4126_v27  ;;  %v6516_v27 = vmov 0.0   ;;  %v6130_v49 = vld [vmem:[%s8253_s7] sm:$0xff]  }
0x1277   :  { %5742 = vmatprep.subr.bf16.mxu0 %v6516_v27  ;;  %5750 = vmatprep.subr.bf16.mxu1 %v6516_v27 }
0x1278   :  { %v4550_v45 = vpack.c.bf16 %v4542_v19, %v4538_v32  ;;  %5746 = vmatprep.mubr.msk.bf16.mxu0 %vm6517_vm7, %v6516_v27  ;;  %5751 = vmatpush3.bf16.msra.mxu1 %v6130_v49  ;;  %v6131_v32 = vld [vmem:[%s8253_s7 + $0x8] sm:$0xff]   ;;  %v6132_v19 = vld [vmem:[%s8253_s7 + $0x10] sm:$0xff]  }
0x1279   :  { %5752 = vmatprep.subr.bf16.mxu1 %v6516_v27 }
0x127a   :  { %4901 = vmatprep.mubr.bf16.mxu1 %v4550_v45  ;;  %v6133_v45 = vld [vmem:[%s8253_s7 + $0x18] sm:$0xff]  }
0x127b   :  { %4902 = vmatmul.mubr.bf16.gmra.mrb[72].mxu1 %v4549_v41 }
0x127c   :  { %5766 = vmatprep.mubr.msk.bf16.mxu1 %vm6517_vm7, %v6516_v27  ;;  %5753 = vmatpush3.bf16.msra.mxu1 %v6131_v32 }
0x127d   :  { %5754 = vmatprep.subr.bf16.mxu1 %v6516_v27 }
0x1280   :  { %5755 = vmatpush3.bf16.msra.mxu1 %v6132_v19 }
0x1281   :  { %5756 = vmatprep.subr.bf16.mxu1 %v6516_v27 }
0x1284   :  { %5757 = vmatpush3.bf16.msra.mxu1 %v6133_v45 }
0x1285   :  { %5758 = vmatprep.subr.bf16.mxu1 %v6516_v27 }
0x131e   :  { %v5562_v28 = vpop.f32.mrb[76].mxu0 }
0x131f   :  { %v5563_v0 = vpop.f32.mrb[77].mxu0 }
0x1320   :  { %v5564_v37 = vadd.f32 %v5563_v0, %v5562_v28  ;;  %v5565_v21 = vpop.f32.mrb[78].mxu0  ;;  %v6134_v28 = vld [vmem:[%s8253_s7 + $0x20] sm:$0xff]  }
0x1321   :  { %v5566_v14 = vpop.f32.mrb[79].mxu0  ;;  %5759 = vmatpush3.bf16.msra.mxu1 %v6134_v28 }
0x1322   :  { %v5590_v12 = vpop.f32.mrb[68].mxu1  ;;  %v4847_v30 = vadd.f32 %v5564_v37, %v4619_v53  ;;  %v5567_v36 = vadd.f32 %v5566_v14, %v5565_v21  ;;  %5760 = vmatprep.subr.bf16.mxu1 %v6516_v27 }
0x1323   :  { %v5591_v10 = vpop.f32.mrb[69].mxu1 }
0x1324   :  { %v5592_v58 = vadd.f32 %v5591_v10, %v5590_v12  ;;  %v5593_v42 = vpop.f32.mrb[70].mxu1  ;;  %v4850_v46 = vadd.f32 %v5567_v36, %v4619_v53  ;;  %v8350_v36 = vld [vmem:[#allocation13_spill] sm:$0xff] }
0x1325   :  { %v5594_v11 = vpop.f32.mrb[71].mxu1  ;;  %5761 = vmatpush3.bf16.msra.mxu1 %v6135_v55  ;;  %v4961_v10 = vrot.slane %v8170_v57, %v8350_v36 }
0x1326   :  { %v4896_v52 = vadd.f32 %v5592_v58, %v4847_v30  ;;  %v5595_v33 = vadd.f32 %v5594_v11, %v5593_v42  ;;  %5762 = vmatprep.subr.bf16.mxu1 %v6516_v27 }
0x1328   :  { %v4899_v15 = vadd.f32 %v5595_v33, %v4850_v46  ;;  %v4910_v63 = vadd.f32 %v4896_v52, %v8346_v34  ;;  %v8351_v33 = vld [vmem:[#allocation14_spill] sm:$0xff] }
0x132a   :  { %4914 = vadd.xlane.f32.xlu1 %v4910_v63  ;;  %v4911_v47 = vadd.f32 %v4899_v15, %v8347_v8  ;;  %v4969_v15 = vrot.slane %v8170_v57, %v8351_v33  ;;  %v8353_v57 = vld [vmem:[#allocation16_spill] sm:$0xff] }
0x132c   :  { %4916 = vadd.xlane.f32.xlu0 %v4911_v47 }
0x1348   :  { %v5568_v31 = vpop.f32.mrb[80].mxu0 }
0x1349   :  { %v5569_v26 = vpop.f32.mrb[81].mxu0 }
0x134a   :  { %v5570_v25 = vadd.f32 %v5569_v26, %v5568_v31  ;;  %v5571_v22 = vpop.f32.mrb[82].mxu0 }
0x134b   :  { %v5572_v13 = vpop.f32.mrb[83].mxu0 }
0x134c   :  { %v5573_v59 = vadd.f32 %v5572_v13, %v5571_v22  ;;  %v4855_v61 = vadd.f32 %v5570_v25, %v4619_v53 }
0x134e   :  { %v5596_v23 = vpop.f32.mrb[72].mxu1  ;;  %v4858_v54 = vadd.f32 %v5573_v59, %v4619_v53  ;;  %v6136_v53 = vld [vmem:[%s8253_s7 + $0x30] sm:$0xff]   ;;  %v8352_v59 = vld [vmem:[#allocation9_spill] sm:$0xff] }
0x134f   :  { %v5597_v38 = vpop.f32.mrb[73].mxu1  ;;  %5763 = vmatpush3.bf16.msra.mxu1 %v6136_v53  ;;  %vm4974_vm8 = vcmp.ge.s32.totalorder %v8352_v59, 4  ;;  %vm4975_vm9 = vcmp.lt.s32.totalorder %v8352_v59, 6  ;;  %vm4977_vm10 = vcmp.lt.s32.totalorder %v8352_v59, 4  ;;  %vm4978_vm11 = vcmp.eq.s32.totalorder %v8353_v57, %v8352_v59 }
0x1350   :  { %v5598_v60 = vadd.f32 %v5597_v38, %v5596_v23  ;;  %v5599_v3 = vpop.f32.mrb[74].mxu1  ;;  %5764 = vmatprep.subr.bf16.mxu1 %v6516_v27  ;;  %v5415_v23 = vadd.s32 4294967292, %v8352_v59  ;;  %vm4976_vm12 = vmand %vm4974_vm8, %vm4975_vm9 }
0x1351   :  { %v5600_v24 = vpop.f32.mrb[75].mxu1  ;;  %vm4979_vm14 = vmand %vm4977_vm10, %vm4978_vm11 }
0x1352   :  { %v4904_v50 = vadd.f32 %v5598_v60, %v4855_v61  ;;  %v5601_v43 = vadd.f32 %v5600_v24, %v5599_v3  ;;  %vm4982_vm13 = vcmp.eq.s32.totalorder %v8353_v57, %v5415_v23  ;;  %v4986_v38 = vadd.s32 2, %v5415_v23 }
0x1353   :  { %vm4983_vm15 = vmand %vm4976_vm12, %vm4982_vm13  ;;  %v4980_v60 = vsel %vm4979_vm14, 0.125, %v6516_v27 }
0x1354   :  { %v4907_v29 = vadd.f32 %v5601_v43, %v4858_v54  ;;  %v4912_v41 = vadd.f32 %v4904_v50, %v8348_v51  ;;  %vm4987_vm1 = vcmp.eq.s32.totalorder %v8353_v57, %v4986_v38  ;;  %v4984_v3 = vsel %vm4983_vm15, 0.125, %v6516_v27 }
0x1355   :  { %vm4988_vm2 = vmand %vm4976_vm12, %vm4987_vm1  ;;  %v4985_v43 = vadd.f32 %v4984_v3, %v4980_v60 }
0x1356   :  { %4918 = vadd.xlane.f32.xlu1 %v4912_v41  ;;  %v4913_v9 = vadd.f32 %v4907_v29, %v8349_v2 }
0x1358   :  { %4920 = vadd.xlane.f32.xlu0 %v4913_v9 }
0x13b7   :  { %v4915_v40 = vpop.xlane.xlu1 %4914 }
0x13b8   :  { %v4922_v18 = vmul.f32 0.0078125, %v4915_v40 }
0x13b9   :  { %v4917_v56 = vpop.xlane.xlu0 %4916 }
0x13ba   :  { %v4926_v17 = vsub.f32 %v4910_v63, %v4922_v18  ;;  %v4923_v39 = vmul.f32 0.0078125, %v4917_v56 }
0x13bc   :  { %v4927_v35 = vsub.f32 %v4911_v47, %v4923_v39  ;;  %v4930_v1 = vmul.f32 %v4926_v17, %v4926_v17  ;;  %v6137_v39 = vld [vmem:[%s8253_s7 + $0x38] sm:$0xff]  }
0x13bd   :  { %5765 = vmatpush3.bf16.msra.mxu1 %v6137_v39 }
0x13be   :  { %4934 = vadd.xlane.f32.xlu1 %v4930_v1  ;;  %v4931_v4 = vmul.f32 %v4927_v35, %v4927_v35 }
0x13c0   :  { %4936 = vadd.xlane.f32.xlu0 %v4931_v4 }
0x13e3   :  { %v4919_v5 = vpop.xlane.xlu1 %4918 }
0x13e4   :  { %v4924_v20 = vmul.f32 0.0078125, %v4919_v5 }
0x13e5   :  { %v4921_v6 = vpop.xlane.xlu0 %4920 }
0x13e6   :  { %v8178_v7 = vsub.f32 %v4912_v41, %v4924_v20  ;;  %v4925_v62 = vmul.f32 0.0078125, %v4921_v6  ;;  %v4989_v41 = vsel %vm4988_vm2, -0.125, %v6516_v27  ;;  %v5417_v6 = vld [vmem:[%s8254_s8] ss:$0 sm:$0xff] }
0x13e8   :  { %v8180_v44 = vsub.f32 %v4913_v9, %v4925_v62  ;;  %v4932_v16 = vmul.f32 %v8178_v7, %v8178_v7  ;;  %v4990_v9 = vadd.f32 %v4989_v41, %v4985_v43 }
0x13ea   :  { %4938 = vadd.xlane.f32.xlu1 %v4932_v16  ;;  %v4933_v48 = vmul.f32 %v8180_v44, %v8180_v44 }
0x13ec   :  { %4940 = vadd.xlane.f32.xlu0 %v4933_v48 }
0x144b   :  { %v4935_v0 = vpop.xlane.xlu1 %4934 }
0x144c   :  { %v4942_v37 = vmul.f32 0.0078125, %v4935_v0 }
0x144d   :  { %v4937_v21 = vpop.xlane.xlu0 %4936 }
0x144e   :  { %v4946_v14 = vadd.f32 1e-12, %v4942_v37  ;;  %v4943_v12 = vmul.f32 0.0078125, %v4937_v21 }
0x1450   :  { %6418 = vrsqrt.f32 %v4946_v14  ;;  %v4947_v30 = vadd.f32 1e-12, %v4943_v12 }
0x1452   :  { %6420 = vrsqrt.f32 %v4947_v30 }
0x145a   :  { %v6419_v58 = vpop.eup %6418 }
0x145b   :  { %v4954_v42 = vmul.f32 %v6419_v58, %v4926_v17  ;;  %v4991_v17 = vpack.c.bf16 %v4990_v9, %v4990_v9 }
0x145c   :  { %v6421_v46 = vpop.eup %6420 }
0x145d   :  { %v4955_v11 = vmul.f32 %v6421_v46, %v4927_v35  ;;  %v4962_v52 = vmul.f32 %v4961_v10, %v4954_v42 }
0x145f   :  { %v4963_v34 = vmul.f32 %v4961_v10, %v4955_v11  ;;  %v4970_v63 = vadd.f32 %v4969_v15, %v4962_v52 }
0x1461   :  { %v4971_v8 = vadd.f32 %v4969_v15, %v4963_v34 }
0x1463   :  { %v4992_v47 = vpack.c.bf16 %v4971_v8, %v4970_v63 }
0x1465   :  { %5743 = vmatpush3.bf16.msra.mxu0 %v4992_v47 }
0x1466   :  { %5744 = vmatprep.subr.bf16.mxu0 %v6516_v27 }
0x1477   :  { %v4939_v31 = vpop.xlane.xlu1 %4938 }
0x1478   :  { %v4944_v26 = vmul.f32 0.0078125, %v4939_v31 }
0x1479   :  { %v4941_v25 = vpop.xlane.xlu0 %4940 }
0x147a   :  { %v4948_v22 = vadd.f32 1e-12, %v4944_v26  ;;  %v4945_v13 = vmul.f32 0.0078125, %v4941_v25 }
0x147c   :  { %6422 = vrsqrt.f32 %v4948_v22  ;;  %v4949_v61 = vadd.f32 1e-12, %v4945_v13 }
0x147e   :  { %6424 = vrsqrt.f32 %v4949_v61 }
0x1486   :  { %v6423_v54 = vpop.eup %6422 }
0x1487   :  { %v4956_v24 = vmul.f32 %v6423_v54, %v8178_v7 }
0x1488   :  { %v6425_v50 = vpop.eup %6424 }
0x1489   :  { %v4957_v29 = vmul.f32 %v6425_v50, %v8180_v44  ;;  %v4964_v51 = vmul.f32 %v4961_v10, %v4956_v24 }
0x148b   :  { %v4965_v2 = vmul.f32 %v4961_v10, %v4957_v29  ;;  %v4972_v40 = vadd.f32 %v4969_v15, %v4964_v51 }
0x148d   :  { %v4973_v18 = vadd.f32 %v4969_v15, %v4965_v2 }
0x148f   :  { %v4993_v56 = vpack.c.bf16 %v4973_v18, %v4972_v40 }
0x1491   :  { %5745 = vmatpush3.bf16.msra.mxu0 %v4993_v56 }
0x1494   :  { %5747 = vmatmul.mubr.msk.bf16.vlgmr.msra.gmra.mrb[84].mxu0 %vm586_vm0, %v4991_v17 }
0x1567   :  { %v5031_v35 = vpop.f32.mrb[84].mxu0 }
0x1568   :  { %v5037_v1 = vpack.c.bf16 %v5031_v35, %v5031_v35  ;;  %v5748_v4 = vpop.f32.mrb[85].mxu0 }
0x1569   :  { %v5034_v5 = vpop.f32.mrb[86].mxu0 }
0x156a   :  { %v5749_v20 = vpop.f32.mrb[87].mxu0  ;;  %5767 = vmatmul.mubr.bf16.vlgmr.msra.gmra.mrb[76].mxu1 %v5037_v1 }
0x163d   :  { %v5143_v7 = vpop.f32.mrb[76].mxu1 }
0x163e   :  { %v5144_v62 = vadd.f32 %v5417_v6, %v5143_v7  ;;  %v5768_v44 = vpop.f32.mrb[77].mxu1 }
0x163f   :  { %v5146_v16 = vpop.f32.mrb[78].mxu1 }
0x1640   :  { %5149 = vst [vmem:[%s8255_s9] sm:$0xff] %v5144_v62  ;;  %v5769_v48 = vpop.f32.mrb[79].mxu1 }
0x1641   :  { %5154 = vsyncpa [#allocation3], 1 }
0x1642   :  { %5155 = vsyncpa [#allocation5], 1 }

</bundles_post_ra>
